<compile_context>
chip_gen: v7x
topology: tpu7x:2x2x1
jax: 0.10.0
libtpu: 0.0.40
codegen_flags: <defaults>
</compile_context>

<pallas_src>
import functools

import jax
import jax.numpy as jnp
from jax import lax
from jax.experimental import pallas as pl
from jax.experimental.pallas import tpu as pltpu


_VMEM_LIMIT = 48 * 1024 * 1024   # explicit scoped limit; fits v5e/v6e and v7x


# ----------------------------- helpers --------------------------------------

def _gelu_exact(x):
    """GELU(x) = 0.5*x*(1+erf(x/sqrt(2))) with an f32-accurate erf polynomial."""
    z = x * 0.70710678118654752
    a = jnp.abs(z)
    t = 1.0 / (1.0 + 0.3275911 * a)
    poly = t * (0.254829592 + t * (-0.284496736 + t * (1.421413741
               + t * (-1.453152027 + t * 1.061405429))))
    erf_abs = 1.0 - poly * jnp.exp(-a * a)
    erf = jnp.where(z >= 0.0, erf_abs, -erf_abs)
    return 0.5 * x * (1.0 + erf)


# ------------------- kernel 1: s-projection + fused depthwise conv ----------

def _s_dwconv_kernel(x_ref, ws_ref, bs_ref, wc_ref, bc_ref, o_ref, pad_ref,
                     *, H, W, k_max, p_max):
    """Per-batch image: s = x @ Ws + bs, then all-head fused depthwise conv."""
    C = o_ref.shape[-1]
    # self.s projection (bf16 MXU operands, f32 accumulation)
    s = jnp.dot(x_ref[0].astype(jnp.bfloat16), ws_ref[...],
                preferred_element_type=jnp.float32) + bs_ref[...]
    # place into the zero-padded spatial scratch (padding = p_max for all heads)
    pad_ref[...] = jnp.zeros_like(pad_ref)
    pad_ref[p_max:p_max + H, p_max:p_max + W, :] = s.reshape(H, W, C)
    # All heads at once: smaller-kernel heads have zero taps outside their
    # centered k_i x k_i window, so one k_max x k_max loop covers everything
    # with all C channels lane-dense.
    acc = jnp.zeros((H, W, C), jnp.float32)
    for dy in range(k_max):
        for dx in range(k_max):
            tap = dy * k_max + dx
            acc = acc + pad_ref[dy:dy + H, dx:dx + W, :] * wc_ref[tap:tap + 1, :]
    # bf16 store: downstream matmuls consume bf16 anyway -> halves HBM traffic
    o_ref[...] = (acc + bc_ref[...]).astype(o_ref.dtype)[None]


def s_dwconv(x, ws_bf, bs, wc_all, bc_all, H, W, k_max, p_max):
    B, N, C = x.shape
    kern = functools.partial(_s_dwconv_kernel, H=H, W=W, k_max=k_max, p_max=p_max)
    return pl.pallas_call(
        kern,
        out_shape=jax.ShapeDtypeStruct((B, H, W, C), jnp.bfloat16),
        grid=(B,),
        in_specs=[pl.BlockSpec((1, N, C), lambda b: (b, 0, 0)),
                  pl.BlockSpec(ws_bf.shape, lambda b: (0, 0)),
                  pl.BlockSpec(bs.shape, lambda b: (0, 0)),
                  pl.BlockSpec(wc_all.shape, lambda b: (0, 0)),
                  pl.BlockSpec(bc_all.shape, lambda b: (0, 0))],
        out_specs=pl.BlockSpec((1, H, W, C), lambda b: (b, 0, 0, 0)),
        scratch_shapes=[pltpu.VMEM((H + 2 * p_max, W + 2 * p_max, C), jnp.float32)],
        compiler_params=pltpu.CompilerParams(
            dimension_semantics=("parallel",),
            vmem_limit_bytes=_VMEM_LIMIT),
    )(x, ws_bf, bs, wc_all, bc_all)


# --------- kernel 2: BatchNorm statistics -> folded (scale, shift) ----------

def _bn_scale_shift_kernel(s_ref, w0_ref, b0_ref, g_ref, be_ref, o_ref,
                           *, M, eps):
    t = pl.program_id(0)
    tm = s_ref.shape[0]
    y = jnp.dot(s_ref[...], w0_ref[...],
                preferred_element_type=jnp.float32) + b0_ref[...]
    # mask rows past M (last tile when M % tm != 0)
    row = t * tm + lax.broadcasted_iota(jnp.int32, y.shape, 0)
    y = jnp.where(row < M, y, 0.0)
    part = jnp.concatenate([jnp.sum(y, axis=0, keepdims=True),
                            jnp.sum(y * y, axis=0, keepdims=True)], axis=0)

    @pl.when(t == 0)
    def _():
        o_ref[...] = jnp.zeros_like(o_ref)

    o_ref[...] += part

    # finalize on the last step: fold mean/var/gamma/beta/eps into scale+shift
    @pl.when(t == pl.num_programs(0) - 1)
    def _():
        inv_m = 1.0 / M
        mean = o_ref[0:1, :] * inv_m
        var = jnp.maximum(o_ref[1:2, :] * inv_m - mean * mean, 0.0)
        scale = g_ref[...] * lax.rsqrt(var + eps)
        shift = be_ref[...] - mean * scale
        o_ref[...] = jnp.concatenate([scale, shift], axis=0)


def bn_scale_shift(s_flat, w0_bf, b0, gamma, beta, tm, eps):
    M, C = s_flat.shape
    Ce = w0_bf.shape[1]
    kern = functools.partial(_bn_scale_shift_kernel, M=M, eps=eps)
    return pl.pallas_call(
        kern,
        out_shape=jax.ShapeDtypeStruct((2, Ce), jnp.float32),
        grid=(pl.cdiv(M, tm),),
        in_specs=[pl.BlockSpec((tm, C), lambda i: (i, 0)),
                  pl.BlockSpec(w0_bf.shape, lambda i: (0, 0)),
                  pl.BlockSpec(b0.shape, lambda i: (0, 0)),
                  pl.BlockSpec(gamma.shape, lambda i: (0, 0)),
                  pl.BlockSpec(beta.shape, lambda i: (0, 0))],
        out_specs=pl.BlockSpec((2, Ce), lambda i: (0, 0)),   # resident accumulator
        compiler_params=pltpu.CompilerParams(
            dimension_semantics=("arbitrary",),
            vmem_limit_bytes=_VMEM_LIMIT),
    )(s_flat, w0_bf, b0, gamma, beta)


# ------------------- kernel 3: fused tail (pass 2) --------------------------

def _tail_kernel(x_ref, s_ref, wv_ref, bv_ref, w0_ref, b0_ref, st_ref,
                 w1_ref, b1_ref, wp_ref, bp_ref, o_ref):
    # v = x @ Wv + bv  (computed in-kernel, never materialized in HBM)
    v = jnp.dot(x_ref[...].astype(jnp.bfloat16), wv_ref[...],
                preferred_element_type=jnp.float32) + bv_ref[...]
    # proj0: grouped 1x1 conv as dense matmul; rows pre-permuted so the
    # head-blocked channel order is consumed directly (no interleave relayout).
    # s_ref is already bf16 -> straight into the MXU.
    y = jnp.dot(s_ref[...], w0_ref[...],
                preferred_element_type=jnp.float32) + b0_ref[...]
    # BatchNorm2d (training mode), pre-folded into per-channel scale/shift
    y = y * st_ref[0:1, :] + st_ref[1:2, :]
    # GELU (exact, erf-based)
    y = _gelu_exact(y)
    # proj1: 1x1 conv == dense matmul
    y = jnp.dot(y.astype(jnp.bfloat16), w1_ref[...],
                preferred_element_type=jnp.float32) + b1_ref[...]
    # modulator * v, then final Linear projection
    y = y * v
    o_ref[...] = jnp.dot(y.astype(jnp.bfloat16), wp_ref[...],
                         preferred_element_type=jnp.float32) + bp_ref[...]


def tail(x2, s_flat, stats, kp, tm):
    M, C = x2.shape
    bcast = (kp['wv_bf'], kp['bv'], kp['w0_bf'], kp['b0'], stats,
             kp['w1_bf'], kp['b1'], kp['wp_bf'], kp['bp'])
    row_spec_x = pl.BlockSpec((tm, C), lambda i: (i, 0))
    row_spec_s = pl.BlockSpec((tm, C), lambda i: (i, 0))
    return pl.pallas_call(
        _tail_kernel,
        out_shape=jax.ShapeDtypeStruct((M, C), jnp.float32),
        grid=(pl.cdiv(M, tm),),
        in_specs=[row_spec_x, row_spec_s] +
                 [pl.BlockSpec(a.shape, lambda i: (0, 0)) for a in bcast],
        out_specs=pl.BlockSpec((tm, C), lambda i: (i, 0)),
        compiler_params=pltpu.CompilerParams(
            dimension_semantics=("parallel",),
            vmem_limit_bytes=_VMEM_LIMIT),
    )(x2, s_flat, *bcast)


# ----------------------------- forward (glue + kernels) ---------------------

def mhmc_forward(x, kp, H, W, *, row_tile=512, eps=1e-5):
    B, N, C = x.shape
    M = B * N
    tm = min(row_tile, M)
    assert tm == M or tm % 16 == 0, "row_tile must be a multiple of 16"
    s_conv = s_dwconv(x, kp['ws_bf'], kp['bs'], kp['wc_all'], kp['bc_all'],
                      H, W, kp['k_max'], kp['p_max'])
    s_flat = s_conv.reshape(M, C)     # metadata-only reshape (C stays last)
    x2 = x.reshape(M, C)
    stats = bn_scale_shift(s_flat, kp['w0_bf'], kp['b0'], kp['gamma'],
                           kp['beta'], tm, eps)                # pass 1
    out = tail(x2, s_flat, stats, kp, tm)                      # pass 2
    return out.reshape(B, N, C)


# ----------------------------- parameter preparation -------------------------

def prepare_params(params, ca_num_heads, expand_ratio):
    """One-time (init-cost) repacking of PyTorch-layout params for the kernels."""
    del expand_ratio  # implicit in w0's shape
    h = ca_num_heads
    C = params['wv'].shape[0]
    Ch = C // h
    k_max = 3 + 2 * (h - 1)
    p_max = h          # = 1 + (h - 1)

    # Fused all-head depthwise taps: zero-padded & centered to k_max x k_max,
    # channels kept head-blocked (c' = i*Ch + d, the natural Linear order).
    wc_all = jnp.zeros((k_max * k_max, C), jnp.float32)
    bc_all = jnp.zeros((1, C), jnp.float32)
    for i in range(h):
        k = 3 + 2 * i
        off = p_max - (1 + i)
        canvas = jnp.zeros((k_max, k_max, Ch), jnp.float32)
        canvas = canvas.at[off:off + k, off:off + k, :].set(
            params['conv_w'][i].reshape(k, k, Ch))
        wc_all = wc_all.at[:, i * Ch:(i + 1) * Ch].set(
            canvas.reshape(k_max * k_max, Ch))
        bc_all = bc_all.at[:, i * Ch:(i + 1) * Ch].set(params['conv_b'][i])

    # Fold the PyTorch channel interleave (c = d*h + i) into proj0's rows so the
    # kernels consume head-blocked activations (c' = i*Ch + d) directly.
    c = jnp.arange(C)
    perm = (c % h) * Ch + (c // h)
    w0_hb = jnp.zeros_like(params['w0']).at[perm].set(params['w0'])

    bf = lambda w: w.astype(jnp.bfloat16)
    return dict(
        ws_bf=bf(params['ws']), bs=params['bs'],
        wv_bf=bf(params['wv']), bv=params['bv'],
        wc_all=wc_all, bc_all=bc_all,
        w0_bf=bf(w0_hb), b0=params['b0'],
        gamma=params['gamma'], beta=params['beta'],
        w1_bf=bf(params['w1']), b1=params['b1'],
        wp_bf=bf(params['wp']), bp=params['bp'],
        k_max=k_max, p_max=p_max,
    )


# ----------------------------- pure-JAX reference ----------------------------

def mhmc_reference(x, params, H, W, ca_num_heads, expand_ratio, eps=1e-5):
    B, N, C = x.shape
    h = ca_num_heads
    Ch = C // h
    x2 = x.reshape(B * N, C)
    v = x2 @ params['wv'] + params['bv']
    s = (x2 @ params['ws'] + params['bs']).reshape(B, H, W, h, Ch)
    outs = []
    for i in range(h):
        k = 3 + 2 * i
        p = 1 + i
        si = s[:, :, :, i, :]
        kern = params['conv_w'][i].reshape(k, k, 1, Ch)
        oi = lax.conv_general_dilated(
            si, kern, window_strides=(1, 1), padding=[(p, p), (p, p)],
            dimension_numbers=('NHWC', 'HWIO', 'NHWC'),
            feature_group_count=Ch) + params['conv_b'][i].reshape(1, 1, 1, Ch)
        outs.append(oi)
    s_flat = jnp.stack(outs, axis=-1).reshape(B, H, W, C).reshape(B * N, C)
    y = s_flat @ params['w0'] + params['b0']
    mean = jnp.mean(y, axis=0, keepdims=True)
    var = jnp.mean((y - mean) ** 2, axis=0, keepdims=True)
    y = (y - mean) / jnp.sqrt(var + eps) * params['gamma'] + params['beta']
    y = _gelu_exact(y)
    y = y @ params['w1'] + params['b1']
    y = y * v
    y = y @ params['wp'] + params['bp']
    return y.reshape(B, N, C)


# ----------------------------- deterministic parameter init ------------------

def init_params(key, dim, ca_num_heads=4, expand_ratio=2):
    h = ca_num_heads
    Ch = dim // h                      # split_groups
    e = expand_ratio
    ks = jax.random.split(key, 12)

    # Linear layers (weights stored pre-transposed as (in, out))
    wv = jax.random.normal(ks[0], (dim, dim), jnp.float32) * 0.02
    bv = jax.random.normal(ks[1], (1, dim), jnp.float32) * 0.02
    ws = jax.random.normal(ks[2], (dim, dim), jnp.float32) * 0.02
    bs = jax.random.normal(ks[3], (1, dim), jnp.float32) * 0.02
    wp = jax.random.normal(ks[4], (dim, dim), jnp.float32) * 0.02
    bp = jax.random.normal(ks[5], (1, dim), jnp.float32) * 0.02

    # Depthwise convs local_conv_{i+1}: kernel 3+2i, groups = dim//h (per-channel)
    conv_w, conv_b = [], []
    for i in range(h):
        k = 3 + 2 * i
        std = (2.0 / (k * k)) ** 0.5     # fan_out // groups == k*k
        conv_w.append(jax.random.normal(jax.random.fold_in(ks[6], i),
                                        (k * k, Ch), jnp.float32) * std)
        conv_b.append(jax.random.normal(jax.random.fold_in(ks[7], i),
                                        (1, Ch), jnp.float32) * 0.02)

    # proj0: Conv2d(dim, dim*e, 1, groups=split_groups) -> block-diagonal dense
    w0_pt = jax.random.normal(ks[8], (dim * e, h), jnp.float32) * (2.0 / (h * e)) ** 0.5
    w0 = jnp.zeros((dim, dim * e), jnp.float32)
    for g in range(Ch):
        w0 = w0.at[g * h:(g + 1) * h, g * h * e:(g + 1) * h * e].set(
            w0_pt[g * h * e:(g + 1) * h * e, :].T)
    b0 = jax.random.normal(ks[9], (1, dim * e), jnp.float32) * 0.02

    # BatchNorm2d(dim*e)
    gamma = 1.0 + 0.1 * jax.random.normal(ks[10], (1, dim * e), jnp.float32)
    beta = 0.1 * jax.random.normal(ks[11], (1, dim * e), jnp.float32)

    # proj1: Conv2d(dim*e, dim, 1) -> dense (dim*e, dim)
    w1 = (jax.random.normal(jax.random.fold_in(ks[8], 99), (dim, dim * e),
                            jnp.float32) * (2.0 / dim) ** 0.5).T
    b1 = jax.random.normal(jax.random.fold_in(ks[9], 99), (1, dim),
                           jnp.float32) * 0.02

    return dict(wv=wv, bv=bv, ws=ws, bs=bs, wp=wp, bp=bp,
                conv_w=conv_w, conv_b=conv_b,
                w0=w0, b0=b0, gamma=gamma, beta=beta, w1=w1, b1=b1)


# ----------------------------- main ------------------------------------------

if __name__ == "__main__":
    B, H, W = 2, 8, 8
    dim = 16
    ca_num_heads = 4
    expand_ratio = 2
    N = H * W

    key = jax.random.PRNGKey(0)
    kx, kp_key = jax.random.split(key)
    x = jax.random.normal(kx, (B, N, dim), dtype=jnp.float32)
    params = init_params(kp_key, dim, ca_num_heads, expand_ratio)
    kparams = prepare_params(params, ca_num_heads, expand_ratio)

    # row_tile=64 -> two row tiles, exercising the two-pass-BN accumulation path
    # (production sizes would use 256-512).
    out = mhmc_forward(x, kparams, H, W, row_tile=64)
    out = jax.block_until_ready(out)
    assert out.shape == (B, N, dim)

    ref = mhmc_reference(x, params, H, W, ca_num_heads, expand_ratio)
    err = float(jnp.max(jnp.abs(out - ref)))
    # bf16 MXU operands (f32 accumulation) vs the f32 reference: budget 3e-3.
    if not err < 3e-3:
        raise AssertionError(f"kernel/reference mismatch: max abs err {err}")

    print("KERNEL_OK")
</pallas_src>

<mosaic_0001>
module attributes {stable_mosaic.version = 11 : i64} {
  func.func @_s_dwconv_kernel(%arg0: i32, %arg1: memref<1x64x16xf32, #tpu.memory_space<vmem>>, %arg2: memref<16x16xbf16, #tpu.memory_space<vmem>>, %arg3: memref<1x16xf32, #tpu.memory_space<vmem>>, %arg4: memref<81x16xf32, #tpu.memory_space<vmem>>, %arg5: memref<1x16xf32, #tpu.memory_space<vmem>>, %arg6: memref<1x8x8x16xbf16, #tpu.memory_space<vmem>>, %arg7: memref<16x16x16xf32, #tpu.memory_space<vmem>>) attributes {dimension_semantics = [#tpu.dimension_semantics<parallel>], iteration_bounds = array<i64: 2>, scalar_prefetch = 0 : i64, scratch_operands = 1 : i64, tpu.core_type = #tpu.core_type<tc>, window_params = [{transform_indices = @transform_0, window_bounds = array<i64: 1, 64, 16>}, {pipeline_mode = #tpu.pipeline_mode<synchronous>, transform_indices = @transform_1, window_bounds = array<i64: 16, 16>}, {pipeline_mode = #tpu.pipeline_mode<synchronous>, transform_indices = @transform_2, window_bounds = array<i64: 1, 16>}, {pipeline_mode = #tpu.pipeline_mode<synchronous>, transform_indices = @transform_3, window_bounds = array<i64: 81, 16>}, {pipeline_mode = #tpu.pipeline_mode<synchronous>, transform_indices = @transform_4, window_bounds = array<i64: 1, 16>}, {transform_indices = @transform_5, window_bounds = array<i64: 1, 8, 8, 16>}]} {
    %c0 = arith.constant 0 : index
    %c0_0 = arith.constant 0 : index
    %c0_1 = arith.constant 0 : index
    %0 = vector.load %arg1[%c0, %c0_0, %c0_1] : memref<1x64x16xf32, #tpu.memory_space<vmem>>, vector<1x64x16xf32>
    %1 = vector.shape_cast %0 : vector<1x64x16xf32> to vector<64x16xf32>
    %2 = arith.truncf %1 : vector<64x16xf32> to vector<64x16xbf16>
    %c0_2 = arith.constant 0 : index
    %c0_3 = arith.constant 0 : index
    %3 = vector.load %arg2[%c0_2, %c0_3] : memref<16x16xbf16, #tpu.memory_space<vmem>>, vector<16x16xbf16>
    %cst = arith.constant dense<0.000000e+00> : vector<64x16xf32>
    %4 = tpu.matmul %2, %3, %cst {dimension_numbers = #tpu.dot_dimension_numbers<[1], [0], [0], [1], [0, 0, 1, 1], [], []>} : vector<64x16xbf16>, vector<16x16xbf16>, vector<64x16xf32> -> vector<64x16xf32>
    %c0_4 = arith.constant 0 : index
    %c0_5 = arith.constant 0 : index
    %5 = vector.load %arg3[%c0_4, %c0_5] : memref<1x16xf32, #tpu.memory_space<vmem>>, vector<1x16xf32>
    %6 = vector.broadcast %5 : vector<1x16xf32> to vector<64x16xf32>
    %7 = arith.addf %4, %6 : vector<64x16xf32>
    %cst_6 = arith.constant 0.000000e+00 : f32
    %8 = vector.broadcast %cst_6 : f32 to vector<16x16x16xf32>
    %c0_7 = arith.constant 0 : index
    %c0_8 = arith.constant 0 : index
    %c0_9 = arith.constant 0 : index
    %9 = vector.load %arg7[%c0_7, %c0_8, %c0_9] : memref<16x16x16xf32, #tpu.memory_space<vmem>>, vector<16x16x16xf32>
    tpu.vector_store %arg7[%c0_7, %c0_8, %c0_9], %8 {strides = array<i32>} : memref<16x16x16xf32, #tpu.memory_space<vmem>>, vector<16x16x16xf32>,
    %10 = vector.shape_cast %7 : vector<64x16xf32> to vector<8x8x16xf32>
    %c4 = arith.constant 4 : index
    %c4_10 = arith.constant 4 : index
    %c0_11 = arith.constant 0 : index
    %11 = vector.load %arg7[%c4, %c4_10, %c0_11] : memref<16x16x16xf32, #tpu.memory_space<vmem>>, vector<8x8x16xf32>
    tpu.vector_store %arg7[%c4, %c4_10, %c0_11], %10 {strides = array<i32>} : memref<16x16x16xf32, #tpu.memory_space<vmem>>, vector<8x8x16xf32>,
    %cst_12 = arith.constant 0.000000e+00 : f32
    %12 = vector.broadcast %cst_12 : f32 to vector<8x8x16xf32>
    %c0_13 = arith.constant 0 : index
    %c0_14 = arith.constant 0 : index
    %c0_15 = arith.constant 0 : index
    %13 = vector.load %arg7[%c0_13, %c0_14, %c0_15] : memref<16x16x16xf32, #tpu.memory_space<vmem>>, vector<8x8x16xf32>
    %c0_16 = arith.constant 0 : index
    %c0_17 = arith.constant 0 : index
    %14 = vector.load %arg4[%c0_16, %c0_17] : memref<81x16xf32, #tpu.memory_space<vmem>>, vector<1x16xf32>
    %15 = vector.shape_cast %14 : vector<1x16xf32> to vector<1x1x16xf32>
    %16 = vector.broadcast %15 : vector<1x1x16xf32> to vector<8x8x16xf32>
    %17 = arith.mulf %13, %16 : vector<8x8x16xf32>
    %18 = arith.addf %12, %17 : vector<8x8x16xf32>
    %c0_18 = arith.constant 0 : index
    %c1 = arith.constant 1 : index
    %c0_19 = arith.constant 0 : index
    %19 = vector.load %arg7[%c0_18, %c1, %c0_19] : memref<16x16x16xf32, #tpu.memory_space<vmem>>, vector<8x8x16xf32>
    %c1_20 = arith.constant 1 : index
    %c0_21 = arith.constant 0 : index
    %20 = vector.load %arg4[%c1_20, %c0_21] : memref<81x16xf32, #tpu.memory_space<vmem>>, vector<1x16xf32>
    %21 = vector.shape_cast %20 : vector<1x16xf32> to vector<1x1x16xf32>
    %22 = vector.broadcast %21 : vector<1x1x16xf32> to vector<8x8x16xf32>
    %23 = arith.mulf %19, %22 : vector<8x8x16xf32>
    %24 = arith.addf %18, %23 : vector<8x8x16xf32>
    %c0_22 = arith.constant 0 : index
    %c2 = arith.constant 2 : index
    %c0_23 = arith.constant 0 : index
    %25 = vector.load %arg7[%c0_22, %c2, %c0_23] : memref<16x16x16xf32, #tpu.memory_space<vmem>>, vector<8x8x16xf32>
    %c2_24 = arith.constant 2 : index
    %c0_25 = arith.constant 0 : index
    %26 = vector.load %arg4[%c2_24, %c0_25] : memref<81x16xf32, #tpu.memory_space<vmem>>, vector<1x16xf32>
    %27 = vector.shape_cast %26 : vector<1x16xf32> to vector<1x1x16xf32>
    %28 = vector.broadcast %27 : vector<1x1x16xf32> to vector<8x8x16xf32>
    %29 = arith.mulf %25, %28 : vector<8x8x16xf32>
    %30 = arith.addf %24, %29 : vector<8x8x16xf32>
    %c0_26 = arith.constant 0 : index
    %c3 = arith.constant 3 : index
    %c0_27 = arith.constant 0 : index
    %31 = vector.load %arg7[%c0_26, %c3, %c0_27] : memref<16x16x16xf32, #tpu.memory_space<vmem>>, vector<8x8x16xf32>
    %c3_28 = arith.constant 3 : index
    %c0_29 = arith.constant 0 : index
    %32 = vector.load %arg4[%c3_28, %c0_29] : memref<81x16xf32, #tpu.memory_space<vmem>>, vector<1x16xf32>
    %33 = vector.shape_cast %32 : vector<1x16xf32> to vector<1x1x16xf32>
    %34 = vector.broadcast %33 : vector<1x1x16xf32> to vector<8x8x16xf32>
    %35 = arith.mulf %31, %34 : vector<8x8x16xf32>
    %36 = arith.addf %30, %35 : vector<8x8x16xf32>
    %c0_30 = arith.constant 0 : index
    %c4_31 = arith.constant 4 : index
    %c0_32 = arith.constant 0 : index
    %37 = vector.load %arg7[%c0_30, %c4_31, %c0_32] : memref<16x16x16xf32, #tpu.memory_space<vmem>>, vector<8x8x16xf32>
    %c4_33 = arith.constant 4 : index
    %c0_34 = arith.constant 0 : index
    %38 = vector.load %arg4[%c4_33, %c0_34] : memref<81x16xf32, #tpu.memory_space<vmem>>, vector<1x16xf32>
    %39 = vector.shape_cast %38 : vector<1x16xf32> to vector<1x1x16xf32>
    %40 = vector.broadcast %39 : vector<1x1x16xf32> to vector<8x8x16xf32>
    %41 = arith.mulf %37, %40 : vector<8x8x16xf32>
    %42 = arith.addf %36, %41 : vector<8x8x16xf32>
    %c0_35 = arith.constant 0 : index
    %c5 = arith.constant 5 : index
    %c0_36 = arith.constant 0 : index
    %43 = vector.load %arg7[%c0_35, %c5, %c0_36] : memref<16x16x16xf32, #tpu.memory_space<vmem>>, vector<8x8x16xf32>
    %c5_37 = arith.constant 5 : index
    %c0_38 = arith.constant 0 : index
    %44 = vector.load %arg4[%c5_37, %c0_38] : memref<81x16xf32, #tpu.memory_space<vmem>>, vector<1x16xf32>
    %45 = vector.shape_cast %44 : vector<1x16xf32> to vector<1x1x16xf32>
    %46 = vector.broadcast %45 : vector<1x1x16xf32> to vector<8x8x16xf32>
    %47 = arith.mulf %43, %46 : vector<8x8x16xf32>
    %48 = arith.addf %42, %47 : vector<8x8x16xf32>
    %c0_39 = arith.constant 0 : index
    %c6 = arith.constant 6 : index
    %c0_40 = arith.constant 0 : index
    %49 = vector.load %arg7[%c0_39, %c6, %c0_40] : memref<16x16x16xf32, #tpu.memory_space<vmem>>, vector<8x8x16xf32>
    %c6_41 = arith.constant 6 : index
    %c0_42 = arith.constant 0 : index
    %50 = vector.load %arg4[%c6_41, %c0_42] : memref<81x16xf32, #tpu.memory_space<vmem>>, vector<1x16xf32>
    %51 = vector.shape_cast %50 : vector<1x16xf32> to vector<1x1x16xf32>
    %52 = vector.broadcast %51 : vector<1x1x16xf32> to vector<8x8x16xf32>
    %53 = arith.mulf %49, %52 : vector<8x8x16xf32>
    %54 = arith.addf %48, %53 : vector<8x8x16xf32>
    %c0_43 = arith.constant 0 : index
    %c7 = arith.constant 7 : index
    %c0_44 = arith.constant 0 : index
    %55 = vector.load %arg7[%c0_43, %c7, %c0_44] : memref<16x16x16xf32, #tpu.memory_space<vmem>>, vector<8x8x16xf32>
    %c7_45 = arith.constant 7 : index
    %c0_46 = arith.constant 0 : index
    %56 = vector.load %arg4[%c7_45, %c0_46] : memref<81x16xf32, #tpu.memory_space<vmem>>, vector<1x16xf32>
    %57 = vector.shape_cast %56 : vector<1x16xf32> to vector<1x1x16xf32>
    %58 = vector.broadcast %57 : vector<1x1x16xf32> to vector<8x8x16xf32>
    %59 = arith.mulf %55, %58 : vector<8x8x16xf32>
    %60 = arith.addf %54, %59 : vector<8x8x16xf32>
    %c0_47 = arith.constant 0 : index
    %c8 = arith.constant 8 : index
    %c0_48 = arith.constant 0 : index
    %61 = vector.load %arg7[%c0_47, %c8, %c0_48] : memref<16x16x16xf32, #tpu.memory_space<vmem>>, vector<8x8x16xf32>
    %c8_49 = arith.constant 8 : index
    %c0_50 = arith.constant 0 : index
    %62 = vector.load %arg4[%c8_49, %c0_50] : memref<81x16xf32, #tpu.memory_space<vmem>>, vector<1x16xf32>
    %63 = vector.shape_cast %62 : vector<1x16xf32> to vector<1x1x16xf32>
    %64 = vector.broadcast %63 : vector<1x1x16xf32> to vector<8x8x16xf32>
    %65 = arith.mulf %61, %64 : vector<8x8x16xf32>
    %66 = arith.addf %60, %65 : vector<8x8x16xf32>
    %c1_51 = arith.constant 1 : index
    %c0_52 = arith.constant 0 : index
    %c0_53 = arith.constant 0 : index
    %67 = vector.load %arg7[%c1_51, %c0_52, %c0_53] : memref<16x16x16xf32, #tpu.memory_space<vmem>>, vector<8x8x16xf32>
    %c9 = arith.constant 9 : index
    %c0_54 = arith.constant 0 : index
    %68 = vector.load %arg4[%c9, %c0_54] : memref<81x16xf32, #tpu.memory_space<vmem>>, vector<1x16xf32>
    %69 = vector.shape_cast %68 : vector<1x16xf32> to vector<1x1x16xf32>
    %70 = vector.broadcast %69 : vector<1x1x16xf32> to vector<8x8x16xf32>
    %71 = arith.mulf %67, %70 : vector<8x8x16xf32>
    %72 = arith.addf %66, %71 : vector<8x8x16xf32>
    %c1_55 = arith.constant 1 : index
    %c1_56 = arith.constant 1 : index
    %c0_57 = arith.constant 0 : index
    %73 = vector.load %arg7[%c1_55, %c1_56, %c0_57] : memref<16x16x16xf32, #tpu.memory_space<vmem>>, vector<8x8x16xf32>
    %c10 = arith.constant 10 : index
    %c0_58 = arith.constant 0 : index
    %74 = vector.load %arg4[%c10, %c0_58] : memref<81x16xf32, #tpu.memory_space<vmem>>, vector<1x16xf32>
    %75 = vector.shape_cast %74 : vector<1x16xf32> to vector<1x1x16xf32>
    %76 = vector.broadcast %75 : vector<1x1x16xf32> to vector<8x8x16xf32>
    %77 = arith.mulf %73, %76 : vector<8x8x16xf32>
    %78 = arith.addf %72, %77 : vector<8x8x16xf32>
    %c1_59 = arith.constant 1 : index
    %c2_60 = arith.constant 2 : index
    %c0_61 = arith.constant 0 : index
    %79 = vector.load %arg7[%c1_59, %c2_60, %c0_61] : memref<16x16x16xf32, #tpu.memory_space<vmem>>, vector<8x8x16xf32>
    %c11 = arith.constant 11 : index
    %c0_62 = arith.constant 0 : index
    %80 = vector.load %arg4[%c11, %c0_62] : memref<81x16xf32, #tpu.memory_space<vmem>>, vector<1x16xf32>
    %81 = vector.shape_cast %80 : vector<1x16xf32> to vector<1x1x16xf32>
    %82 = vector.broadcast %81 : vector<1x1x16xf32> to vector<8x8x16xf32>
    %83 = arith.mulf %79, %82 : vector<8x8x16xf32>
    %84 = arith.addf %78, %83 : vector<8x8x16xf32>
    %c1_63 = arith.constant 1 : index
    %c3_64 = arith.constant 3 : index
    %c0_65 = arith.constant 0 : index
    %85 = vector.load %arg7[%c1_63, %c3_64, %c0_65] : memref<16x16x16xf32, #tpu.memory_space<vmem>>, vector<8x8x16xf32>
    %c12 = arith.constant 12 : index
    %c0_66 = arith.constant 0 : index
    %86 = vector.load %arg4[%c12, %c0_66] : memref<81x16xf32, #tpu.memory_space<vmem>>, vector<1x16xf32>
    %87 = vector.shape_cast %86 : vector<1x16xf32> to vector<1x1x16xf32>
    %88 = vector.broadcast %87 : vector<1x1x16xf32> to vector<8x8x16xf32>
    %89 = arith.mulf %85, %88 : vector<8x8x16xf32>
    %90 = arith.addf %84, %89 : vector<8x8x16xf32>
    %c1_67 = arith.constant 1 : index
    %c4_68 = arith.constant 4 : index
    %c0_69 = arith.constant 0 : index
    %91 = vector.load %arg7[%c1_67, %c4_68, %c0_69] : memref<16x16x16xf32, #tpu.memory_space<vmem>>, vector<8x8x16xf32>
    %c13 = arith.constant 13 : index
    %c0_70 = arith.constant 0 : index
    %92 = vector.load %arg4[%c13, %c0_70] : memref<81x16xf32, #tpu.memory_space<vmem>>, vector<1x16xf32>
    %93 = vector.shape_cast %92 : vector<1x16xf32> to vector<1x1x16xf32>
    %94 = vector.broadcast %93 : vector<1x1x16xf32> to vector<8x8x16xf32>
    %95 = arith.mulf %91, %94 : vector<8x8x16xf32>
    %96 = arith.addf %90, %95 : vector<8x8x16xf32>
    %c1_71 = arith.constant 1 : index
    %c5_72 = arith.constant 5 : index
    %c0_73 = arith.constant 0 : index
    %97 = vector.load %arg7[%c1_71, %c5_72, %c0_73] : memref<16x16x16xf32, #tpu.memory_space<vmem>>, vector<8x8x16xf32>
    %c14 = arith.constant 14 : index
    %c0_74 = arith.constant 0 : index
    %98 = vector.load %arg4[%c14, %c0_74] : memref<81x16xf32, #tpu.memory_space<vmem>>, vector<1x16xf32>
    %99 = vector.shape_cast %98 : vector<1x16xf32> to vector<1x1x16xf32>
    %100 = vector.broadcast %99 : vector<1x1x16xf32> to vector<8x8x16xf32>
    %101 = arith.mulf %97, %100 : vector<8x8x16xf32>
    %102 = arith.addf %96, %101 : vector<8x8x16xf32>
    %c1_75 = arith.constant 1 : index
    %c6_76 = arith.constant 6 : index
    %c0_77 = arith.constant 0 : index
    %103 = vector.load %arg7[%c1_75, %c6_76, %c0_77] : memref<16x16x16xf32, #tpu.memory_space<vmem>>, vector<8x8x16xf32>
    %c15 = arith.constant 15 : index
    %c0_78 = arith.constant 0 : index
    %104 = vector.load %arg4[%c15, %c0_78] : memref<81x16xf32, #tpu.memory_space<vmem>>, vector<1x16xf32>
    %105 = vector.shape_cast %104 : vector<1x16xf32> to vector<1x1x16xf32>
    %106 = vector.broadcast %105 : vector<1x1x16xf32> to vector<8x8x16xf32>
    %107 = arith.mulf %103, %106 : vector<8x8x16xf32>
    %108 = arith.addf %102, %107 : vector<8x8x16xf32>
    %c1_79 = arith.constant 1 : index
    %c7_80 = arith.constant 7 : index
    %c0_81 = arith.constant 0 : index
    %109 = vector.load %arg7[%c1_79, %c7_80, %c0_81] : memref<16x16x16xf32, #tpu.memory_space<vmem>>, vector<8x8x16xf32>
    %c16 = arith.constant 16 : index
    %c0_82 = arith.constant 0 : index
    %110 = vector.load %arg4[%c16, %c0_82] : memref<81x16xf32, #tpu.memory_space<vmem>>, vector<1x16xf32>
    %111 = vector.shape_cast %110 : vector<1x16xf32> to vector<1x1x16xf32>
    %112 = vector.broadcast %111 : vector<1x1x16xf32> to vector<8x8x16xf32>
    %113 = arith.mulf %109, %112 : vector<8x8x16xf32>
    %114 = arith.addf %108, %113 : vector<8x8x16xf32>
    %c1_83 = arith.constant 1 : index
    %c8_84 = arith.constant 8 : index
    %c0_85 = arith.constant 0 : index
    %115 = vector.load %arg7[%c1_83, %c8_84, %c0_85] : memref<16x16x16xf32, #tpu.memory_space<vmem>>, vector<8x8x16xf32>
    %c17 = arith.constant 17 : index
    %c0_86 = arith.constant 0 : index
    %116 = vector.load %arg4[%c17, %c0_86] : memref<81x16xf32, #tpu.memory_space<vmem>>, vector<1x16xf32>
    %117 = vector.shape_cast %116 : vector<1x16xf32> to vector<1x1x16xf32>
    %118 = vector.broadcast %117 : vector<1x1x16xf32> to vector<8x8x16xf32>
    %119 = arith.mulf %115, %118 : vector<8x8x16xf32>
    %120 = arith.addf %114, %119 : vector<8x8x16xf32>
    %c2_87 = arith.constant 2 : index
    %c0_88 = arith.constant 0 : index
    %c0_89 = arith.constant 0 : index
    %121 = vector.load %arg7[%c2_87, %c0_88, %c0_89] : memref<16x16x16xf32, #tpu.memory_space<vmem>>, vector<8x8x16xf32>
    %c18 = arith.constant 18 : index
    %c0_90 = arith.constant 0 : index
    %122 = vector.load %arg4[%c18, %c0_90] : memref<81x16xf32, #tpu.memory_space<vmem>>, vector<1x16xf32>
    %123 = vector.shape_cast %122 : vector<1x16xf32> to vector<1x1x16xf32>
    %124 = vector.broadcast %123 : vector<1x1x16xf32> to vector<8x8x16xf32>
    %125 = arith.mulf %121, %124 : vector<8x8x16xf32>
    %126 = arith.addf %120, %125 : vector<8x8x16xf32>
    %c2_91 = arith.constant 2 : index
    %c1_92 = arith.constant 1 : index
    %c0_93 = arith.constant 0 : index
    %127 = vector.load %arg7[%c2_91, %c1_92, %c0_93] : memref<16x16x16xf32, #tpu.memory_space<vmem>>, vector<8x8x16xf32>
    %c19 = arith.constant 19 : index
    %c0_94 = arith.constant 0 : index
    %128 = vector.load %arg4[%c19, %c0_94] : memref<81x16xf32, #tpu.memory_space<vmem>>, vector<1x16xf32>
    %129 = vector.shape_cast %128 : vector<1x16xf32> to vector<1x1x16xf32>
    %130 = vector.broadcast %129 : vector<1x1x16xf32> to vector<8x8x16xf32>
    %131 = arith.mulf %127, %130 : vector<8x8x16xf32>
    %132 = arith.addf %126, %131 : vector<8x8x16xf32>
    %c2_95 = arith.constant 2 : index
    %c2_96 = arith.constant 2 : index
    %c0_97 = arith.constant 0 : index
    %133 = vector.load %arg7[%c2_95, %c2_96, %c0_97] : memref<16x16x16xf32, #tpu.memory_space<vmem>>, vector<8x8x16xf32>
    %c20 = arith.constant 20 : index
    %c0_98 = arith.constant 0 : index
    %134 = vector.load %arg4[%c20, %c0_98] : memref<81x16xf32, #tpu.memory_space<vmem>>, vector<1x16xf32>
    %135 = vector.shape_cast %134 : vector<1x16xf32> to vector<1x1x16xf32>
    %136 = vector.broadcast %135 : vector<1x1x16xf32> to vector<8x8x16xf32>
    %137 = arith.mulf %133, %136 : vector<8x8x16xf32>
    %138 = arith.addf %132, %137 : vector<8x8x16xf32>
    %c2_99 = arith.constant 2 : index
    %c3_100 = arith.constant 3 : index
    %c0_101 = arith.constant 0 : index
    %139 = vector.load %arg7[%c2_99, %c3_100, %c0_101] : memref<16x16x16xf32, #tpu.memory_space<vmem>>, vector<8x8x16xf32>
    %c21 = arith.constant 21 : index
    %c0_102 = arith.constant 0 : index
    %140 = vector.load %arg4[%c21, %c0_102] : memref<81x16xf32, #tpu.memory_space<vmem>>, vector<1x16xf32>
    %141 = vector.shape_cast %140 : vector<1x16xf32> to vector<1x1x16xf32>
    %142 = vector.broadcast %141 : vector<1x1x16xf32> to vector<8x8x16xf32>
    %143 = arith.mulf %139, %142 : vector<8x8x16xf32>
    %144 = arith.addf %138, %143 : vector<8x8x16xf32>
    %c2_103 = arith.constant 2 : index
    %c4_104 = arith.constant 4 : index
    %c0_105 = arith.constant 0 : index
    %145 = vector.load %arg7[%c2_103, %c4_104, %c0_105] : memref<16x16x16xf32, #tpu.memory_space<vmem>>, vector<8x8x16xf32>
    %c22 = arith.constant 22 : index
    %c0_106 = arith.constant 0 : index
    %146 = vector.load %arg4[%c22, %c0_106] : memref<81x16xf32, #tpu.memory_space<vmem>>, vector<1x16xf32>
    %147 = vector.shape_cast %146 : vector<1x16xf32> to vector<1x1x16xf32>
    %148 = vector.broadcast %147 : vector<1x1x16xf32> to vector<8x8x16xf32>
    %149 = arith.mulf %145, %148 : vector<8x8x16xf32>
    %150 = arith.addf %144, %149 : vector<8x8x16xf32>
    %c2_107 = arith.constant 2 : index
    %c5_108 = arith.constant 5 : index
    %c0_109 = arith.constant 0 : index
    %151 = vector.load %arg7[%c2_107, %c5_108, %c0_109] : memref<16x16x16xf32, #tpu.memory_space<vmem>>, vector<8x8x16xf32>
    %c23 = arith.constant 23 : index
    %c0_110 = arith.constant 0 : index
    %152 = vector.load %arg4[%c23, %c0_110] : memref<81x16xf32, #tpu.memory_space<vmem>>, vector<1x16xf32>
    %153 = vector.shape_cast %152 : vector<1x16xf32> to vector<1x1x16xf32>
    %154 = vector.broadcast %153 : vector<1x1x16xf32> to vector<8x8x16xf32>
    %155 = arith.mulf %151, %154 : vector<8x8x16xf32>
    %156 = arith.addf %150, %155 : vector<8x8x16xf32>
    %c2_111 = arith.constant 2 : index
    %c6_112 = arith.constant 6 : index
    %c0_113 = arith.constant 0 : index
    %157 = vector.load %arg7[%c2_111, %c6_112, %c0_113] : memref<16x16x16xf32, #tpu.memory_space<vmem>>, vector<8x8x16xf32>
    %c24 = arith.constant 24 : index
    %c0_114 = arith.constant 0 : index
    %158 = vector.load %arg4[%c24, %c0_114] : memref<81x16xf32, #tpu.memory_space<vmem>>, vector<1x16xf32>
    %159 = vector.shape_cast %158 : vector<1x16xf32> to vector<1x1x16xf32>
    %160 = vector.broadcast %159 : vector<1x1x16xf32> to vector<8x8x16xf32>
    %161 = arith.mulf %157, %160 : vector<8x8x16xf32>
    %162 = arith.addf %156, %161 : vector<8x8x16xf32>
    %c2_115 = arith.constant 2 : index
    %c7_116 = arith.constant 7 : index
    %c0_117 = arith.constant 0 : index
    %163 = vector.load %arg7[%c2_115, %c7_116, %c0_117] : memref<16x16x16xf32, #tpu.memory_space<vmem>>, vector<8x8x16xf32>
    %c25 = arith.constant 25 : index
    %c0_118 = arith.constant 0 : index
    %164 = vector.load %arg4[%c25, %c0_118] : memref<81x16xf32, #tpu.memory_space<vmem>>, vector<1x16xf32>
    %165 = vector.shape_cast %164 : vector<1x16xf32> to vector<1x1x16xf32>
    %166 = vector.broadcast %165 : vector<1x1x16xf32> to vector<8x8x16xf32>
    %167 = arith.mulf %163, %166 : vector<8x8x16xf32>
    %168 = arith.addf %162, %167 : vector<8x8x16xf32>
    %c2_119 = arith.constant 2 : index
    %c8_120 = arith.constant 8 : index
    %c0_121 = arith.constant 0 : index
    %169 = vector.load %arg7[%c2_119, %c8_120, %c0_121] : memref<16x16x16xf32, #tpu.memory_space<vmem>>, vector<8x8x16xf32>
    %c26 = arith.constant 26 : index
    %c0_122 = arith.constant 0 : index
    %170 = vector.load %arg4[%c26, %c0_122] : memref<81x16xf32, #tpu.memory_space<vmem>>, vector<1x16xf32>
    %171 = vector.shape_cast %170 : vector<1x16xf32> to vector<1x1x16xf32>
    %172 = vector.broadcast %171 : vector<1x1x16xf32> to vector<8x8x16xf32>
    %173 = arith.mulf %169, %172 : vector<8x8x16xf32>
    %174 = arith.addf %168, %173 : vector<8x8x16xf32>
    %c3_123 = arith.constant 3 : index
    %c0_124 = arith.constant 0 : index
    %c0_125 = arith.constant 0 : index
    %175 = vector.load %arg7[%c3_123, %c0_124, %c0_125] : memref<16x16x16xf32, #tpu.memory_space<vmem>>, vector<8x8x16xf32>
    %c27 = arith.constant 27 : index
    %c0_126 = arith.constant 0 : index
    %176 = vector.load %arg4[%c27, %c0_126] : memref<81x16xf32, #tpu.memory_space<vmem>>, vector<1x16xf32>
    %177 = vector.shape_cast %176 : vector<1x16xf32> to vector<1x1x16xf32>
    %178 = vector.broadcast %177 : vector<1x1x16xf32> to vector<8x8x16xf32>
    %179 = arith.mulf %175, %178 : vector<8x8x16xf32>
    %180 = arith.addf %174, %179 : vector<8x8x16xf32>
    %c3_127 = arith.constant 3 : index
    %c1_128 = arith.constant 1 : index
    %c0_129 = arith.constant 0 : index
    %181 = vector.load %arg7[%c3_127, %c1_128, %c0_129] : memref<16x16x16xf32, #tpu.memory_space<vmem>>, vector<8x8x16xf32>
    %c28 = arith.constant 28 : index
    %c0_130 = arith.constant 0 : index
    %182 = vector.load %arg4[%c28, %c0_130] : memref<81x16xf32, #tpu.memory_space<vmem>>, vector<1x16xf32>
    %183 = vector.shape_cast %182 : vector<1x16xf32> to vector<1x1x16xf32>
    %184 = vector.broadcast %183 : vector<1x1x16xf32> to vector<8x8x16xf32>
    %185 = arith.mulf %181, %184 : vector<8x8x16xf32>
    %186 = arith.addf %180, %185 : vector<8x8x16xf32>
    %c3_131 = arith.constant 3 : index
    %c2_132 = arith.constant 2 : index
    %c0_133 = arith.constant 0 : index
    %187 = vector.load %arg7[%c3_131, %c2_132, %c0_133] : memref<16x16x16xf32, #tpu.memory_space<vmem>>, vector<8x8x16xf32>
    %c29 = arith.constant 29 : index
    %c0_134 = arith.constant 0 : index
    %188 = vector.load %arg4[%c29, %c0_134] : memref<81x16xf32, #tpu.memory_space<vmem>>, vector<1x16xf32>
    %189 = vector.shape_cast %188 : vector<1x16xf32> to vector<1x1x16xf32>
    %190 = vector.broadcast %189 : vector<1x1x16xf32> to vector<8x8x16xf32>
    %191 = arith.mulf %187, %190 : vector<8x8x16xf32>
    %192 = arith.addf %186, %191 : vector<8x8x16xf32>
    %c3_135 = arith.constant 3 : index
    %c3_136 = arith.constant 3 : index
    %c0_137 = arith.constant 0 : index
    %193 = vector.load %arg7[%c3_135, %c3_136, %c0_137] : memref<16x16x16xf32, #tpu.memory_space<vmem>>, vector<8x8x16xf32>
    %c30 = arith.constant 30 : index
    %c0_138 = arith.constant 0 : index
    %194 = vector.load %arg4[%c30, %c0_138] : memref<81x16xf32, #tpu.memory_space<vmem>>, vector<1x16xf32>
    %195 = vector.shape_cast %194 : vector<1x16xf32> to vector<1x1x16xf32>
    %196 = vector.broadcast %195 : vector<1x1x16xf32> to vector<8x8x16xf32>
    %197 = arith.mulf %193, %196 : vector<8x8x16xf32>
    %198 = arith.addf %192, %197 : vector<8x8x16xf32>
    %c3_139 = arith.constant 3 : index
    %c4_140 = arith.constant 4 : index
    %c0_141 = arith.constant 0 : index
    %199 = vector.load %arg7[%c3_139, %c4_140, %c0_141] : memref<16x16x16xf32, #tpu.memory_space<vmem>>, vector<8x8x16xf32>
    %c31 = arith.constant 31 : index
    %c0_142 = arith.constant 0 : index
    %200 = vector.load %arg4[%c31, %c0_142] : memref<81x16xf32, #tpu.memory_space<vmem>>, vector<1x16xf32>
    %201 = vector.shape_cast %200 : vector<1x16xf32> to vector<1x1x16xf32>
    %202 = vector.broadcast %201 : vector<1x1x16xf32> to vector<8x8x16xf32>
    %203 = arith.mulf %199, %202 : vector<8x8x16xf32>
    %204 = arith.addf %198, %203 : vector<8x8x16xf32>
    %c3_143 = arith.constant 3 : index
    %c5_144 = arith.constant 5 : index
    %c0_145 = arith.constant 0 : index
    %205 = vector.load %arg7[%c3_143, %c5_144, %c0_145] : memref<16x16x16xf32, #tpu.memory_space<vmem>>, vector<8x8x16xf32>
    %c32 = arith.constant 32 : index
    %c0_146 = arith.constant 0 : index
    %206 = vector.load %arg4[%c32, %c0_146] : memref<81x16xf32, #tpu.memory_space<vmem>>, vector<1x16xf32>
    %207 = vector.shape_cast %206 : vector<1x16xf32> to vector<1x1x16xf32>
    %208 = vector.broadcast %207 : vector<1x1x16xf32> to vector<8x8x16xf32>
    %209 = arith.mulf %205, %208 : vector<8x8x16xf32>
    %210 = arith.addf %204, %209 : vector<8x8x16xf32>
    %c3_147 = arith.constant 3 : index
    %c6_148 = arith.constant 6 : index
    %c0_149 = arith.constant 0 : index
    %211 = vector.load %arg7[%c3_147, %c6_148, %c0_149] : memref<16x16x16xf32, #tpu.memory_space<vmem>>, vector<8x8x16xf32>
    %c33 = arith.constant 33 : index
    %c0_150 = arith.constant 0 : index
    %212 = vector.load %arg4[%c33, %c0_150] : memref<81x16xf32, #tpu.memory_space<vmem>>, vector<1x16xf32>
    %213 = vector.shape_cast %212 : vector<1x16xf32> to vector<1x1x16xf32>
    %214 = vector.broadcast %213 : vector<1x1x16xf32> to vector<8x8x16xf32>
    %215 = arith.mulf %211, %214 : vector<8x8x16xf32>
    %216 = arith.addf %210, %215 : vector<8x8x16xf32>
    %c3_151 = arith.constant 3 : index
    %c7_152 = arith.constant 7 : index
    %c0_153 = arith.constant 0 : index
    %217 = vector.load %arg7[%c3_151, %c7_152, %c0_153] : memref<16x16x16xf32, #tpu.memory_space<vmem>>, vector<8x8x16xf32>
    %c34 = arith.constant 34 : index
    %c0_154 = arith.constant 0 : index
    %218 = vector.load %arg4[%c34, %c0_154] : memref<81x16xf32, #tpu.memory_space<vmem>>, vector<1x16xf32>
    %219 = vector.shape_cast %218 : vector<1x16xf32> to vector<1x1x16xf32>
    %220 = vector.broadcast %219 : vector<1x1x16xf32> to vector<8x8x16xf32>
    %221 = arith.mulf %217, %220 : vector<8x8x16xf32>
    %222 = arith.addf %216, %221 : vector<8x8x16xf32>
    %c3_155 = arith.constant 3 : index
    %c8_156 = arith.constant 8 : index
    %c0_157 = arith.constant 0 : index
    %223 = vector.load %arg7[%c3_155, %c8_156, %c0_157] : memref<16x16x16xf32, #tpu.memory_space<vmem>>, vector<8x8x16xf32>
    %c35 = arith.constant 35 : index
    %c0_158 = arith.constant 0 : index
    %224 = vector.load %arg4[%c35, %c0_158] : memref<81x16xf32, #tpu.memory_space<vmem>>, vector<1x16xf32>
    %225 = vector.shape_cast %224 : vector<1x16xf32> to vector<1x1x16xf32>
    %226 = vector.broadcast %225 : vector<1x1x16xf32> to vector<8x8x16xf32>
    %227 = arith.mulf %223, %226 : vector<8x8x16xf32>
    %228 = arith.addf %222, %227 : vector<8x8x16xf32>
    %c4_159 = arith.constant 4 : index
    %c0_160 = arith.constant 0 : index
    %c0_161 = arith.constant 0 : index
    %229 = vector.load %arg7[%c4_159, %c0_160, %c0_161] : memref<16x16x16xf32, #tpu.memory_space<vmem>>, vector<8x8x16xf32>
    %c36 = arith.constant 36 : index
    %c0_162 = arith.constant 0 : index
    %230 = vector.load %arg4[%c36, %c0_162] : memref<81x16xf32, #tpu.memory_space<vmem>>, vector<1x16xf32>
    %231 = vector.shape_cast %230 : vector<1x16xf32> to vector<1x1x16xf32>
    %232 = vector.broadcast %231 : vector<1x1x16xf32> to vector<8x8x16xf32>
    %233 = arith.mulf %229, %232 : vector<8x8x16xf32>
    %234 = arith.addf %228, %233 : vector<8x8x16xf32>
    %c4_163 = arith.constant 4 : index
    %c1_164 = arith.constant 1 : index
    %c0_165 = arith.constant 0 : index
    %235 = vector.load %arg7[%c4_163, %c1_164, %c0_165] : memref<16x16x16xf32, #tpu.memory_space<vmem>>, vector<8x8x16xf32>
    %c37 = arith.constant 37 : index
    %c0_166 = arith.constant 0 : index
    %236 = vector.load %arg4[%c37, %c0_166] : memref<81x16xf32, #tpu.memory_space<vmem>>, vector<1x16xf32>
    %237 = vector.shape_cast %236 : vector<1x16xf32> to vector<1x1x16xf32>
    %238 = vector.broadcast %237 : vector<1x1x16xf32> to vector<8x8x16xf32>
    %239 = arith.mulf %235, %238 : vector<8x8x16xf32>
    %240 = arith.addf %234, %239 : vector<8x8x16xf32>
    %c4_167 = arith.constant 4 : index
    %c2_168 = arith.constant 2 : index
    %c0_169 = arith.constant 0 : index
    %241 = vector.load %arg7[%c4_167, %c2_168, %c0_169] : memref<16x16x16xf32, #tpu.memory_space<vmem>>, vector<8x8x16xf32>
    %c38 = arith.constant 38 : index
    %c0_170 = arith.constant 0 : index
    %242 = vector.load %arg4[%c38, %c0_170] : memref<81x16xf32, #tpu.memory_space<vmem>>, vector<1x16xf32>
    %243 = vector.shape_cast %242 : vector<1x16xf32> to vector<1x1x16xf32>
    %244 = vector.broadcast %243 : vector<1x1x16xf32> to vector<8x8x16xf32>
    %245 = arith.mulf %241, %244 : vector<8x8x16xf32>
    %246 = arith.addf %240, %245 : vector<8x8x16xf32>
    %c4_171 = arith.constant 4 : index
    %c3_172 = arith.constant 3 : index
    %c0_173 = arith.constant 0 : index
    %247 = vector.load %arg7[%c4_171, %c3_172, %c0_173] : memref<16x16x16xf32, #tpu.memory_space<vmem>>, vector<8x8x16xf32>
    %c39 = arith.constant 39 : index
    %c0_174 = arith.constant 0 : index
    %248 = vector.load %arg4[%c39, %c0_174] : memref<81x16xf32, #tpu.memory_space<vmem>>, vector<1x16xf32>
    %249 = vector.shape_cast %248 : vector<1x16xf32> to vector<1x1x16xf32>
    %250 = vector.broadcast %249 : vector<1x1x16xf32> to vector<8x8x16xf32>
    %251 = arith.mulf %247, %250 : vector<8x8x16xf32>
    %252 = arith.addf %246, %251 : vector<8x8x16xf32>
    %c4_175 = arith.constant 4 : index
    %c4_176 = arith.constant 4 : index
    %c0_177 = arith.constant 0 : index
    %253 = vector.load %arg7[%c4_175, %c4_176, %c0_177] : memref<16x16x16xf32, #tpu.memory_space<vmem>>, vector<8x8x16xf32>
    %c40 = arith.constant 40 : index
    %c0_178 = arith.constant 0 : index
    %254 = vector.load %arg4[%c40, %c0_178] : memref<81x16xf32, #tpu.memory_space<vmem>>, vector<1x16xf32>
    %255 = vector.shape_cast %254 : vector<1x16xf32> to vector<1x1x16xf32>
    %256 = vector.broadcast %255 : vector<1x1x16xf32> to vector<8x8x16xf32>
    %257 = arith.mulf %253, %256 : vector<8x8x16xf32>
    %258 = arith.addf %252, %257 : vector<8x8x16xf32>
    %c4_179 = arith.constant 4 : index
    %c5_180 = arith.constant 5 : index
    %c0_181 = arith.constant 0 : index
    %259 = vector.load %arg7[%c4_179, %c5_180, %c0_181] : memref<16x16x16xf32, #tpu.memory_space<vmem>>, vector<8x8x16xf32>
    %c41 = arith.constant 41 : index
    %c0_182 = arith.constant 0 : index
    %260 = vector.load %arg4[%c41, %c0_182] : memref<81x16xf32, #tpu.memory_space<vmem>>, vector<1x16xf32>
    %261 = vector.shape_cast %260 : vector<1x16xf32> to vector<1x1x16xf32>
    %262 = vector.broadcast %261 : vector<1x1x16xf32> to vector<8x8x16xf32>
    %263 = arith.mulf %259, %262 : vector<8x8x16xf32>
    %264 = arith.addf %258, %263 : vector<8x8x16xf32>
    %c4_183 = arith.constant 4 : index
    %c6_184 = arith.constant 6 : index
    %c0_185 = arith.constant 0 : index
    %265 = vector.load %arg7[%c4_183, %c6_184, %c0_185] : memref<16x16x16xf32, #tpu.memory_space<vmem>>, vector<8x8x16xf32>
    %c42 = arith.constant 42 : index
    %c0_186 = arith.constant 0 : index
    %266 = vector.load %arg4[%c42, %c0_186] : memref<81x16xf32, #tpu.memory_space<vmem>>, vector<1x16xf32>
    %267 = vector.shape_cast %266 : vector<1x16xf32> to vector<1x1x16xf32>
    %268 = vector.broadcast %267 : vector<1x1x16xf32> to vector<8x8x16xf32>
    %269 = arith.mulf %265, %268 : vector<8x8x16xf32>
    %270 = arith.addf %264, %269 : vector<8x8x16xf32>
    %c4_187 = arith.constant 4 : index
    %c7_188 = arith.constant 7 : index
    %c0_189 = arith.constant 0 : index
    %271 = vector.load %arg7[%c4_187, %c7_188, %c0_189] : memref<16x16x16xf32, #tpu.memory_space<vmem>>, vector<8x8x16xf32>
    %c43 = arith.constant 43 : index
    %c0_190 = arith.constant 0 : index
    %272 = vector.load %arg4[%c43, %c0_190] : memref<81x16xf32, #tpu.memory_space<vmem>>, vector<1x16xf32>
    %273 = vector.shape_cast %272 : vector<1x16xf32> to vector<1x1x16xf32>
    %274 = vector.broadcast %273 : vector<1x1x16xf32> to vector<8x8x16xf32>
    %275 = arith.mulf %271, %274 : vector<8x8x16xf32>
    %276 = arith.addf %270, %275 : vector<8x8x16xf32>
    %c4_191 = arith.constant 4 : index
    %c8_192 = arith.constant 8 : index
    %c0_193 = arith.constant 0 : index
    %277 = vector.load %arg7[%c4_191, %c8_192, %c0_193] : memref<16x16x16xf32, #tpu.memory_space<vmem>>, vector<8x8x16xf32>
    %c44 = arith.constant 44 : index
    %c0_194 = arith.constant 0 : index
    %278 = vector.load %arg4[%c44, %c0_194] : memref<81x16xf32, #tpu.memory_space<vmem>>, vector<1x16xf32>
    %279 = vector.shape_cast %278 : vector<1x16xf32> to vector<1x1x16xf32>
    %280 = vector.broadcast %279 : vector<1x1x16xf32> to vector<8x8x16xf32>
    %281 = arith.mulf %277, %280 : vector<8x8x16xf32>
    %282 = arith.addf %276, %281 : vector<8x8x16xf32>
    %c5_195 = arith.constant 5 : index
    %c0_196 = arith.constant 0 : index
    %c0_197 = arith.constant 0 : index
    %283 = vector.load %arg7[%c5_195, %c0_196, %c0_197] : memref<16x16x16xf32, #tpu.memory_space<vmem>>, vector<8x8x16xf32>
    %c45 = arith.constant 45 : index
    %c0_198 = arith.constant 0 : index
    %284 = vector.load %arg4[%c45, %c0_198] : memref<81x16xf32, #tpu.memory_space<vmem>>, vector<1x16xf32>
    %285 = vector.shape_cast %284 : vector<1x16xf32> to vector<1x1x16xf32>
    %286 = vector.broadcast %285 : vector<1x1x16xf32> to vector<8x8x16xf32>
    %287 = arith.mulf %283, %286 : vector<8x8x16xf32>
    %288 = arith.addf %282, %287 : vector<8x8x16xf32>
    %c5_199 = arith.constant 5 : index
    %c1_200 = arith.constant 1 : index
    %c0_201 = arith.constant 0 : index
    %289 = vector.load %arg7[%c5_199, %c1_200, %c0_201] : memref<16x16x16xf32, #tpu.memory_space<vmem>>, vector<8x8x16xf32>
    %c46 = arith.constant 46 : index
    %c0_202 = arith.constant 0 : index
    %290 = vector.load %arg4[%c46, %c0_202] : memref<81x16xf32, #tpu.memory_space<vmem>>, vector<1x16xf32>
    %291 = vector.shape_cast %290 : vector<1x16xf32> to vector<1x1x16xf32>
    %292 = vector.broadcast %291 : vector<1x1x16xf32> to vector<8x8x16xf32>
    %293 = arith.mulf %289, %292 : vector<8x8x16xf32>
    %294 = arith.addf %288, %293 : vector<8x8x16xf32>
    %c5_203 = arith.constant 5 : index
    %c2_204 = arith.constant 2 : index
    %c0_205 = arith.constant 0 : index
    %295 = vector.load %arg7[%c5_203, %c2_204, %c0_205] : memref<16x16x16xf32, #tpu.memory_space<vmem>>, vector<8x8x16xf32>
    %c47 = arith.constant 47 : index
    %c0_206 = arith.constant 0 : index
    %296 = vector.load %arg4[%c47, %c0_206] : memref<81x16xf32, #tpu.memory_space<vmem>>, vector<1x16xf32>
    %297 = vector.shape_cast %296 : vector<1x16xf32> to vector<1x1x16xf32>
    %298 = vector.broadcast %297 : vector<1x1x16xf32> to vector<8x8x16xf32>
    %299 = arith.mulf %295, %298 : vector<8x8x16xf32>
    %300 = arith.addf %294, %299 : vector<8x8x16xf32>
    %c5_207 = arith.constant 5 : index
    %c3_208 = arith.constant 3 : index
    %c0_209 = arith.constant 0 : index
    %301 = vector.load %arg7[%c5_207, %c3_208, %c0_209] : memref<16x16x16xf32, #tpu.memory_space<vmem>>, vector<8x8x16xf32>
    %c48 = arith.constant 48 : index
    %c0_210 = arith.constant 0 : index
    %302 = vector.load %arg4[%c48, %c0_210] : memref<81x16xf32, #tpu.memory_space<vmem>>, vector<1x16xf32>
    %303 = vector.shape_cast %302 : vector<1x16xf32> to vector<1x1x16xf32>
    %304 = vector.broadcast %303 : vector<1x1x16xf32> to vector<8x8x16xf32>
    %305 = arith.mulf %301, %304 : vector<8x8x16xf32>
    %306 = arith.addf %300, %305 : vector<8x8x16xf32>
    %c5_211 = arith.constant 5 : index
    %c4_212 = arith.constant 4 : index
    %c0_213 = arith.constant 0 : index
    %307 = vector.load %arg7[%c5_211, %c4_212, %c0_213] : memref<16x16x16xf32, #tpu.memory_space<vmem>>, vector<8x8x16xf32>
    %c49 = arith.constant 49 : index
    %c0_214 = arith.constant 0 : index
    %308 = vector.load %arg4[%c49, %c0_214] : memref<81x16xf32, #tpu.memory_space<vmem>>, vector<1x16xf32>
    %309 = vector.shape_cast %308 : vector<1x16xf32> to vector<1x1x16xf32>
    %310 = vector.broadcast %309 : vector<1x1x16xf32> to vector<8x8x16xf32>
    %311 = arith.mulf %307, %310 : vector<8x8x16xf32>
    %312 = arith.addf %306, %311 : vector<8x8x16xf32>
    %c5_215 = arith.constant 5 : index
    %c5_216 = arith.constant 5 : index
    %c0_217 = arith.constant 0 : index
    %313 = vector.load %arg7[%c5_215, %c5_216, %c0_217] : memref<16x16x16xf32, #tpu.memory_space<vmem>>, vector<8x8x16xf32>
    %c50 = arith.constant 50 : index
    %c0_218 = arith.constant 0 : index
    %314 = vector.load %arg4[%c50, %c0_218] : memref<81x16xf32, #tpu.memory_space<vmem>>, vector<1x16xf32>
    %315 = vector.shape_cast %314 : vector<1x16xf32> to vector<1x1x16xf32>
    %316 = vector.broadcast %315 : vector<1x1x16xf32> to vector<8x8x16xf32>
    %317 = arith.mulf %313, %316 : vector<8x8x16xf32>
    %318 = arith.addf %312, %317 : vector<8x8x16xf32>
    %c5_219 = arith.constant 5 : index
    %c6_220 = arith.constant 6 : index
    %c0_221 = arith.constant 0 : index
    %319 = vector.load %arg7[%c5_219, %c6_220, %c0_221] : memref<16x16x16xf32, #tpu.memory_space<vmem>>, vector<8x8x16xf32>
    %c51 = arith.constant 51 : index
    %c0_222 = arith.constant 0 : index
    %320 = vector.load %arg4[%c51, %c0_222] : memref<81x16xf32, #tpu.memory_space<vmem>>, vector<1x16xf32>
    %321 = vector.shape_cast %320 : vector<1x16xf32> to vector<1x1x16xf32>
    %322 = vector.broadcast %321 : vector<1x1x16xf32> to vector<8x8x16xf32>
    %323 = arith.mulf %319, %322 : vector<8x8x16xf32>
    %324 = arith.addf %318, %323 : vector<8x8x16xf32>
    %c5_223 = arith.constant 5 : index
    %c7_224 = arith.constant 7 : index
    %c0_225 = arith.constant 0 : index
    %325 = vector.load %arg7[%c5_223, %c7_224, %c0_225] : memref<16x16x16xf32, #tpu.memory_space<vmem>>, vector<8x8x16xf32>
    %c52 = arith.constant 52 : index
    %c0_226 = arith.constant 0 : index
    %326 = vector.load %arg4[%c52, %c0_226] : memref<81x16xf32, #tpu.memory_space<vmem>>, vector<1x16xf32>
    %327 = vector.shape_cast %326 : vector<1x16xf32> to vector<1x1x16xf32>
    %328 = vector.broadcast %327 : vector<1x1x16xf32> to vector<8x8x16xf32>
    %329 = arith.mulf %325, %328 : vector<8x8x16xf32>
    %330 = arith.addf %324, %329 : vector<8x8x16xf32>
    %c5_227 = arith.constant 5 : index
    %c8_228 = arith.constant 8 : index
    %c0_229 = arith.constant 0 : index
    %331 = vector.load %arg7[%c5_227, %c8_228, %c0_229] : memref<16x16x16xf32, #tpu.memory_space<vmem>>, vector<8x8x16xf32>
    %c53 = arith.constant 53 : index
    %c0_230 = arith.constant 0 : index
    %332 = vector.load %arg4[%c53, %c0_230] : memref<81x16xf32, #tpu.memory_space<vmem>>, vector<1x16xf32>
    %333 = vector.shape_cast %332 : vector<1x16xf32> to vector<1x1x16xf32>
    %334 = vector.broadcast %333 : vector<1x1x16xf32> to vector<8x8x16xf32>
    %335 = arith.mulf %331, %334 : vector<8x8x16xf32>
    %336 = arith.addf %330, %335 : vector<8x8x16xf32>
    %c6_231 = arith.constant 6 : index
    %c0_232 = arith.constant 0 : index
    %c0_233 = arith.constant 0 : index
    %337 = vector.load %arg7[%c6_231, %c0_232, %c0_233] : memref<16x16x16xf32, #tpu.memory_space<vmem>>, vector<8x8x16xf32>
    %c54 = arith.constant 54 : index
    %c0_234 = arith.constant 0 : index
    %338 = vector.load %arg4[%c54, %c0_234] : memref<81x16xf32, #tpu.memory_space<vmem>>, vector<1x16xf32>
    %339 = vector.shape_cast %338 : vector<1x16xf32> to vector<1x1x16xf32>
    %340 = vector.broadcast %339 : vector<1x1x16xf32> to vector<8x8x16xf32>
    %341 = arith.mulf %337, %340 : vector<8x8x16xf32>
    %342 = arith.addf %336, %341 : vector<8x8x16xf32>
    %c6_235 = arith.constant 6 : index
    %c1_236 = arith.constant 1 : index
    %c0_237 = arith.constant 0 : index
    %343 = vector.load %arg7[%c6_235, %c1_236, %c0_237] : memref<16x16x16xf32, #tpu.memory_space<vmem>>, vector<8x8x16xf32>
    %c55 = arith.constant 55 : index
    %c0_238 = arith.constant 0 : index
    %344 = vector.load %arg4[%c55, %c0_238] : memref<81x16xf32, #tpu.memory_space<vmem>>, vector<1x16xf32>
    %345 = vector.shape_cast %344 : vector<1x16xf32> to vector<1x1x16xf32>
    %346 = vector.broadcast %345 : vector<1x1x16xf32> to vector<8x8x16xf32>
    %347 = arith.mulf %343, %346 : vector<8x8x16xf32>
    %348 = arith.addf %342, %347 : vector<8x8x16xf32>
    %c6_239 = arith.constant 6 : index
    %c2_240 = arith.constant 2 : index
    %c0_241 = arith.constant 0 : index
    %349 = vector.load %arg7[%c6_239, %c2_240, %c0_241] : memref<16x16x16xf32, #tpu.memory_space<vmem>>, vector<8x8x16xf32>
    %c56 = arith.constant 56 : index
    %c0_242 = arith.constant 0 : index
    %350 = vector.load %arg4[%c56, %c0_242] : memref<81x16xf32, #tpu.memory_space<vmem>>, vector<1x16xf32>
    %351 = vector.shape_cast %350 : vector<1x16xf32> to vector<1x1x16xf32>
    %352 = vector.broadcast %351 : vector<1x1x16xf32> to vector<8x8x16xf32>
    %353 = arith.mulf %349, %352 : vector<8x8x16xf32>
    %354 = arith.addf %348, %353 : vector<8x8x16xf32>
    %c6_243 = arith.constant 6 : index
    %c3_244 = arith.constant 3 : index
    %c0_245 = arith.constant 0 : index
    %355 = vector.load %arg7[%c6_243, %c3_244, %c0_245] : memref<16x16x16xf32, #tpu.memory_space<vmem>>, vector<8x8x16xf32>
    %c57 = arith.constant 57 : index
    %c0_246 = arith.constant 0 : index
    %356 = vector.load %arg4[%c57, %c0_246] : memref<81x16xf32, #tpu.memory_space<vmem>>, vector<1x16xf32>
    %357 = vector.shape_cast %356 : vector<1x16xf32> to vector<1x1x16xf32>
    %358 = vector.broadcast %357 : vector<1x1x16xf32> to vector<8x8x16xf32>
    %359 = arith.mulf %355, %358 : vector<8x8x16xf32>
    %360 = arith.addf %354, %359 : vector<8x8x16xf32>
    %c6_247 = arith.constant 6 : index
    %c4_248 = arith.constant 4 : index
    %c0_249 = arith.constant 0 : index
    %361 = vector.load %arg7[%c6_247, %c4_248, %c0_249] : memref<16x16x16xf32, #tpu.memory_space<vmem>>, vector<8x8x16xf32>
    %c58 = arith.constant 58 : index
    %c0_250 = arith.constant 0 : index
    %362 = vector.load %arg4[%c58, %c0_250] : memref<81x16xf32, #tpu.memory_space<vmem>>, vector<1x16xf32>
    %363 = vector.shape_cast %362 : vector<1x16xf32> to vector<1x1x16xf32>
    %364 = vector.broadcast %363 : vector<1x1x16xf32> to vector<8x8x16xf32>
    %365 = arith.mulf %361, %364 : vector<8x8x16xf32>
    %366 = arith.addf %360, %365 : vector<8x8x16xf32>
    %c6_251 = arith.constant 6 : index
    %c5_252 = arith.constant 5 : index
    %c0_253 = arith.constant 0 : index
    %367 = vector.load %arg7[%c6_251, %c5_252, %c0_253] : memref<16x16x16xf32, #tpu.memory_space<vmem>>, vector<8x8x16xf32>
    %c59 = arith.constant 59 : index
    %c0_254 = arith.constant 0 : index
    %368 = vector.load %arg4[%c59, %c0_254] : memref<81x16xf32, #tpu.memory_space<vmem>>, vector<1x16xf32>
    %369 = vector.shape_cast %368 : vector<1x16xf32> to vector<1x1x16xf32>
    %370 = vector.broadcast %369 : vector<1x1x16xf32> to vector<8x8x16xf32>
    %371 = arith.mulf %367, %370 : vector<8x8x16xf32>
    %372 = arith.addf %366, %371 : vector<8x8x16xf32>
    %c6_255 = arith.constant 6 : index
    %c6_256 = arith.constant 6 : index
    %c0_257 = arith.constant 0 : index
    %373 = vector.load %arg7[%c6_255, %c6_256, %c0_257] : memref<16x16x16xf32, #tpu.memory_space<vmem>>, vector<8x8x16xf32>
    %c60 = arith.constant 60 : index
    %c0_258 = arith.constant 0 : index
    %374 = vector.load %arg4[%c60, %c0_258] : memref<81x16xf32, #tpu.memory_space<vmem>>, vector<1x16xf32>
    %375 = vector.shape_cast %374 : vector<1x16xf32> to vector<1x1x16xf32>
    %376 = vector.broadcast %375 : vector<1x1x16xf32> to vector<8x8x16xf32>
    %377 = arith.mulf %373, %376 : vector<8x8x16xf32>
    %378 = arith.addf %372, %377 : vector<8x8x16xf32>
    %c6_259 = arith.constant 6 : index
    %c7_260 = arith.constant 7 : index
    %c0_261 = arith.constant 0 : index
    %379 = vector.load %arg7[%c6_259, %c7_260, %c0_261] : memref<16x16x16xf32, #tpu.memory_space<vmem>>, vector<8x8x16xf32>
    %c61 = arith.constant 61 : index
    %c0_262 = arith.constant 0 : index
    %380 = vector.load %arg4[%c61, %c0_262] : memref<81x16xf32, #tpu.memory_space<vmem>>, vector<1x16xf32>
    %381 = vector.shape_cast %380 : vector<1x16xf32> to vector<1x1x16xf32>
    %382 = vector.broadcast %381 : vector<1x1x16xf32> to vector<8x8x16xf32>
    %383 = arith.mulf %379, %382 : vector<8x8x16xf32>
    %384 = arith.addf %378, %383 : vector<8x8x16xf32>
    %c6_263 = arith.constant 6 : index
    %c8_264 = arith.constant 8 : index
    %c0_265 = arith.constant 0 : index
    %385 = vector.load %arg7[%c6_263, %c8_264, %c0_265] : memref<16x16x16xf32, #tpu.memory_space<vmem>>, vector<8x8x16xf32>
    %c62 = arith.constant 62 : index
    %c0_266 = arith.constant 0 : index
    %386 = vector.load %arg4[%c62, %c0_266] : memref<81x16xf32, #tpu.memory_space<vmem>>, vector<1x16xf32>
    %387 = vector.shape_cast %386 : vector<1x16xf32> to vector<1x1x16xf32>
    %388 = vector.broadcast %387 : vector<1x1x16xf32> to vector<8x8x16xf32>
    %389 = arith.mulf %385, %388 : vector<8x8x16xf32>
    %390 = arith.addf %384, %389 : vector<8x8x16xf32>
    %c7_267 = arith.constant 7 : index
    %c0_268 = arith.constant 0 : index
    %c0_269 = arith.constant 0 : index
    %391 = vector.load %arg7[%c7_267, %c0_268, %c0_269] : memref<16x16x16xf32, #tpu.memory_space<vmem>>, vector<8x8x16xf32>
    %c63 = arith.constant 63 : index
    %c0_270 = arith.constant 0 : index
    %392 = vector.load %arg4[%c63, %c0_270] : memref<81x16xf32, #tpu.memory_space<vmem>>, vector<1x16xf32>
    %393 = vector.shape_cast %392 : vector<1x16xf32> to vector<1x1x16xf32>
    %394 = vector.broadcast %393 : vector<1x1x16xf32> to vector<8x8x16xf32>
    %395 = arith.mulf %391, %394 : vector<8x8x16xf32>
    %396 = arith.addf %390, %395 : vector<8x8x16xf32>
    %c7_271 = arith.constant 7 : index
    %c1_272 = arith.constant 1 : index
    %c0_273 = arith.constant 0 : index
    %397 = vector.load %arg7[%c7_271, %c1_272, %c0_273] : memref<16x16x16xf32, #tpu.memory_space<vmem>>, vector<8x8x16xf32>
    %c64 = arith.constant 64 : index
    %c0_274 = arith.constant 0 : index
    %398 = vector.load %arg4[%c64, %c0_274] : memref<81x16xf32, #tpu.memory_space<vmem>>, vector<1x16xf32>
    %399 = vector.shape_cast %398 : vector<1x16xf32> to vector<1x1x16xf32>
    %400 = vector.broadcast %399 : vector<1x1x16xf32> to vector<8x8x16xf32>
    %401 = arith.mulf %397, %400 : vector<8x8x16xf32>
    %402 = arith.addf %396, %401 : vector<8x8x16xf32>
    %c7_275 = arith.constant 7 : index
    %c2_276 = arith.constant 2 : index
    %c0_277 = arith.constant 0 : index
    %403 = vector.load %arg7[%c7_275, %c2_276, %c0_277] : memref<16x16x16xf32, #tpu.memory_space<vmem>>, vector<8x8x16xf32>
    %c65 = arith.constant 65 : index
    %c0_278 = arith.constant 0 : index
    %404 = vector.load %arg4[%c65, %c0_278] : memref<81x16xf32, #tpu.memory_space<vmem>>, vector<1x16xf32>
    %405 = vector.shape_cast %404 : vector<1x16xf32> to vector<1x1x16xf32>
    %406 = vector.broadcast %405 : vector<1x1x16xf32> to vector<8x8x16xf32>
    %407 = arith.mulf %403, %406 : vector<8x8x16xf32>
    %408 = arith.addf %402, %407 : vector<8x8x16xf32>
    %c7_279 = arith.constant 7 : index
    %c3_280 = arith.constant 3 : index
    %c0_281 = arith.constant 0 : index
    %409 = vector.load %arg7[%c7_279, %c3_280, %c0_281] : memref<16x16x16xf32, #tpu.memory_space<vmem>>, vector<8x8x16xf32>
    %c66 = arith.constant 66 : index
    %c0_282 = arith.constant 0 : index
    %410 = vector.load %arg4[%c66, %c0_282] : memref<81x16xf32, #tpu.memory_space<vmem>>, vector<1x16xf32>
    %411 = vector.shape_cast %410 : vector<1x16xf32> to vector<1x1x16xf32>
    %412 = vector.broadcast %411 : vector<1x1x16xf32> to vector<8x8x16xf32>
    %413 = arith.mulf %409, %412 : vector<8x8x16xf32>
    %414 = arith.addf %408, %413 : vector<8x8x16xf32>
    %c7_283 = arith.constant 7 : index
    %c4_284 = arith.constant 4 : index
    %c0_285 = arith.constant 0 : index
    %415 = vector.load %arg7[%c7_283, %c4_284, %c0_285] : memref<16x16x16xf32, #tpu.memory_space<vmem>>, vector<8x8x16xf32>
    %c67 = arith.constant 67 : index
    %c0_286 = arith.constant 0 : index
    %416 = vector.load %arg4[%c67, %c0_286] : memref<81x16xf32, #tpu.memory_space<vmem>>, vector<1x16xf32>
    %417 = vector.shape_cast %416 : vector<1x16xf32> to vector<1x1x16xf32>
    %418 = vector.broadcast %417 : vector<1x1x16xf32> to vector<8x8x16xf32>
    %419 = arith.mulf %415, %418 : vector<8x8x16xf32>
    %420 = arith.addf %414, %419 : vector<8x8x16xf32>
    %c7_287 = arith.constant 7 : index
    %c5_288 = arith.constant 5 : index
    %c0_289 = arith.constant 0 : index
    %421 = vector.load %arg7[%c7_287, %c5_288, %c0_289] : memref<16x16x16xf32, #tpu.memory_space<vmem>>, vector<8x8x16xf32>
    %c68 = arith.constant 68 : index
    %c0_290 = arith.constant 0 : index
    %422 = vector.load %arg4[%c68, %c0_290] : memref<81x16xf32, #tpu.memory_space<vmem>>, vector<1x16xf32>
    %423 = vector.shape_cast %422 : vector<1x16xf32> to vector<1x1x16xf32>
    %424 = vector.broadcast %423 : vector<1x1x16xf32> to vector<8x8x16xf32>
    %425 = arith.mulf %421, %424 : vector<8x8x16xf32>
    %426 = arith.addf %420, %425 : vector<8x8x16xf32>
    %c7_291 = arith.constant 7 : index
    %c6_292 = arith.constant 6 : index
    %c0_293 = arith.constant 0 : index
    %427 = vector.load %arg7[%c7_291, %c6_292, %c0_293] : memref<16x16x16xf32, #tpu.memory_space<vmem>>, vector<8x8x16xf32>
    %c69 = arith.constant 69 : index
    %c0_294 = arith.constant 0 : index
    %428 = vector.load %arg4[%c69, %c0_294] : memref<81x16xf32, #tpu.memory_space<vmem>>, vector<1x16xf32>
    %429 = vector.shape_cast %428 : vector<1x16xf32> to vector<1x1x16xf32>
    %430 = vector.broadcast %429 : vector<1x1x16xf32> to vector<8x8x16xf32>
    %431 = arith.mulf %427, %430 : vector<8x8x16xf32>
    %432 = arith.addf %426, %431 : vector<8x8x16xf32>
    %c7_295 = arith.constant 7 : index
    %c7_296 = arith.constant 7 : index
    %c0_297 = arith.constant 0 : index
    %433 = vector.load %arg7[%c7_295, %c7_296, %c0_297] : memref<16x16x16xf32, #tpu.memory_space<vmem>>, vector<8x8x16xf32>
    %c70 = arith.constant 70 : index
    %c0_298 = arith.constant 0 : index
    %434 = vector.load %arg4[%c70, %c0_298] : memref<81x16xf32, #tpu.memory_space<vmem>>, vector<1x16xf32>
    %435 = vector.shape_cast %434 : vector<1x16xf32> to vector<1x1x16xf32>
    %436 = vector.broadcast %435 : vector<1x1x16xf32> to vector<8x8x16xf32>
    %437 = arith.mulf %433, %436 : vector<8x8x16xf32>
    %438 = arith.addf %432, %437 : vector<8x8x16xf32>
    %c7_299 = arith.constant 7 : index
    %c8_300 = arith.constant 8 : index
    %c0_301 = arith.constant 0 : index
    %439 = vector.load %arg7[%c7_299, %c8_300, %c0_301] : memref<16x16x16xf32, #tpu.memory_space<vmem>>, vector<8x8x16xf32>
    %c71 = arith.constant 71 : index
    %c0_302 = arith.constant 0 : index
    %440 = vector.load %arg4[%c71, %c0_302] : memref<81x16xf32, #tpu.memory_space<vmem>>, vector<1x16xf32>
    %441 = vector.shape_cast %440 : vector<1x16xf32> to vector<1x1x16xf32>
    %442 = vector.broadcast %441 : vector<1x1x16xf32> to vector<8x8x16xf32>
    %443 = arith.mulf %439, %442 : vector<8x8x16xf32>
    %444 = arith.addf %438, %443 : vector<8x8x16xf32>
    %c8_303 = arith.constant 8 : index
    %c0_304 = arith.constant 0 : index
    %c0_305 = arith.constant 0 : index
    %445 = vector.load %arg7[%c8_303, %c0_304, %c0_305] : memref<16x16x16xf32, #tpu.memory_space<vmem>>, vector<8x8x16xf32>
    %c72 = arith.constant 72 : index
    %c0_306 = arith.constant 0 : index
    %446 = vector.load %arg4[%c72, %c0_306] : memref<81x16xf32, #tpu.memory_space<vmem>>, vector<1x16xf32>
    %447 = vector.shape_cast %446 : vector<1x16xf32> to vector<1x1x16xf32>
    %448 = vector.broadcast %447 : vector<1x1x16xf32> to vector<8x8x16xf32>
    %449 = arith.mulf %445, %448 : vector<8x8x16xf32>
    %450 = arith.addf %444, %449 : vector<8x8x16xf32>
    %c8_307 = arith.constant 8 : index
    %c1_308 = arith.constant 1 : index
    %c0_309 = arith.constant 0 : index
    %451 = vector.load %arg7[%c8_307, %c1_308, %c0_309] : memref<16x16x16xf32, #tpu.memory_space<vmem>>, vector<8x8x16xf32>
    %c73 = arith.constant 73 : index
    %c0_310 = arith.constant 0 : index
    %452 = vector.load %arg4[%c73, %c0_310] : memref<81x16xf32, #tpu.memory_space<vmem>>, vector<1x16xf32>
    %453 = vector.shape_cast %452 : vector<1x16xf32> to vector<1x1x16xf32>
    %454 = vector.broadcast %453 : vector<1x1x16xf32> to vector<8x8x16xf32>
    %455 = arith.mulf %451, %454 : vector<8x8x16xf32>
    %456 = arith.addf %450, %455 : vector<8x8x16xf32>
    %c8_311 = arith.constant 8 : index
    %c2_312 = arith.constant 2 : index
    %c0_313 = arith.constant 0 : index
    %457 = vector.load %arg7[%c8_311, %c2_312, %c0_313] : memref<16x16x16xf32, #tpu.memory_space<vmem>>, vector<8x8x16xf32>
    %c74 = arith.constant 74 : index
    %c0_314 = arith.constant 0 : index
    %458 = vector.load %arg4[%c74, %c0_314] : memref<81x16xf32, #tpu.memory_space<vmem>>, vector<1x16xf32>
    %459 = vector.shape_cast %458 : vector<1x16xf32> to vector<1x1x16xf32>
    %460 = vector.broadcast %459 : vector<1x1x16xf32> to vector<8x8x16xf32>
    %461 = arith.mulf %457, %460 : vector<8x8x16xf32>
    %462 = arith.addf %456, %461 : vector<8x8x16xf32>
    %c8_315 = arith.constant 8 : index
    %c3_316 = arith.constant 3 : index
    %c0_317 = arith.constant 0 : index
    %463 = vector.load %arg7[%c8_315, %c3_316, %c0_317] : memref<16x16x16xf32, #tpu.memory_space<vmem>>, vector<8x8x16xf32>
    %c75 = arith.constant 75 : index
    %c0_318 = arith.constant 0 : index
    %464 = vector.load %arg4[%c75, %c0_318] : memref<81x16xf32, #tpu.memory_space<vmem>>, vector<1x16xf32>
    %465 = vector.shape_cast %464 : vector<1x16xf32> to vector<1x1x16xf32>
    %466 = vector.broadcast %465 : vector<1x1x16xf32> to vector<8x8x16xf32>
    %467 = arith.mulf %463, %466 : vector<8x8x16xf32>
    %468 = arith.addf %462, %467 : vector<8x8x16xf32>
    %c8_319 = arith.constant 8 : index
    %c4_320 = arith.constant 4 : index
    %c0_321 = arith.constant 0 : index
    %469 = vector.load %arg7[%c8_319, %c4_320, %c0_321] : memref<16x16x16xf32, #tpu.memory_space<vmem>>, vector<8x8x16xf32>
    %c76 = arith.constant 76 : index
    %c0_322 = arith.constant 0 : index
    %470 = vector.load %arg4[%c76, %c0_322] : memref<81x16xf32, #tpu.memory_space<vmem>>, vector<1x16xf32>
    %471 = vector.shape_cast %470 : vector<1x16xf32> to vector<1x1x16xf32>
    %472 = vector.broadcast %471 : vector<1x1x16xf32> to vector<8x8x16xf32>
    %473 = arith.mulf %469, %472 : vector<8x8x16xf32>
    %474 = arith.addf %468, %473 : vector<8x8x16xf32>
    %c8_323 = arith.constant 8 : index
    %c5_324 = arith.constant 5 : index
    %c0_325 = arith.constant 0 : index
    %475 = vector.load %arg7[%c8_323, %c5_324, %c0_325] : memref<16x16x16xf32, #tpu.memory_space<vmem>>, vector<8x8x16xf32>
    %c77 = arith.constant 77 : index
    %c0_326 = arith.constant 0 : index
    %476 = vector.load %arg4[%c77, %c0_326] : memref<81x16xf32, #tpu.memory_space<vmem>>, vector<1x16xf32>
    %477 = vector.shape_cast %476 : vector<1x16xf32> to vector<1x1x16xf32>
    %478 = vector.broadcast %477 : vector<1x1x16xf32> to vector<8x8x16xf32>
    %479 = arith.mulf %475, %478 : vector<8x8x16xf32>
    %480 = arith.addf %474, %479 : vector<8x8x16xf32>
    %c8_327 = arith.constant 8 : index
    %c6_328 = arith.constant 6 : index
    %c0_329 = arith.constant 0 : index
    %481 = vector.load %arg7[%c8_327, %c6_328, %c0_329] : memref<16x16x16xf32, #tpu.memory_space<vmem>>, vector<8x8x16xf32>
    %c78 = arith.constant 78 : index
    %c0_330 = arith.constant 0 : index
    %482 = vector.load %arg4[%c78, %c0_330] : memref<81x16xf32, #tpu.memory_space<vmem>>, vector<1x16xf32>
    %483 = vector.shape_cast %482 : vector<1x16xf32> to vector<1x1x16xf32>
    %484 = vector.broadcast %483 : vector<1x1x16xf32> to vector<8x8x16xf32>
    %485 = arith.mulf %481, %484 : vector<8x8x16xf32>
    %486 = arith.addf %480, %485 : vector<8x8x16xf32>
    %c8_331 = arith.constant 8 : index
    %c7_332 = arith.constant 7 : index
    %c0_333 = arith.constant 0 : index
    %487 = vector.load %arg7[%c8_331, %c7_332, %c0_333] : memref<16x16x16xf32, #tpu.memory_space<vmem>>, vector<8x8x16xf32>
    %c79 = arith.constant 79 : index
    %c0_334 = arith.constant 0 : index
    %488 = vector.load %arg4[%c79, %c0_334] : memref<81x16xf32, #tpu.memory_space<vmem>>, vector<1x16xf32>
    %489 = vector.shape_cast %488 : vector<1x16xf32> to vector<1x1x16xf32>
    %490 = vector.broadcast %489 : vector<1x1x16xf32> to vector<8x8x16xf32>
    %491 = arith.mulf %487, %490 : vector<8x8x16xf32>
    %492 = arith.addf %486, %491 : vector<8x8x16xf32>
    %c8_335 = arith.constant 8 : index
    %c8_336 = arith.constant 8 : index
    %c0_337 = arith.constant 0 : index
    %493 = vector.load %arg7[%c8_335, %c8_336, %c0_337] : memref<16x16x16xf32, #tpu.memory_space<vmem>>, vector<8x8x16xf32>
    %c80 = arith.constant 80 : index
    %c0_338 = arith.constant 0 : index
    %494 = vector.load %arg4[%c80, %c0_338] : memref<81x16xf32, #tpu.memory_space<vmem>>, vector<1x16xf32>
    %495 = vector.shape_cast %494 : vector<1x16xf32> to vector<1x1x16xf32>
    %496 = vector.broadcast %495 : vector<1x1x16xf32> to vector<8x8x16xf32>
    %497 = arith.mulf %493, %496 : vector<8x8x16xf32>
    %498 = arith.addf %492, %497 : vector<8x8x16xf32>
    %c0_339 = arith.constant 0 : index
    %c0_340 = arith.constant 0 : index
    %499 = vector.load %arg5[%c0_339, %c0_340] : memref<1x16xf32, #tpu.memory_space<vmem>>, vector<1x16xf32>
    %500 = vector.shape_cast %499 : vector<1x16xf32> to vector<1x1x16xf32>
    %501 = vector.broadcast %500 : vector<1x1x16xf32> to vector<8x8x16xf32>
    %502 = arith.addf %498, %501 : vector<8x8x16xf32>
    %503 = arith.truncf %502 : vector<8x8x16xf32> to vector<8x8x16xbf16>
    %504 = vector.shape_cast %503 : vector<8x8x16xbf16> to vector<1x8x8x16xbf16>
    %c0_341 = arith.constant 0 : index
    %c0_342 = arith.constant 0 : index
    %c0_343 = arith.constant 0 : index
    %c0_344 = arith.constant 0 : index
    %505 = vector.load %arg6[%c0_341, %c0_342, %c0_343, %c0_344] : memref<1x8x8x16xbf16, #tpu.memory_space<vmem>>, vector<1x8x8x16xbf16>
    tpu.vector_store %arg6[%c0_341, %c0_342, %c0_343, %c0_344], %504 {strides = array<i32>} : memref<1x8x8x16xbf16, #tpu.memory_space<vmem>>, vector<1x8x8x16xbf16>,
    return
  }
  func.func @transform_0(%arg0: i32) -> (i32, i32, i32) {
    %c0_i32 = arith.constant 0 : i32
    %c0_i32_0 = arith.constant 0 : i32
    %c0_i32_1 = arith.constant 0 : i32
    return %arg0, %c0_i32, %c0_i32_0 : i32, i32, i32
  }
  func.func @transform_1(%arg0: i32) -> (i32, i32) {
    %c0_i32 = arith.constant 0 : i32
    %c0_i32_0 = arith.constant 0 : i32
    %c0_i32_1 = arith.constant 0 : i32
    return %c0_i32, %c0_i32_0 : i32, i32
  }
  func.func @transform_2(%arg0: i32) -> (i32, i32) {
    %c0_i32 = arith.constant 0 : i32
    %c0_i32_0 = arith.constant 0 : i32
    %c0_i32_1 = arith.constant 0 : i32
    return %c0_i32, %c0_i32_0 : i32, i32
  }
  func.func @transform_3(%arg0: i32) -> (i32, i32) {
    %c0_i32 = arith.constant 0 : i32
    %c0_i32_0 = arith.constant 0 : i32
    %c0_i32_1 = arith.constant 0 : i32
    return %c0_i32, %c0_i32_0 : i32, i32
  }
  func.func @transform_4(%arg0: i32) -> (i32, i32) {
    %c0_i32 = arith.constant 0 : i32
    %c0_i32_0 = arith.constant 0 : i32
    %c0_i32_1 = arith.constant 0 : i32
    return %c0_i32, %c0_i32_0 : i32, i32
  }
  func.func @transform_5(%arg0: i32) -> (i32, i32, i32, i32) {
    %c0_i32 = arith.constant 0 : i32
    %c0_i32_0 = arith.constant 0 : i32
    %c0_i32_1 = arith.constant 0 : i32
    %c0_i32_2 = arith.constant 0 : i32
    return %arg0, %c0_i32, %c0_i32_0, %c0_i32_1 : i32, i32, i32, i32
  }
}

</mosaic_0001>

<bundles_post_ra>
// kernel: tpu_custom_call.1
= control target key start
LH: loop header
LB: loop body
LE: loop exit
PB: predicated region body
PF: predicated region fallthrough
CT: control target
= control target key end

     0   :  { %10 = vsyncpa [#allocation4], 0  ;;  %s4776_s0 = inlined_call_operand.vmem [shape: f32[2,64,16], index: 0, kind: input, shape index: {}]   ;;  %s4777_s1 = inlined_call_operand.vmem [shape: bf16[16,16], index: 1, kind: input, shape index: {}]   ;;  %s4778_s2 = inlined_call_operand.vmem [shape: f32[1,16], index: 2, kind: input, shape index: {}]   ;;  %s4779_s3 = inlined_call_operand.vmem [shape: f32[81,16], index: 3, kind: input, shape index: {}]   ;;  %s4780_s4 = inlined_call_operand.vmem [shape: f32[1,16], index: 4, kind: input, shape index: {}]   ;;  %s4781_s5 = inlined_call_operand.hbm [shape: bf16[2,8,8,16], index: 5, kind: output, shape index: {}]  }
   0x1   :  { %12 = vsyncpa [#allocation4 + $0x1], 0  ;;  %s3095_s18 = smov 0   ;;  %s3097_s19 = smov 0  }
   0x2   :  { %s3099_s20 = smov 0   ;;  %s3101_s21 = smov 0  }
   0x3 LB: > { %s3116_s22 = sadd.s32 4294967295, %s3059_s21   ;;  %s2834_s23 = sadd.s32 4294967294, %s3059_s21   ;;  %s3059_s21 = sphi %s3101_s21, %s5140_s21   ;;  %s3055_s20 = sphi %s3099_s20, %s5139_s20   ;;  %s3051_s19 = sphi %s3097_s19, %s5138_s19   ;;  %s3047_s18 = sphi %s3095_s18, %s5137_s18  }
   0x4   : > { %s3120_s24 = sadd.s32 1, %s3059_s21   ;;  %s135_s25 = sadd.s32 1, %s3055_s20 }
   0x5   : > { %s132_s26 = ssub.s32 %s3059_s21, %s3120_s24  ;;  %p145_p0 = scmp.ne.s32.totalorder %s3055_s20, %s3051_s19 }
   0x6   : > { %p133_p1 = scmp.eq.s32.totalorder %s132_s26, 0  ;;  %p146_p2 = scmp.eq.s32.totalorder %s3116_s22, 1 }
   0x7   : > { %p151_p3 = scmp.ne.s32.totalorder %s3051_s19, %s3047_s18  ;;  %p152_p4 = scmp.eq.s32.totalorder %s2834_s23, 1 }
   0x8   : > { %s3131_s27 = scalar_select %p133_p1, %s3055_s20, %s135_s25  }
   0x9   : > { %p3133_p5 = por %p146_p2, %p145_p0  ;;  %p3137_p6 = por %p152_p4, %p151_p3 }
   0xa   : > { %p2837_p7 = scmp.ge.s32.totalorder %s3059_s21, 1  ;;  %p190_p8 = scmp.lt.s32.totalorder %s3059_s21, 3 }
   0xc   : > { %p191_p9 = pnand %p2837_p7, %p190_p8 }
   0xe   : > { %194 = sbr.rel (%p191_p9) target bundleno = 557 (0x22d), region = 40 }
  0x15   : > { %p218_p10 = scmp.lt.s32.totalorder %s3116_s22, 1  ;;  %v2995_v0 = vld [vmem:[%s4777_s1] sm:$0xff]   ;;  %vm251_vm0 = vcmask 130048   ;;  %v3061_v13 = vmov 0.0   ;;  %v3238_v45 = vld [vmem:[%s4779_s3 + $0x8] ss:$0 sm:$0xff] }
  0x16   : > { %2941 = vmatprep.subr.bf16.mxu0 %v2995_v0  ;;  %2951 = vmatprep.subr.bf16.mxu1 %v2995_v0  ;;  %329 = vst.msk [vmem:[#allocation2] sm:$0xff] %vm251_vm0, %v3061_v13  ;;  %330 = vst.msk [vmem:[#allocation2 + $0x8] sm:$0xff] %vm251_vm0, %v3061_v13  ;;  %v3190_v15 = vld [vmem:[%s4779_s3] ss:$0 sm:$0xff]  ;;  %v3195_v17 = vld [vmem:[%s4779_s3 + $0x1] ss:$0 sm:$0xff] }
  0x17   : > { %s219_s7 = scalar_select %p218_p10, %s3116_s22, 1  ;;  %2942 = vmatpush3.bf16.msra.mxu0 %v2995_v0  ;;  %2952 = vmatpush3.bf16.msra.mxu1 %v2995_v0  ;;  %331 = vst.msk [vmem:[#allocation2 + $0x10] sm:$0xff] %vm251_vm0, %v3061_v13  ;;  %332 = vst.msk [vmem:[#allocation2 + $0x18] sm:$0xff] %vm251_vm0, %v3061_v13  ;;  %v3202_v21 = vld [vmem:[%s4779_s3 + $0x2] ss:$0 sm:$0xff]  ;;  %vm2749_vm1 = vcmask 125952  }
  0x18   : > { %333 = vst.msk [vmem:[#allocation2 + $0x20] sm:$0xff] %vm251_vm0, %v3061_v13  ;;  %334 = vst.msk [vmem:[#allocation2 + $0x28] sm:$0xff] %vm251_vm0, %v3061_v13  ;;  %v3208_v25 = vld [vmem:[%s4779_s3 + $0x3] ss:$0 sm:$0xff]  ;;  %v3214_v29 = vld [vmem:[%s4779_s3 + $0x4] ss:$0 sm:$0xff] }
  0x19   : > { %s2934_s8 = sshll.u32 %s219_s7, 6  ;;  %335 = vst.msk [vmem:[#allocation2 + $0x30] sm:$0xff] %vm251_vm0, %v3061_v13  ;;  %336 = vst.msk [vmem:[#allocation2 + $0x38] sm:$0xff] %vm251_vm0, %v3061_v13  ;;  %v3220_v33 = vld [vmem:[%s4779_s3 + $0x5] ss:$0 sm:$0xff]  ;;  %s215_s16 = sand.u32 1, %s3051_s19  }
  0x1a   : > { %s222_s11 = scalar_lea.vmem %s4776_s0, %s2934_s8  ;;  %337 = vst.msk [vmem:[#allocation2 + $0x40] sm:$0xff] %vm251_vm0, %v3061_v13  ;;  %338 = vst.msk [vmem:[#allocation2 + $0x48] sm:$0xff] %vm251_vm0, %v3061_v13  ;;  %v3226_v37 = vld [vmem:[%s4779_s3 + $0x6] ss:$0 sm:$0xff]  ;;  %v3232_v41 = vld [vmem:[%s4779_s3 + $0x7] ss:$0 sm:$0xff] }
  0x1b   : > { %v224_v1 = vld [vmem:[%s222_s11] sm:$0xff]  ;;  %v225_v2 = vld [vmem:[%s222_s11 + $0x8] sm:$0xff]  ;;  %v226_v3 = vld [vmem:[%s222_s11 + $0x10] sm:$0xff]  ;;  %339 = vst.msk [vmem:[#allocation2 + $0x50] sm:$0xff] %vm251_vm0, %v3061_v13  ;;  %s2838_s25 = sshll.u32 %s215_s16, 5  ;;  %s2935_s6 = sshll.u32 %s3116_s22, 9 }
  0x1c   : > { %v227_v4 = vld [vmem:[%s222_s11 + $0x18] sm:$0xff]  ;;  %v228_v5 = vld [vmem:[%s222_s11 + $0x20] sm:$0xff]  ;;  %v229_v6 = vld [vmem:[%s222_s11 + $0x28] sm:$0xff]  ;;  %v232_v7 = vpack.c.bf16 %v225_v2, %v224_v1  ;;  %340 = vst.msk [vmem:[#allocation2 + $0x58] sm:$0xff] %vm251_vm0, %v3061_v13  ;;  %s217_s7 = scalar_lea.vmem [#allocation3], %s2838_s25  ;;  %s4735_s22 = scalar_lea.sflag [#allocation4], %s215_s16 }
  0x1d   : > { %v230_v8 = vld [vmem:[%s222_s11 + $0x30] sm:$0xff]  ;;  %v231_v9 = vld [vmem:[%s222_s11 + $0x38] sm:$0xff]  ;;  %v233_v10 = vpack.c.bf16 %v227_v4, %v226_v3  ;;  %v234_v11 = vpack.c.bf16 %v229_v6, %v228_v5  ;;  %341 = vst.msk [vmem:[#allocation2 + $0x60] sm:$0xff] %vm251_vm0, %v3061_v13  ;;  %342 = vst.msk [vmem:[#allocation2 + $0x68] sm:$0xff] %vm251_vm0, %v3061_v13  ;;  %s2772_s8 = sshll.u32 %s217_s7, 4  ;;  %s4729_s11 = scalar_lea.hbm %s4781_s5, %s2935_s6  ;;  %s4731_s8 = int_to_ptr.vmem [resolvable:$true] %s2772_s8 }
  0x1e   : > { %v235_v12 = vpack.c.bf16 %v231_v9, %v230_v8  ;;  %2943 = vmatprep.mubr.msk.bf16.mxu0 %vm251_vm0, %v232_v7  ;;  %343 = vst.msk [vmem:[#allocation2 + $0x70] sm:$0xff] %vm251_vm0, %v3061_v13  ;;  %344 = vst.msk [vmem:[#allocation2 + $0x78] sm:$0xff] %vm251_vm0, %v3061_v13  ;;  %v370_v14 = vld [vmem:[#allocation2] sm:$0xff]  ;;  %v602_v44 = vld [vmem:[#allocation2 + $0x8] sm:$0xff]  ;;  %s2997_s12 = scalar_lea.vmem %s4731_s8, 512  ;;  %s3062_s13 = smov [#allocation3]  }
  0x1f   : > { %2944 = vmatmul.mubr.msk.bf16.vlgmr.msra.gmra.mrb[0].mxu0 %vm251_vm0, %v233_v10  ;;  %2947 = vmatprep.mubr.msk.bf16.mxu1 %vm251_vm0, %v234_v11  ;;  %345 = vst.msk [vmem:[#allocation2 + $0x80] sm:$0xff] %vm251_vm0, %v3061_v13  ;;  %346 = vst.msk [vmem:[#allocation2 + $0x88] sm:$0xff] %vm251_vm0, %v3061_v13  ;;  %v399_v16 = vld [vmem:[#allocation2 + $0x1] sm:$0xff]  ;;  %v383_v18 = vmul.f32 %v3190_v15, %v370_v14  ;;  %v615_v47 = vmul.f32 %v3238_v45, %v602_v44  ;;  %v371_v48 = vld [vmem:[#allocation2 + $0x10] sm:$0xff]  ;;  %p2998_p11 = scmp.ne.s32.totalorder %s4731_s8, %s2997_s12  ;;  %s3001_s14 = sshll.u32 %s3062_s13, 4  ;;  %s3002_s14 = int_to_ptr.vmem [resolvable:$false] %s3001_s14 }
  0x20   : > { %2948 = vmatmul.mubr.msk.bf16.vlgmr.msra.gmra.mrb[0].mxu1 %vm251_vm0, %v235_v12  ;;  %347 = vst.msk [vmem:[#allocation2 + $0x90] sm:$0xff] %vm251_vm0, %v3061_v13  ;;  %348 = vst.msk [vmem:[#allocation2 + $0x98] sm:$0xff] %vm251_vm0, %v3061_v13  ;;  %v412_v19 = vmul.f32 %v3195_v17, %v399_v16  ;;  %v428_v20 = vld [vmem:[#allocation2 + $0x2] sm:$0xff]  ;;  %v400_v50 = vld [vmem:[#allocation2 + $0x11] sm:$0xff]  ;;  %v384_v54 = vmul.f32 %v3190_v15, %v371_v48  ;;  %s3003_s15 = scalar_lea.vmem %s3002_s14, 1024  ;;  %p3004_p0 = scmp.lt.s32.totalorder %s4731_s8, %s3002_s14 }
  0x21   : > { %349 = vst.msk [vmem:[#allocation2 + $0xa0] sm:$0xff] %vm251_vm0, %v3061_v13  ;;  %350 = vst.msk [vmem:[#allocation2 + $0xa8] sm:$0xff] %vm251_vm0, %v3061_v13  ;;  %v441_v23 = vmul.f32 %v3202_v21, %v428_v20  ;;  %v457_v24 = vld [vmem:[#allocation2 + $0x3] sm:$0xff]  ;;  %v413_v55 = vmul.f32 %v3195_v17, %v400_v50  ;;  %v429_v56 = vld [vmem:[#allocation2 + $0x12] sm:$0xff]  ;;  %p2999_p12 = pnand %p2998_p11, %p3133_p5  ;;  %p3005_p1 = scmp.lt.s32.totalorder %s3003_s15, %s2997_s12 }
  0x22   : > { %351 = vst.msk [vmem:[#allocation2 + $0xb0] sm:$0xff] %vm251_vm0, %v3061_v13  ;;  %352 = vst.msk [vmem:[#allocation2 + $0xb8] sm:$0xff] %vm251_vm0, %v3061_v13  ;;  %v420_v22 = vadd.f32 %v412_v19, %v383_v18  ;;  %v470_v27 = vmul.f32 %v3208_v25, %v457_v24  ;;  %v486_v28 = vld [vmem:[#allocation2 + $0x4] sm:$0xff]  ;;  %v442_v61 = vmul.f32 %v3202_v21, %v429_v56  ;;  %v458_v62 = vld [vmem:[#allocation2 + $0x13] sm:$0xff] }
  0x23   : > { %353 = vst.msk [vmem:[#allocation2 + $0xc0] sm:$0xff] %vm251_vm0, %v3061_v13  ;;  %354 = vst.msk [vmem:[#allocation2 + $0xc8] sm:$0xff] %vm251_vm0, %v3061_v13  ;;  %v499_v31 = vmul.f32 %v3214_v29, %v486_v28  ;;  %v515_v32 = vld [vmem:[#allocation2 + $0x5] sm:$0xff]  ;;  %v421_v60 = vadd.f32 %v413_v55, %v384_v54  ;;  %v471_v3 = vmul.f32 %v3208_v25, %v458_v62  ;;  %v487_v4 = vld [vmem:[#allocation2 + $0x14] sm:$0xff]  ;;  %p3000_p13 = pneg %p2999_p12  ;;  %p3006_p2 = por %p3005_p1, %p3004_p0 }
  0x24   : > { %355 = vst.msk [vmem:[#allocation2 + $0xd0] sm:$0xff] %vm251_vm0, %v3061_v13  ;;  %356 = vst.msk [vmem:[#allocation2 + $0xd8] sm:$0xff] %vm251_vm0, %v3061_v13  ;;  %v449_v26 = vadd.f32 %v441_v23, %v420_v22  ;;  %v528_v35 = vmul.f32 %v3220_v33, %v515_v32  ;;  %v544_v36 = vld [vmem:[#allocation2 + $0x6] sm:$0xff]  ;;  %v500_v9 = vmul.f32 %v3214_v29, %v487_v4  ;;  %v516_v10 = vld [vmem:[#allocation2 + $0x15] sm:$0xff] }
  0x25   : > { %357 = vst.msk [vmem:[#allocation2 + $0xe0] sm:$0xff] %vm251_vm0, %v3061_v13  ;;  %358 = vst.msk [vmem:[#allocation2 + $0xe8] sm:$0xff] %vm251_vm0, %v3061_v13  ;;  %v557_v39 = vmul.f32 %v3226_v37, %v544_v36  ;;  %v573_v40 = vld [vmem:[#allocation2 + $0x7] sm:$0xff]  ;;  %v450_v2 = vadd.f32 %v442_v61, %v421_v60  ;;  %v529_v16 = vmul.f32 %v3220_v33, %v516_v10  ;;  %v545_v18 = vld [vmem:[#allocation2 + $0x16] sm:$0xff]  ;;  %p3007_p3 = pnand %p3006_p2, %p3000_p13 }
  0x26   : > { %359 = vst.msk [vmem:[#allocation2 + $0xf0] sm:$0xff] %vm251_vm0, %v3061_v13  ;;  %360 = vst.msk [vmem:[#allocation2 + $0xf8] sm:$0xff] %vm251_vm0, %v3061_v13  ;;  %v478_v30 = vadd.f32 %v470_v27, %v449_v26  ;;  %v586_v43 = vmul.f32 %v3232_v41, %v573_v40  ;;  %v3244_v49 = vld [vmem:[%s4779_s3 + $0x9] ss:$0 sm:$0xff]  ;;  %v3250_v53 = vld [vmem:[%s4779_s3 + $0xa] ss:$0 sm:$0xff]  ;;  %v558_v24 = vmul.f32 %v3226_v37, %v545_v18 }
  0x27   : > { %v645_v52 = vmul.f32 %v3244_v49, %v371_v48  ;;  %v674_v58 = vmul.f32 %v3250_v53, %v400_v50  ;;  %v3258_v59 = vld [vmem:[%s4779_s3 + $0xb] ss:$0 sm:$0xff]  ;;  %v3265_v1 = vld [vmem:[%s4779_s3 + $0xc] ss:$0 sm:$0xff]  ;;  %v3272_v7 = vld [vmem:[%s4779_s3 + $0xd] ss:$0 sm:$0xff]  ;;  %v479_v8 = vadd.f32 %v471_v3, %v450_v2 }
  0x28   : > { %v507_v34 = vadd.f32 %v499_v31, %v478_v30  ;;  %v703_v0 = vmul.f32 %v3258_v59, %v429_v56  ;;  %v732_v6 = vmul.f32 %v3265_v1, %v458_v62  ;;  %v761_v12 = vmul.f32 %v3272_v7, %v487_v4  ;;  %v3279_v13 = vld [vmem:[%s4779_s3 + $0xe] ss:$0 sm:$0xff]  ;;  %v3286_v22 = vld [vmem:[%s4779_s3 + $0xf] ss:$0 sm:$0xff]  ;;  %v574_v26 = vld [vmem:[#allocation2 + $0x17] sm:$0xff] }
  0x29   : > { %v508_v14 = vadd.f32 %v500_v9, %v479_v8  ;;  %v790_v20 = vmul.f32 %v3279_v13, %v516_v10  ;;  %v819_v28 = vmul.f32 %v3286_v22, %v545_v18  ;;  %v3293_v30 = vld [vmem:[%s4779_s3 + $0x10] ss:$0 sm:$0xff]  ;;  %v587_v32 = vmul.f32 %v3232_v41, %v574_v26  ;;  %v3314_v54 = vld [vmem:[%s4779_s3 + $0x13] ss:$0 sm:$0xff]  ;;  %v459_v3 = vld [vmem:[#allocation2 + $0x23] sm:$0xff] }
  0x2a   : > { %v536_v38 = vadd.f32 %v528_v35, %v507_v34  ;;  %4937 = vst [vmem:[#allocation6_spill] sm:$0xff] %v3293_v30  ;;  %v603_v34 = vld [vmem:[#allocation2 + $0x18] sm:$0xff]  ;;  %v848_v36 = vmul.f32 %v3293_v30, %v574_v26  ;;  %4940 = vst [vmem:[#allocation9_spill] sm:$0xff] %v3314_v54  ;;  %v3331_v9 = vld [vmem:[%s4779_s3 + $0x15] ss:$0 sm:$0xff] }
  0x2b   : > { %v537_v23 = vadd.f32 %v529_v16, %v508_v14  ;;  %v616_v40 = vmul.f32 %v3238_v45, %v603_v34  ;;  %4942 = vst [vmem:[#allocation11_spill] sm:$0xff] %v3331_v9  ;;  %v733_v16 = vmul.f32 %v3265_v1, %v459_v3  ;;  %v517_v26 = vld [vmem:[#allocation2 + $0x25] sm:$0xff] }
  0x2c   : > { %v565_v42 = vadd.f32 %v557_v39, %v536_v38  ;;  %v3300_v38 = vld [vmem:[%s4779_s3 + $0x11] ss:$0 sm:$0xff] }
  0x2d   : > { %v566_v31 = vadd.f32 %v558_v24, %v537_v23  ;;  %4938 = vst [vmem:[#allocation7_spill] sm:$0xff] %v3300_v38  ;;  %v877_v44 = vmul.f32 %v3300_v38, %v603_v34  ;;  %v3347_v34 = vld [vmem:[%s4779_s3 + $0x17] ss:$0 sm:$0xff] }
  0x2e   : > { %v594_v46 = vadd.f32 %v586_v43, %v565_v42  ;;  %v372_v42 = vld [vmem:[#allocation2 + $0x20] sm:$0xff]  ;;  %4944 = vst [vmem:[#allocation13_spill] sm:$0xff] %v3347_v34 }
  0x2f   : > { %v595_v39 = vadd.f32 %v587_v32, %v566_v31  ;;  %v646_v50 = vmul.f32 %v3244_v49, %v372_v42  ;;  %v385_v55 = vmul.f32 %v3190_v15, %v372_v42 }
  0x30   : > { %v623_v51 = vadd.f32 %v615_v47, %v594_v46  ;;  %v3307_v46 = vld [vmem:[%s4779_s3 + $0x12] ss:$0 sm:$0xff]  ;;  %v401_v47 = vld [vmem:[#allocation2 + $0x21] sm:$0xff] }
  0x31   : > { %4939 = vst [vmem:[#allocation8_spill] sm:$0xff] %v3307_v46  ;;  %v624_v48 = vadd.f32 %v616_v40, %v595_v39  ;;  %v414_v56 = vmul.f32 %v3195_v17, %v401_v47  ;;  %v675_v60 = vmul.f32 %v3250_v53, %v401_v47  ;;  %v936_v62 = vmul.f32 %v3314_v54, %v401_v47  ;;  %v546_v39 = vld [vmem:[#allocation2 + $0x26] sm:$0xff]  ;;  %v3355_v47 = vld [vmem:[%s4779_s3 + $0x18] ss:$0 sm:$0xff] }
  0x32   : > { %v653_v57 = vadd.f32 %v645_v52, %v623_v51  ;;  %v907_v52 = vmul.f32 %v3307_v46, %v372_v42  ;;  %v791_v42 = vmul.f32 %v3279_v13, %v517_v26  ;;  %4945 = vst [vmem:[#allocation14_spill] sm:$0xff] %v3355_v47 }
  0x34   : > { %v682_v63 = vadd.f32 %v674_v58, %v653_v57  ;;  %v430_v57 = vld [vmem:[#allocation2 + $0x22] sm:$0xff]  ;;  %v654_v58 = vadd.f32 %v646_v50, %v624_v48  ;;  %v559_v50 = vmul.f32 %v3226_v37, %v546_v39 }
  0x35   : > { %v443_v2 = vmul.f32 %v3202_v21, %v430_v57 }
  0x36   : > { %v711_v5 = vadd.f32 %v703_v0, %v682_v63  ;;  %v3323_v63 = vld [vmem:[%s4779_s3 + $0x14] ss:$0 sm:$0xff]  ;;  %v422_v0 = vadd.f32 %v414_v56, %v385_v55  ;;  %v683_v4 = vadd.f32 %v675_v60, %v654_v58  ;;  %v820_v55 = vmul.f32 %v3286_v22, %v546_v39  ;;  %v3363_v58 = vld [vmem:[%s4779_s3 + $0x19] ss:$0 sm:$0xff] }
  0x37   : > { %4941 = vst [vmem:[#allocation10_spill] sm:$0xff] %v3323_v63  ;;  %v965_v8 = vmul.f32 %v3323_v63, %v430_v57  ;;  %4946 = vst [vmem:[#allocation15_spill] sm:$0xff] %v3363_v58 }
  0x38   : > { %v740_v11 = vadd.f32 %v732_v6, %v711_v5  ;;  %v704_v5 = vmul.f32 %v3258_v59, %v430_v57  ;;  %v451_v10 = vadd.f32 %v443_v2, %v422_v0  ;;  %v1081_v57 = vmul.f32 %v3355_v47, %v546_v39 }
  0x3a   : > { %v769_v19 = vadd.f32 %v761_v12, %v740_v11  ;;  %v472_v11 = vmul.f32 %v3208_v25, %v459_v3  ;;  %v488_v12 = vld [vmem:[#allocation2 + $0x24] sm:$0xff]  ;;  %v712_v14 = vadd.f32 %v704_v5, %v683_v4  ;;  %v3371_v5 = vld [vmem:[%s4779_s3 + $0x1a] ss:$0 sm:$0xff] }
  0x3b   : > { %v501_v24 = vmul.f32 %v3214_v29, %v488_v12  ;;  %4947 = vst [vmem:[#allocation16_spill] sm:$0xff] %v3371_v5 }
  0x3c   : > { %v798_v27 = vadd.f32 %v790_v20, %v769_v19  ;;  %v994_v19 = vmul.f32 %v3331_v9, %v459_v3  ;;  %v3339_v20 = vld [vmem:[%s4779_s3 + $0x16] ss:$0 sm:$0xff]  ;;  %v480_v23 = vadd.f32 %v472_v11, %v451_v10 }
  0x3d   : > { %4943 = vst [vmem:[#allocation12_spill] sm:$0xff] %v3339_v20  ;;  %v1023_v32 = vmul.f32 %v3339_v20, %v488_v12  ;;  %v373_v10 = vld [vmem:[#allocation2 + $0x30] sm:$0xff] }
  0x3e   : > { %v827_v35 = vadd.f32 %v819_v28, %v798_v27  ;;  %v741_v27 = vadd.f32 %v733_v16, %v712_v14  ;;  %v762_v28 = vmul.f32 %v3272_v7, %v488_v12  ;;  %v386_v39 = vmul.f32 %v3190_v15, %v373_v10 }
  0x40   : > { %v856_v43 = vadd.f32 %v848_v36, %v827_v35  ;;  %v509_v35 = vadd.f32 %v501_v24, %v480_v23  ;;  %v530_v36 = vmul.f32 %v3220_v33, %v517_v26  ;;  %v770_v40 = vadd.f32 %v762_v28, %v741_v27 }
  0x41   : > { %v647_v24 = vmul.f32 %v3244_v49, %v373_v10  ;;  %v908_v28 = vmul.f32 %v3307_v46, %v373_v10  ;;  %v3406_v10 = vld [vmem:[%s4779_s3 + $0x1e] ss:$0 sm:$0xff] }
  0x42   : > { %v885_v51 = vadd.f32 %v877_v44, %v856_v43  ;;  %v1052_v44 = vmul.f32 %v3347_v34, %v517_v26  ;;  %v538_v48 = vadd.f32 %v530_v36, %v509_v35  ;;  %v402_v26 = vld [vmem:[#allocation2 + $0x31] sm:$0xff]  ;;  %v3387_v36 = vld [vmem:[%s4779_s3 + $0x1c] ss:$0 sm:$0xff]  ;;  %4951 = vst [vmem:[#allocation20_spill] sm:$0xff] %v3406_v10 }
  0x43   : > { %v1185_v35 = vld [vmem:[#allocation2 + $0x31] sm:$0xff]  ;;  %4949 = vst [vmem:[#allocation18_spill] sm:$0xff] %v3387_v36 }
  0x44   : > { %v915_v61 = vadd.f32 %v907_v52, %v885_v51  ;;  %v575_v51 = vld [vmem:[#allocation2 + $0x27] sm:$0xff]  ;;  %v799_v52 = vadd.f32 %v791_v42, %v770_v40  ;;  %v567_v60 = vadd.f32 %v559_v50, %v538_v48  ;;  %v415_v40 = vmul.f32 %v3195_v17, %v402_v26 }
  0x45   : > { %v849_v2 = vmul.f32 %v3293_v30, %v575_v51  ;;  %v1110_v4 = vmul.f32 %v3363_v58, %v575_v51  ;;  %v937_v50 = vmul.f32 %v3314_v54, %v402_v26 }
  0x46   : > { %v944_v6 = vadd.f32 %v936_v62, %v915_v61  ;;  %v588_v61 = vmul.f32 %v3232_v41, %v575_v51  ;;  %v604_v62 = vld [vmem:[#allocation2 + $0x28] sm:$0xff]  ;;  %v828_v0 = vadd.f32 %v820_v55, %v799_v52  ;;  %v1198_v52 = vmul.f32 %v3387_v36, %v1185_v35  ;;  %v1214_v55 = vld [vmem:[#allocation2 + $0x32] sm:$0xff] }
  0x47   : > { %v878_v12 = vmul.f32 %v3300_v38, %v604_v62  ;;  %v1139_v16 = vmul.f32 %v3371_v5, %v604_v62 }
  0x48   : > { %v973_v18 = vadd.f32 %v965_v8, %v944_v6  ;;  %v596_v6 = vadd.f32 %v588_v61, %v567_v60  ;;  %v617_v8 = vmul.f32 %v3238_v45, %v604_v62  ;;  %v857_v11 = vadd.f32 %v849_v2, %v828_v0  ;;  %v460_v0 = vld [vmem:[#allocation2 + $0x33] sm:$0xff] }
  0x4a   : > { %v1002_v31 = vadd.f32 %v994_v19, %v973_v18  ;;  %v1156_v18 = vld [vmem:[#allocation2 + $0x30] sm:$0xff]  ;;  %v3379_v19 = vld [vmem:[%s4779_s3 + $0x1b] ss:$0 sm:$0xff]  ;;  %v625_v23 = vadd.f32 %v617_v8, %v596_v6  ;;  %v886_v27 = vadd.f32 %v878_v12, %v857_v11  ;;  %v473_v12 = vmul.f32 %v3208_v25, %v460_v0 }
  0x4b   : > { %4948 = vst [vmem:[#allocation17_spill] sm:$0xff] %v3379_v19  ;;  %v1243_v8 = vld [vmem:[#allocation2 + $0x33] sm:$0xff] }
  0x4c   : > { %v1031_v43 = vadd.f32 %v1023_v32, %v1002_v31  ;;  %v1169_v32 = vmul.f32 %v3379_v19, %v1156_v18  ;;  %v655_v42 = vadd.f32 %v647_v24, %v625_v23  ;;  %v916_v48 = vadd.f32 %v908_v28, %v886_v27  ;;  %v489_v18 = vld [vmem:[#allocation2 + $0x34] sm:$0xff] }
  0x4d   : > { %v995_v24 = vmul.f32 %v3331_v9, %v460_v0  ;;  %v1256_v27 = vmul.f32 %v3406_v10, %v1243_v8  ;;  %v1272_v28 = vld [vmem:[#allocation2 + $0x34] sm:$0xff]  ;;  %v502_v35 = vmul.f32 %v3214_v29, %v489_v18  ;;  %v3433_v8 = vld [vmem:[%s4779_s3 + $0x21] ss:$0 sm:$0xff] }
  0x4e   : > { %v1060_v56 = vadd.f32 %v1052_v44, %v1031_v43  ;;  %v676_v43 = vmul.f32 %v3250_v53, %v402_v26  ;;  %v431_v44 = vld [vmem:[#allocation2 + $0x32] sm:$0xff]  ;;  %v945_v2 = vadd.f32 %v937_v50, %v916_v48  ;;  %4954 = vst [vmem:[#allocation23_spill] sm:$0xff] %v3433_v8 }
  0x4f   : > { %v444_v60 = vmul.f32 %v3202_v21, %v431_v44  ;;  %v705_v62 = vmul.f32 %v3258_v59, %v431_v44 }
  0x50   : > { %v1089_v3 = vadd.f32 %v1081_v57, %v1060_v56  ;;  %v3397_v56 = vld [vmem:[%s4779_s3 + $0x1d] ss:$0 sm:$0xff]  ;;  %v423_v57 = vadd.f32 %v415_v40, %v386_v39  ;;  %v684_v61 = vadd.f32 %v676_v43, %v655_v42  ;;  %v763_v40 = vmul.f32 %v3272_v7, %v489_v18  ;;  %v518_v42 = vld [vmem:[#allocation2 + $0x35] sm:$0xff] }
  0x51   : > { %4950 = vst [vmem:[#allocation19_spill] sm:$0xff] %v3397_v56  ;;  %v1227_v6 = vmul.f32 %v3397_v56, %v1214_v55 }
  0x52   : > { %v1118_v14 = vadd.f32 %v1110_v4, %v1089_v3  ;;  %v966_v3 = vmul.f32 %v3323_v63, %v431_v44  ;;  %v452_v11 = vadd.f32 %v444_v60, %v423_v57  ;;  %v1024_v44 = vmul.f32 %v3339_v20, %v489_v18  ;;  %v576_v18 = vld [vmem:[#allocation2 + $0x37] sm:$0xff] }
  0x53   : > { %v531_v57 = vmul.f32 %v3220_v33, %v518_v42 }
  0x54   : > { %v1147_v31 = vadd.f32 %v1139_v16, %v1118_v14  ;;  %v713_v14 = vadd.f32 %v705_v62, %v684_v61  ;;  %v734_v16 = vmul.f32 %v3265_v1, %v460_v0  ;;  %v974_v23 = vadd.f32 %v966_v3, %v945_v2  ;;  %v547_v62 = vld [vmem:[#allocation2 + $0x36] sm:$0xff] }
  0x55   : > { %v792_v61 = vmul.f32 %v3279_v13, %v518_v42  ;;  %v1053_v2 = vmul.f32 %v3347_v34, %v518_v42  ;;  %v589_v42 = vmul.f32 %v3232_v41, %v576_v18 }
  0x56   : > { %v1177_v51 = vadd.f32 %v1169_v32, %v1147_v31  ;;  %v3415_v31 = vld [vmem:[%s4779_s3 + $0x1f] ss:$0 sm:$0xff]  ;;  %v481_v32 = vadd.f32 %v473_v12, %v452_v11  ;;  %v742_v39 = vadd.f32 %v734_v16, %v713_v14  ;;  %v1003_v43 = vadd.f32 %v995_v24, %v974_v23 }
  0x57   : > { %4952 = vst [vmem:[#allocation21_spill] sm:$0xff] %v3415_v31  ;;  %v1285_v50 = vmul.f32 %v3415_v31, %v1272_v28  ;;  %v560_v12 = vmul.f32 %v3226_v37, %v547_v62  ;;  %v821_v16 = vmul.f32 %v3286_v22, %v547_v62  ;;  %v1082_v24 = vmul.f32 %v3355_v47, %v547_v62 }
  0x58   : > { %v1206_v4 = vadd.f32 %v1198_v52, %v1177_v51  ;;  %v1301_v51 = vld [vmem:[#allocation2 + $0x35] sm:$0xff]  ;;  %v3424_v52 = vld [vmem:[%s4779_s3 + $0x20] ss:$0 sm:$0xff]  ;;  %v510_v55 = vadd.f32 %v502_v35, %v481_v32  ;;  %v771_v60 = vadd.f32 %v763_v40, %v742_v39  ;;  %v1032_v0 = vadd.f32 %v1024_v44, %v1003_v43  ;;  %v3445_v35 = vld [vmem:[%s4779_s3 + $0x22] ss:$0 sm:$0xff] }
  0x59   : > { %4953 = vst [vmem:[#allocation22_spill] sm:$0xff] %v3424_v52  ;;  %v1359_v32 = vld [vmem:[#allocation2 + $0x37] sm:$0xff]  ;;  %4955 = vst [vmem:[#allocation24_spill] sm:$0xff] %v3445_v35 }
  0x5a   : > { %v1235_v26 = vadd.f32 %v1227_v6, %v1206_v4  ;;  %v1314_v4 = vmul.f32 %v3424_v52, %v1301_v51  ;;  %v1330_v6 = vld [vmem:[#allocation2 + $0x36] sm:$0xff]  ;;  %v539_v11 = vadd.f32 %v531_v57, %v510_v55  ;;  %v800_v14 = vadd.f32 %v792_v61, %v771_v60 }
  0x5b   : > { %v1061_v23 = vadd.f32 %v1053_v2, %v1032_v0  ;;  %v1343_v28 = vmul.f32 %v3433_v8, %v1330_v6  ;;  %v850_v51 = vmul.f32 %v3293_v30, %v576_v18  ;;  %v1111_v57 = vmul.f32 %v3363_v58, %v576_v18  ;;  %v605_v2 = vld [vmem:[#allocation2 + $0x38] sm:$0xff] }
  0x5c   : > { %v1264_v48 = vadd.f32 %v1256_v27, %v1235_v26  ;;  %v2841_v26 = vld [vmem:[%s4778_s2] ss:$0 sm:$0xff]  ;;  %v568_v40 = vadd.f32 %v560_v12, %v539_v11  ;;  %v829_v43 = vadd.f32 %v821_v16, %v800_v14  ;;  %v1388_v16 = vld [vmem:[#allocation2 + $0x38] sm:$0xff] }
  0x5d   : > { %v1090_v55 = vadd.f32 %v1082_v24, %v1061_v23  ;;  %v3455_v23 = vld [vmem:[%s4779_s3 + $0x23] ss:$0 sm:$0xff] }
  0x5e   : > { %v1293_v3 = vadd.f32 %v1285_v50, %v1264_v48  ;;  %4956 = vst [vmem:[#allocation25_spill] sm:$0xff] %v3455_v23 }
  0x60   : > { %v1322_v27 = vadd.f32 %v1314_v4, %v1293_v3  ;;  %v1372_v4 = vmul.f32 %v3445_v35, %v1359_v32  ;;  %v618_v32 = vmul.f32 %v3238_v45, %v605_v2 }
  0x62   : > { %v1351_v3 = vadd.f32 %v1343_v28, %v1322_v27  ;;  %v597_v27 = vadd.f32 %v589_v42, %v568_v40  ;;  %v1401_v40 = vmul.f32 %v3455_v23, %v1388_v16 }
  0xf2   : > { %v2945_v39 = vpop.f32.mrb[0].mxu0 }
  0xf3   : > { %v298_v44 = vpop.f32.mrb[1].mxu0  ;;  %v307_v48 = vadd.f32 %v2945_v39, %v2841_v26  ;;  %v2949_v50 = vpop.f32.mrb[0].mxu1 }
  0xf4   : > { %v299_v60 = vadd.f32 %v2841_v26, %v298_v44  ;;  %v2946_v61 = vpop.f32.mrb[2].mxu0  ;;  %v314_v62 = vpop.f32.mrb[1].mxu1  ;;  %v323_v0 = vadd.f32 %v2949_v50, %v2841_v26  ;;  %v858_v44 = vadd.f32 %v850_v51, %v829_v43  ;;  %v1119_v50 = vadd.f32 %v1111_v57, %v1090_v55 }
  0xf5   : > { %v310_v6 = vadd.f32 %v2946_v61, %v2841_v26  ;;  %v301_v11 = vpop.f32.mrb[3].mxu0  ;;  %v315_v12 = vadd.f32 %v2841_v26, %v314_v62  ;;  %v2950_v14 = vpop.f32.mrb[2].mxu1  ;;  %364 = vst.msk [vmem:[#allocation2 + $0x64] sm:$0xff] %vm251_vm0, %v307_v48  ;;  %v879_v48 = vmul.f32 %v3300_v38, %v605_v2  ;;  %v1380_v61 = vadd.f32 %v1372_v4, %v1351_v3 }
  0xf6   : > { %v302_v18 = vadd.f32 %v2841_v26, %v301_v11  ;;  %v317_v24 = vpop.f32.mrb[3].mxu1  ;;  %v326_v39 = vadd.f32 %v2950_v14, %v2841_v26  ;;  %362 = vst.msk [vmem:[#allocation2 + $0x44] sm:$0xff] %vm251_vm0, %v299_v60  ;;  %368 = vst.msk [vmem:[#allocation2 + $0xa4] sm:$0xff] %vm251_vm0, %v323_v0  ;;  %v1140_v60 = vmul.f32 %v3371_v5, %v605_v2 }
  0xf7   : > { %v318_v28 = vadd.f32 %v2841_v26, %v317_v24  ;;  %365 = vst.msk [vmem:[#allocation2 + $0x74] sm:$0xff] %vm251_vm0, %v310_v6  ;;  %366 = vst.msk [vmem:[#allocation2 + $0x84] sm:$0xff] %vm251_vm0, %v315_v12  ;;  %v3474_v43 = vadd.f32 %v618_v32, %v597_v27  ;;  %v3476_v51 = vadd.f32 %v879_v48, %v858_v44 }
  0xf8   : > { %363 = vst.msk [vmem:[#allocation2 + $0x54] sm:$0xff] %vm251_vm0, %v302_v18  ;;  %369 = vst.msk [vmem:[#allocation2 + $0xb4] sm:$0xff] %vm251_vm0, %v326_v39  ;;  %v3478_v0 = vadd.f32 %v1140_v60, %v1119_v50  ;;  %v3480_v55 = vadd.f32 %v1401_v40, %v1380_v61 }
  0xf9   : > { %367 = vst.msk [vmem:[#allocation2 + $0x94] sm:$0xff] %vm251_vm0, %v318_v28  ;;  %4958 = vst [vmem:[#allocation27_spill] sm:$0xff] %v3476_v51 }
  0xfa   : > { %4959 = vst [vmem:[#allocation28_spill] sm:$0xff] %v3478_v0  ;;  %4960 = vst [vmem:[#allocation29_spill] sm:$0xff] %v3480_v55 }
  0xfc   : > { %v3468_v26 = vld [vmem:[#allocation2 + $0x60] sm:$0xff] }
  0xfd   : > { %4957 = vst [vmem:[#allocation26_spill] sm:$0xff] %v3468_v26  ;;  %v3470_v42 = vld [vmem:[#allocation2 + $0x61] sm:$0xff]  ;;  %v389_v2 = vmul.f32 %v3190_v15, %v3468_v26  ;;  %v3496_v12 = vmul.f32 %v3244_v49, %v3468_v26 }
  0xfe   : > { %v3472_v62 = vld [vmem:[#allocation2 + $0x62] sm:$0xff]  ;;  %v418_v4 = vmul.f32 %v3195_v17, %v3470_v42  ;;  %v3498_v14 = vld [vmem:[#allocation2 + $0x70] sm:$0xff] }
  0xff   : > { %v3482_v57 = vld [vmem:[#allocation2 + $0x40] sm:$0xff]  ;;  %v447_v11 = vmul.f32 %v3202_v21, %v3472_v62  ;;  %v3502_v18 = vld [vmem:[#allocation2 + $0x71] sm:$0xff]  ;;  %v390_v44 = vmul.f32 %v3190_v15, %v3498_v14 }
 0x100   : > { %4961 = vst [vmem:[#allocation30_spill] sm:$0xff] %v3482_v57  ;;  %v3486_v3 = vld [vmem:[#allocation2 + $0x41] sm:$0xff]  ;;  %v387_v16 = vmul.f32 %v3190_v15, %v3482_v57  ;;  %v3506_v39 = vld [vmem:[#allocation2 + $0x72] sm:$0xff]  ;;  %v3512_v28 = vmul.f32 %v3244_v49, %v3482_v57  ;;  %v419_v50 = vmul.f32 %v3195_v17, %v3502_v18  ;;  %v426_v60 = vadd.f32 %v418_v4, %v389_v2 }
 0x101   : > { %v3490_v6 = vld [vmem:[#allocation2 + $0x42] sm:$0xff]  ;;  %v416_v24 = vmul.f32 %v3195_v17, %v3486_v3  ;;  %v3514_v32 = vld [vmem:[#allocation2 + $0x50] sm:$0xff]  ;;  %v448_v40 = vmul.f32 %v3202_v21, %v3506_v39 }
 0x102   : > { %v445_v27 = vmul.f32 %v3202_v21, %v3490_v6  ;;  %v3518_v48 = vld [vmem:[#allocation2 + $0x51] sm:$0xff]  ;;  %v388_v55 = vmul.f32 %v3190_v15, %v3514_v32  ;;  %v3532_v52 = vld [vmem:[#allocation2 + $0x43] sm:$0xff]  ;;  %v427_v4 = vadd.f32 %v419_v50, %v390_v44  ;;  %v455_v10 = vadd.f32 %v447_v11, %v426_v60 }
 0x103   : > { %v3522_v61 = vld [vmem:[#allocation2 + $0x52] sm:$0xff]  ;;  %v417_v23 = vmul.f32 %v3195_v17, %v3518_v48  ;;  %v424_v35 = vadd.f32 %v416_v24, %v387_v16  ;;  %v3536_v2 = vld [vmem:[#allocation2 + $0x63] sm:$0xff]  ;;  %v474_v15 = vmul.f32 %v3208_v25, %v3532_v52 }
 0x104   : > { %v446_v8 = vmul.f32 %v3202_v21, %v3522_v61  ;;  %v3534_v31 = vld [vmem:[#allocation2 + $0x53] sm:$0xff]  ;;  %v3544_v16 = vld [vmem:[#allocation2 + $0x44] sm:$0xff]  ;;  %v476_v0 = vmul.f32 %v3208_v25, %v3536_v2  ;;  %v456_v19 = vadd.f32 %v448_v40, %v427_v4 }
 0x105   : > { %v3538_v56 = vld [vmem:[#allocation2 + $0x73] sm:$0xff]  ;;  %v475_v17 = vmul.f32 %v3208_v25, %v3534_v31  ;;  %v425_v21 = vadd.f32 %v417_v23, %v388_v55  ;;  %v453_v36 = vadd.f32 %v445_v27, %v424_v35  ;;  %v3552_v44 = vld [vmem:[#allocation2 + $0x64] sm:$0xff]  ;;  %v503_v5 = vmul.f32 %v3214_v29, %v3544_v16 }
 0x106   : > { %v3546_v24 = vld [vmem:[#allocation2 + $0x54] sm:$0xff]  ;;  %v477_v11 = vmul.f32 %v3208_v25, %v3538_v56  ;;  %v3556_v60 = vld [vmem:[#allocation2 + $0x45] sm:$0xff]  ;;  %v505_v35 = vmul.f32 %v3214_v29, %v3552_v44  ;;  %v484_v34 = vadd.f32 %v476_v0, %v455_v10 }
 0x107   : > { %v3554_v50 = vld [vmem:[#allocation2 + $0x74] sm:$0xff]  ;;  %v504_v23 = vmul.f32 %v3214_v29, %v3546_v24  ;;  %v3566_v27 = vld [vmem:[#allocation2 + $0x65] sm:$0xff]  ;;  %v454_v58 = vadd.f32 %v446_v8, %v425_v21  ;;  %v482_v47 = vadd.f32 %v474_v15, %v453_v36  ;;  %v532_v54 = vmul.f32 %v3220_v33, %v3556_v60 }
 0x108   : > { %v3564_v55 = vld [vmem:[#allocation2 + $0x55] sm:$0xff]  ;;  %v506_v40 = vmul.f32 %v3214_v29, %v3554_v50  ;;  %v3572_v4 = vld [vmem:[#allocation2 + $0x46] sm:$0xff]  ;;  %v485_v63 = vadd.f32 %v477_v11, %v456_v19  ;;  %v534_v36 = vmul.f32 %v3220_v33, %v3566_v27  ;;  %v513_v0 = vadd.f32 %v505_v35, %v484_v34 }
 0x109   : > { %v3568_v25 = vld [vmem:[#allocation2 + $0x75] sm:$0xff]  ;;  %v3576_v9 = vld [vmem:[#allocation2 + $0x66] sm:$0xff]  ;;  %v533_v51 = vmul.f32 %v3220_v33, %v3564_v55  ;;  %v483_v8 = vadd.f32 %v475_v17, %v454_v58  ;;  %v511_v29 = vadd.f32 %v503_v5, %v482_v47  ;;  %v561_v46 = vmul.f32 %v3226_v37, %v3572_v4 }
 0x10a   : > { %v3574_v20 = vld [vmem:[#allocation2 + $0x56] sm:$0xff]  ;;  %4962 = vst [vmem:[#allocation31_spill] sm:$0xff] %v3576_v9  ;;  %v535_v15 = vmul.f32 %v3220_v33, %v3568_v25  ;;  %v3588_v21 = vld [vmem:[#allocation2 + $0x47] sm:$0xff]  ;;  %v514_v26 = vadd.f32 %v506_v40, %v485_v63  ;;  %v563_v47 = vmul.f32 %v3226_v37, %v3576_v9  ;;  %v542_v5 = vadd.f32 %v534_v36, %v513_v0 }
 0x10b   : > { %v3584_v10 = vld [vmem:[#allocation2 + $0x76] sm:$0xff]  ;;  %4964 = vst [vmem:[#allocation33_spill] sm:$0xff] %v3588_v21  ;;  %v3592_v11 = vld [vmem:[#allocation2 + $0x67] sm:$0xff]  ;;  %v562_v57 = vmul.f32 %v3226_v37, %v3574_v20  ;;  %v512_v58 = vadd.f32 %v504_v23, %v483_v8  ;;  %v540_v33 = vadd.f32 %v532_v54, %v511_v29  ;;  %v590_v30 = vmul.f32 %v3232_v41, %v3588_v21 }
 0x10c   : > { %4963 = vst [vmem:[#allocation32_spill] sm:$0xff] %v3584_v10  ;;  %v3590_v19 = vld [vmem:[#allocation2 + $0x57] sm:$0xff]  ;;  %4966 = vst [vmem:[#allocation35_spill] sm:$0xff] %v3592_v11  ;;  %v564_v17 = vmul.f32 %v3226_v37, %v3584_v10  ;;  %v3604_v35 = vld [vmem:[#allocation2 + $0x48] sm:$0xff]  ;;  %v543_v38 = vadd.f32 %v535_v15, %v514_v26  ;;  %v592_v54 = vmul.f32 %v3232_v41, %v3592_v11 }
 0x10d   : > { %4965 = vst [vmem:[#allocation34_spill] sm:$0xff] %v3590_v19  ;;  %v3600_v34 = vld [vmem:[#allocation2 + $0x77] sm:$0xff]  ;;  %4967 = vst [vmem:[#allocation36_spill] sm:$0xff] %v3604_v35  ;;  %v3608_v40 = vld [vmem:[#allocation2 + $0x68] sm:$0xff]  ;;  %v591_v9 = vmul.f32 %v3232_v41, %v3590_v19  ;;  %v541_v36 = vadd.f32 %v533_v51, %v512_v58  ;;  %v569_v37 = vadd.f32 %v561_v46, %v540_v33 }
 0x10e   : > { %v3606_v63 = vld [vmem:[#allocation2 + $0x58] sm:$0xff]  ;;  %v571_v8 = vadd.f32 %v563_v47, %v542_v5  ;;  %v593_v29 = vmul.f32 %v3232_v41, %v3600_v34  ;;  %v3620_v0 = vld [vmem:[#allocation2 + $0x80] sm:$0xff]  ;;  %v572_v26 = vadd.f32 %v564_v17, %v543_v38  ;;  %v619_v15 = vmul.f32 %v3238_v45, %v3604_v35 }
 0x10f   : > { %4968 = vst [vmem:[#allocation37_spill] sm:$0xff] %v3606_v63  ;;  %v3616_v23 = vld [vmem:[#allocation2 + $0x78] sm:$0xff]  ;;  %v620_v19 = vmul.f32 %v3238_v45, %v3606_v63  ;;  %v621_v11 = vmul.f32 %v3238_v45, %v3608_v40  ;;  %v570_v21 = vadd.f32 %v562_v57, %v541_v36  ;;  %v598_v10 = vadd.f32 %v590_v30, %v569_v37  ;;  %v3638_v57 = vld [vmem:[#allocation2 + $0x81] sm:$0xff] }
 0x110   : > { %4969 = vst [vmem:[#allocation38_spill] sm:$0xff] %v3616_v23  ;;  %v600_v51 = vadd.f32 %v592_v54, %v571_v8  ;;  %v622_v46 = vmul.f32 %v3238_v45, %v3616_v23  ;;  %v601_v47 = vadd.f32 %v593_v29, %v572_v26  ;;  %v649_v41 = vmul.f32 %v3244_v49, %v3514_v32 }
 0x111   : > { %v651_v38 = vmul.f32 %v3244_v49, %v3498_v14  ;;  %v652_v58 = vmul.f32 %v3244_v49, %v3620_v0  ;;  %v599_v33 = vadd.f32 %v591_v9, %v570_v21  ;;  %v627_v5 = vadd.f32 %v619_v15, %v598_v10  ;;  %v3648_v21 = vld [vmem:[#allocation2 + $0x82] sm:$0xff] }
 0x112   : > { %v629_v17 = vadd.f32 %v621_v11, %v600_v51  ;;  %v656_v30 = vadd.f32 %v3512_v28, %v3474_v43  ;;  %v630_v54 = vadd.f32 %v622_v46, %v601_v47  ;;  %v677_v45 = vmul.f32 %v3250_v53, %v3486_v3 }
 0x113   : > { %v678_v36 = vmul.f32 %v3250_v53, %v3518_v48  ;;  %v679_v37 = vmul.f32 %v3250_v53, %v3470_v42  ;;  %v628_v8 = vadd.f32 %v620_v19, %v599_v33  ;;  %v657_v49 = vadd.f32 %v649_v41, %v627_v5 }
 0x114   : > { %v659_v9 = vadd.f32 %v651_v38, %v629_v17  ;;  %v680_v10 = vmul.f32 %v3250_v53, %v3502_v18  ;;  %v660_v43 = vadd.f32 %v652_v58, %v630_v54  ;;  %v681_v28 = vmul.f32 %v3250_v53, %v3638_v57  ;;  %v3663_v38 = vld [vmem:[#allocation2 + $0x83] sm:$0xff] }
 0x115   : > { %v685_v11 = vadd.f32 %v677_v45, %v656_v30  ;;  %v706_v29 = vmul.f32 %v3258_v59, %v3490_v6  ;;  %v658_v26 = vadd.f32 %v3496_v12, %v628_v8  ;;  %v686_v15 = vadd.f32 %v678_v36, %v657_v49  ;;  %v3675_v49 = vld [vmem:[#allocation2 + $0x84] sm:$0xff] }
 0x116   : > { %v688_v51 = vadd.f32 %v680_v10, %v659_v9  ;;  %v707_v19 = vmul.f32 %v3258_v59, %v3522_v61  ;;  %v689_v46 = vadd.f32 %v681_v28, %v660_v43  ;;  %v708_v47 = vmul.f32 %v3258_v59, %v3472_v62 }
 0x117   : > { %v709_v41 = vmul.f32 %v3258_v59, %v3506_v39  ;;  %v710_v53 = vmul.f32 %v3258_v59, %v3648_v21  ;;  %v687_v58 = vadd.f32 %v679_v37, %v658_v26  ;;  %v714_v33 = vadd.f32 %v706_v29, %v685_v11 }
 0x118   : > { %v715_v12 = vadd.f32 %v707_v19, %v686_v15  ;;  %v735_v5 = vmul.f32 %v3265_v1, %v3532_v52  ;;  %v736_v54 = vmul.f32 %v3265_v1, %v3534_v31  ;;  %v737_v45 = vmul.f32 %v3265_v1, %v3536_v2 }
 0x119   : > { %v717_v17 = vadd.f32 %v709_v41, %v688_v51  ;;  %v718_v30 = vadd.f32 %v710_v53, %v689_v46  ;;  %v716_v36 = vadd.f32 %v708_v47, %v687_v58  ;;  %v738_v59 = vmul.f32 %v3265_v1, %v3538_v56 }
 0x11a   : > { %v739_v37 = vmul.f32 %v3265_v1, %v3663_v38  ;;  %v743_v8 = vadd.f32 %v735_v5, %v714_v33  ;;  %v744_v9 = vadd.f32 %v736_v54, %v715_v12  ;;  %v764_v10 = vmul.f32 %v3272_v7, %v3544_v16  ;;  %v3685_v1 = vld [vmem:[#allocation2 + $0x85] sm:$0xff] }
 0x11b   : > { %v765_v43 = vmul.f32 %v3272_v7, %v3546_v24  ;;  %v766_v28 = vmul.f32 %v3272_v7, %v3552_v44  ;;  %v745_v11 = vadd.f32 %v737_v45, %v716_v36  ;;  %v746_v29 = vadd.f32 %v738_v59, %v717_v17 }
 0x11c   : > { %v747_v26 = vadd.f32 %v739_v37, %v718_v30  ;;  %v767_v15 = vmul.f32 %v3272_v7, %v3554_v50  ;;  %v768_v51 = vmul.f32 %v3272_v7, %v3675_v49  ;;  %v772_v19 = vadd.f32 %v764_v10, %v743_v8  ;;  %v3699_v30 = vld [vmem:[#allocation2 + $0x86] sm:$0xff] }
 0x11d   : > { %v773_v46 = vadd.f32 %v765_v43, %v744_v9  ;;  %v793_v47 = vmul.f32 %v3279_v13, %v3556_v60  ;;  %v774_v41 = vadd.f32 %v766_v28, %v745_v11  ;;  %v794_v58 = vmul.f32 %v3279_v13, %v3564_v55  ;;  %v4970_v9 = vld [vmem:[#allocation31_spill] sm:$0xff]  ;;  %v4971_v43 = vld [vmem:[#allocation32_spill] sm:$0xff] }
 0x11e   : > { %v775_v53 = vadd.f32 %v767_v15, %v746_v29  ;;  %v795_v33 = vmul.f32 %v3279_v13, %v3566_v27  ;;  %v776_v12 = vadd.f32 %v768_v51, %v747_v26  ;;  %v796_v5 = vmul.f32 %v3279_v13, %v3568_v25  ;;  %v4972_v15 = vld [vmem:[#allocation33_spill] sm:$0xff]  ;;  %v4973_v51 = vld [vmem:[#allocation6_spill] sm:$0xff] }
 0x11f   : > { %v797_v7 = vmul.f32 %v3279_v13, %v3685_v1  ;;  %v801_v17 = vadd.f32 %v793_v47, %v772_v19  ;;  %v802_v54 = vadd.f32 %v794_v58, %v773_v46  ;;  %v822_v36 = vmul.f32 %v3286_v22, %v3572_v4  ;;  %v3709_v13 = vld [vmem:[#allocation2 + $0x87] sm:$0xff] }
 0x120   : > { %v803_v45 = vadd.f32 %v795_v33, %v774_v41  ;;  %v823_v59 = vmul.f32 %v3286_v22, %v3574_v20  ;;  %v804_v37 = vadd.f32 %v796_v5, %v775_v53  ;;  %v824_v10 = vmul.f32 %v3286_v22, %v4970_v9  ;;  %v4974_v41 = vld [vmem:[#allocation34_spill] sm:$0xff]  ;;  %v4975_v58 = vld [vmem:[#allocation35_spill] sm:$0xff] }
 0x121   : > { %v805_v8 = vadd.f32 %v797_v7, %v776_v12  ;;  %v825_v28 = vmul.f32 %v3286_v22, %v4971_v43  ;;  %v826_v11 = vmul.f32 %v3286_v22, %v3699_v30  ;;  %v830_v29 = vadd.f32 %v822_v36, %v801_v17  ;;  %v3723_v17 = vld [vmem:[#allocation2 + $0x88] sm:$0xff] }
 0x122   : > { %v831_v26 = vadd.f32 %v823_v59, %v802_v54  ;;  %v851_v19 = vmul.f32 %v4973_v51, %v4972_v15  ;;  %v832_v46 = vadd.f32 %v824_v10, %v803_v45  ;;  %v852_v53 = vmul.f32 %v4973_v51, %v4974_v41  ;;  %v4976_v45 = vld [vmem:[#allocation7_spill] sm:$0xff] }
 0x123   : > { %v833_v47 = vadd.f32 %v825_v28, %v804_v37  ;;  %v853_v33 = vmul.f32 %v4973_v51, %v4975_v58  ;;  %v834_v12 = vadd.f32 %v826_v11, %v805_v8  ;;  %v854_v5 = vmul.f32 %v4973_v51, %v3600_v34 }
 0x124   : > { %v855_v22 = vmul.f32 %v4973_v51, %v3709_v13  ;;  %v859_v7 = vadd.f32 %v851_v19, %v830_v29  ;;  %v860_v54 = vadd.f32 %v852_v53, %v831_v26  ;;  %v880_v59 = vmul.f32 %v4976_v45, %v3604_v35  ;;  %v3733_v51 = vld [vmem:[#allocation2 + $0x90] sm:$0xff] }
 0x125   : > { %v861_v36 = vadd.f32 %v853_v33, %v832_v46  ;;  %v881_v37 = vmul.f32 %v4976_v45, %v3606_v63  ;;  %v862_v10 = vadd.f32 %v854_v5, %v833_v47  ;;  %v882_v8 = vmul.f32 %v4976_v45, %v3608_v40  ;;  %v4977_v46 = vld [vmem:[#allocation30_spill] sm:$0xff]  ;;  %v4978_v53 = vld [vmem:[#allocation8_spill] sm:$0xff] }
 0x126   : > { %v863_v28 = vadd.f32 %v855_v22, %v834_v12  ;;  %v883_v11 = vmul.f32 %v4976_v45, %v3616_v23  ;;  %v884_v29 = vmul.f32 %v4976_v45, %v3723_v17  ;;  %v888_v26 = vadd.f32 %v880_v59, %v859_v7  ;;  %v4979_v12 = vld [vmem:[#allocation26_spill] sm:$0xff] }
 0x127   : > { %v889_v19 = vadd.f32 %v881_v37, %v860_v54  ;;  %v909_v33 = vmul.f32 %v4978_v53, %v4977_v46  ;;  %v890_v35 = vadd.f32 %v882_v8, %v861_v36  ;;  %v910_v47 = vmul.f32 %v4978_v53, %v3514_v32  ;;  %v3749_v54 = vld [vmem:[#allocation2 + $0x91] sm:$0xff]  ;;  %v4980_v36 = vld [vmem:[#allocation27_spill] sm:$0xff] }
 0x128   : > { %v891_v63 = vadd.f32 %v883_v11, %v862_v10  ;;  %v911_v5 = vmul.f32 %v4978_v53, %v4979_v12  ;;  %v892_v22 = vadd.f32 %v884_v29, %v863_v28  ;;  %v912_v23 = vmul.f32 %v4978_v53, %v3498_v14  ;;  %v4981_v32 = vld [vmem:[#allocation9_spill] sm:$0xff] }
 0x129   : > { %v913_v45 = vmul.f32 %v4978_v53, %v3620_v0  ;;  %v914_v7 = vmul.f32 %v4978_v53, %v3733_v51  ;;  %v917_v59 = vadd.f32 %v909_v33, %v4980_v36  ;;  %v918_v37 = vadd.f32 %v910_v47, %v888_v26 }
 0x12a   : > { %v919_v10 = vadd.f32 %v911_v5, %v889_v19  ;;  %v938_v8 = vmul.f32 %v4981_v32, %v3486_v3  ;;  %v920_v11 = vadd.f32 %v912_v23, %v890_v35  ;;  %v939_v14 = vmul.f32 %v4981_v32, %v3518_v48  ;;  %v3764_v19 = vld [vmem:[#allocation2 + $0x92] sm:$0xff] }
 0x12b   : > { %v921_v28 = vadd.f32 %v913_v45, %v891_v63  ;;  %v922_v29 = vadd.f32 %v914_v7, %v892_v22  ;;  %v940_v46 = vmul.f32 %v4981_v32, %v3470_v42  ;;  %v941_v53 = vmul.f32 %v4981_v32, %v3502_v18  ;;  %v4982_v63 = vld [vmem:[#allocation10_spill] sm:$0xff] }
 0x12c   : > { %v942_v33 = vmul.f32 %v4981_v32, %v3638_v57  ;;  %v943_v26 = vmul.f32 %v4981_v32, %v3749_v54  ;;  %v946_v3 = vadd.f32 %v938_v8, %v917_v59  ;;  %v947_v35 = vadd.f32 %v939_v14, %v918_v37  ;;  %v4983_v59 = vld [vmem:[#allocation11_spill] sm:$0xff] }
 0x12d   : > { %v967_v23 = vmul.f32 %v4982_v63, %v3490_v6  ;;  %v968_v48 = vmul.f32 %v4982_v63, %v3522_v61  ;;  %v948_v42 = vadd.f32 %v940_v46, %v919_v10  ;;  %v949_v47 = vadd.f32 %v941_v53, %v920_v11  ;;  %v3778_v6 = vld [vmem:[#allocation2 + $0x93] sm:$0xff] }
 0x12e   : > { %v950_v12 = vadd.f32 %v942_v33, %v921_v28  ;;  %v951_v18 = vadd.f32 %v943_v26, %v922_v29  ;;  %v969_v5 = vmul.f32 %v4982_v63, %v3472_v62  ;;  %v970_v22 = vmul.f32 %v4982_v63, %v3506_v39  ;;  %v4985_v53 = vld [vmem:[#allocation12_spill] sm:$0xff] }
 0x12f   : > { %v971_v45 = vmul.f32 %v4982_v63, %v3648_v21  ;;  %v972_v7 = vmul.f32 %v4982_v63, %v3764_v19  ;;  %v975_v36 = vadd.f32 %v967_v23, %v946_v3  ;;  %v976_v61 = vadd.f32 %v968_v48, %v947_v35 }
 0x130   : > { %v996_v37 = vmul.f32 %v4983_v59, %v3532_v52  ;;  %v997_v10 = vmul.f32 %v4983_v59, %v3534_v31  ;;  %v977_v62 = vadd.f32 %v969_v5, %v948_v42  ;;  %v978_v32 = vadd.f32 %v970_v22, %v949_v47  ;;  %v3792_v52 = vld [vmem:[#allocation2 + $0x94] sm:$0xff] }
 0x131   : > { %v979_v8 = vadd.f32 %v971_v45, %v950_v12  ;;  %v980_v39 = vadd.f32 %v972_v7, %v951_v18  ;;  %v998_v11 = vmul.f32 %v4983_v59, %v3536_v2  ;;  %v999_v28 = vmul.f32 %v4983_v59, %v3538_v56  ;;  %4984 = vst [vmem:[#allocation31_spill] sm:$0xff] %v3792_v52  ;;  %v4987_v12 = vld [vmem:[#allocation13_spill] sm:$0xff] }
 0x132   : > { %v1000_v29 = vmul.f32 %v4983_v59, %v3663_v38  ;;  %v1001_v14 = vmul.f32 %v4983_v59, %v3778_v6  ;;  %v1004_v46 = vadd.f32 %v996_v37, %v975_v36  ;;  %v1005_v31 = vadd.f32 %v997_v10, %v976_v61  ;;  %v4989_v10 = vld [vmem:[#allocation14_spill] sm:$0xff] }
 0x133   : > { %v1025_v33 = vmul.f32 %v4985_v53, %v3544_v16  ;;  %v1026_v26 = vmul.f32 %v4985_v53, %v3546_v24  ;;  %v1006_v2 = vadd.f32 %v998_v11, %v977_v62  ;;  %v1007_v3 = vadd.f32 %v999_v28, %v978_v32  ;;  %v3806_v16 = vld [vmem:[#allocation2 + $0x95] sm:$0xff] }
 0x134   : > { %v1008_v35 = vadd.f32 %v1000_v29, %v979_v8  ;;  %v1009_v56 = vadd.f32 %v1001_v14, %v980_v39  ;;  %v1027_v63 = vmul.f32 %v4985_v53, %v3552_v44  ;;  %v1028_v23 = vmul.f32 %v4985_v53, %v3554_v50  ;;  %4986 = vst [vmem:[#allocation32_spill] sm:$0xff] %v3806_v16 }
 0x135   : > { %v1029_v48 = vmul.f32 %v4985_v53, %v3675_v49  ;;  %v1030_v42 = vmul.f32 %v4985_v53, %v3792_v52  ;;  %v1033_v47 = vadd.f32 %v1025_v33, %v1004_v46  ;;  %v1034_v24 = vadd.f32 %v1026_v26, %v1005_v31  ;;  %v4991_v31 = vld [vmem:[#allocation15_spill] sm:$0xff] }
 0x136   : > { %v1054_v18 = vmul.f32 %v4987_v12, %v3556_v60  ;;  %v1055_v5 = vmul.f32 %v4987_v12, %v3564_v55  ;;  %v1035_v44 = vadd.f32 %v1027_v63, %v1006_v2  ;;  %v1036_v22 = vadd.f32 %v1028_v23, %v1007_v3  ;;  %v3820_v60 = vld [vmem:[#allocation2 + $0x96] sm:$0xff] }
 0x137   : > { %v1037_v45 = vadd.f32 %v1029_v48, %v1008_v35  ;;  %v1038_v50 = vadd.f32 %v1030_v42, %v1009_v56  ;;  %v1056_v7 = vmul.f32 %v4987_v12, %v3566_v27  ;;  %v1057_v36 = vmul.f32 %v4987_v12, %v3568_v25  ;;  %4988 = vst [vmem:[#allocation33_spill] sm:$0xff] %v3820_v60  ;;  %v4993_v48 = vld [vmem:[#allocation36_spill] sm:$0xff] }
 0x138   : > { %v1058_v61 = vmul.f32 %v4987_v12, %v3685_v1  ;;  %v1059_v59 = vmul.f32 %v4987_v12, %v3806_v16  ;;  %v1062_v37 = vadd.f32 %v1054_v18, %v1033_v47  ;;  %v1063_v55 = vadd.f32 %v1055_v5, %v1034_v24  ;;  %v4994_v42 = vld [vmem:[#allocation16_spill] sm:$0xff]  ;;  %v4995_v24 = vld [vmem:[#allocation37_spill] sm:$0xff] }
 0x139   : > { %v1083_v62 = vmul.f32 %v4989_v10, %v3572_v4  ;;  %v1084_v32 = vmul.f32 %v4989_v10, %v3574_v20  ;;  %v1064_v27 = vadd.f32 %v1056_v7, %v1035_v44  ;;  %v1065_v8 = vadd.f32 %v1057_v36, %v1036_v22  ;;  %v3834_v4 = vld [vmem:[#allocation2 + $0x97] sm:$0xff] }
 0x13a   : > { %v1066_v39 = vadd.f32 %v1058_v61, %v1037_v45  ;;  %v1067_v25 = vadd.f32 %v1059_v59, %v1038_v50  ;;  %v1085_v11 = vmul.f32 %v4989_v10, %v4970_v9  ;;  %v1086_v28 = vmul.f32 %v4989_v10, %v4971_v43  ;;  %4990 = vst [vmem:[#allocation6_spill] sm:$0xff] %v3834_v4  ;;  %v3856_v18 = vld [vmem:[#allocation2 + $0x50] sm:$0xff]  ;;  %v4996_v50 = vld [vmem:[#allocation38_spill] sm:$0xff] }
 0x13b   : > { %v1087_v29 = vmul.f32 %v4989_v10, %v3699_v30  ;;  %v1088_v14 = vmul.f32 %v4989_v10, %v3820_v60  ;;  %v1091_v46 = vadd.f32 %v1083_v62, %v1062_v37  ;;  %v1092_v20 = vadd.f32 %v1084_v32, %v1063_v55  ;;  %v3866_v59 = vld [vmem:[#allocation2 + $0x60] sm:$0xff]  ;;  %v3868_v37 = vld [vmem:[#allocation2 + $0x70] sm:$0xff]  ;;  %v4998_v32 = vld [vmem:[#allocation17_spill] sm:$0xff] }
 0x13c   : > { %v1112_v53 = vmul.f32 %v4991_v31, %v4972_v15  ;;  %v1113_v33 = vmul.f32 %v4991_v31, %v4974_v41  ;;  %v1093_v9 = vadd.f32 %v1085_v11, %v1064_v27  ;;  %v1094_v26 = vadd.f32 %v1086_v28, %v1065_v8  ;;  %v3848_v15 = vld [vmem:[#allocation2 + $0x98] sm:$0xff]  ;;  %v3870_v62 = vld [vmem:[#allocation2 + $0xa0] sm:$0xff] }
 0x13d   : > { %v1095_v2 = vadd.f32 %v1087_v29, %v1066_v39  ;;  %v1096_v43 = vadd.f32 %v1088_v14, %v1067_v25  ;;  %v1114_v3 = vmul.f32 %v4991_v31, %v4975_v58  ;;  %v1115_v35 = vmul.f32 %v4991_v31, %v3600_v34  ;;  %4992 = vst [vmem:[#allocation34_spill] sm:$0xff] %v3848_v15  ;;  %v3854_v58 = vld [vmem:[#allocation2 + $0x40] sm:$0xff] }
 0x13e   : > { %v1116_v56 = vmul.f32 %v4991_v31, %v3709_v13  ;;  %v1117_v63 = vmul.f32 %v4991_v31, %v3834_v4  ;;  %v1120_v23 = vadd.f32 %v1112_v53, %v1091_v46  ;;  %v1121_v41 = vadd.f32 %v1113_v33, %v1092_v20  ;;  %4997 = vst [vmem:[#allocation35_spill] sm:$0xff] %v3870_v62  ;;  %v3876_v8 = vld [vmem:[#allocation2 + $0x41] sm:$0xff]  ;;  %v3886_v31 = vld [vmem:[#allocation2 + $0x51] sm:$0xff] }
 0x13f   : > { %v1141_v47 = vmul.f32 %v4994_v42, %v4993_v48  ;;  %v1142_v12 = vmul.f32 %v4994_v42, %v4995_v24  ;;  %v1122_v34 = vadd.f32 %v1114_v3, %v1093_v9  ;;  %v1123_v5 = vadd.f32 %v1115_v35, %v1094_v26  ;;  %v3888_v53 = vld [vmem:[#allocation2 + $0x61] sm:$0xff]  ;;  %v3890_v33 = vld [vmem:[#allocation2 + $0x71] sm:$0xff] }
 0x140   : > { %v1124_v44 = vadd.f32 %v1116_v56, %v1095_v2  ;;  %v1125_v22 = vadd.f32 %v1117_v63, %v1096_v43  ;;  %v1143_v45 = vmul.f32 %v4994_v42, %v3608_v40  ;;  %v1144_v7 = vmul.f32 %v4994_v42, %v4996_v50  ;;  %v4999_v26 = vld [vmem:[#allocation28_spill] sm:$0xff]  ;;  %v3895_v3 = vld [vmem:[#allocation2 + $0xa1] sm:$0xff] }
 0x141   : > { %v1145_v36 = vmul.f32 %v4994_v42, %v3723_v17  ;;  %v1146_v61 = vmul.f32 %v4994_v42, %v3848_v15  ;;  %v1149_v55 = vadd.f32 %v1141_v47, %v1120_v23  ;;  %v1150_v10 = vadd.f32 %v1142_v12, %v1121_v41  ;;  %v5000_v35 = vld [vmem:[#allocation18_spill] sm:$0xff] }
 0x142   : > { %v1170_v40 = vmul.f32 %v4998_v32, %v3854_v58  ;;  %v1171_v27 = vmul.f32 %v4998_v32, %v3856_v18  ;;  %v1151_v39 = vadd.f32 %v1143_v45, %v1122_v34  ;;  %v1152_v25 = vadd.f32 %v1144_v7, %v1123_v5  ;;  %v3899_v48 = vld [vmem:[#allocation2 + $0x42] sm:$0xff]  ;;  %v3907_v34 = vld [vmem:[#allocation2 + $0x52] sm:$0xff] }
 0x143   : > { %v1153_v11 = vadd.f32 %v1145_v36, %v1124_v44  ;;  %v1154_v28 = vadd.f32 %v1146_v61, %v1125_v22  ;;  %v1172_v29 = vmul.f32 %v4998_v32, %v3866_v59  ;;  %v1173_v14 = vmul.f32 %v4998_v32, %v3868_v37  ;;  %v3915_v50 = vld [vmem:[#allocation2 + $0x62] sm:$0xff]  ;;  %v3917_v7 = vld [vmem:[#allocation2 + $0x72] sm:$0xff] }
 0x144   : > { %v1174_v46 = vmul.f32 %v4998_v32, %v3620_v0  ;;  %v1175_v20 = vmul.f32 %v4998_v32, %v3733_v51  ;;  %v1176_v9 = vmul.f32 %v4998_v32, %v3870_v62  ;;  %v1178_v2 = vadd.f32 %v1170_v40, %v4999_v26  ;;  %v5001_v32 = vld [vmem:[#allocation19_spill] sm:$0xff]  ;;  %v3939_v26 = vld [vmem:[#allocation2 + $0x73] sm:$0xff] }
 0x145   : > { %v1179_v43 = vadd.f32 %v1171_v27, %v1149_v55  ;;  %v1199_v0 = vmul.f32 %v5000_v35, %v3876_v8  ;;  %v1180_v56 = vadd.f32 %v1172_v29, %v1150_v10  ;;  %v1181_v63 = vadd.f32 %v1173_v14, %v1151_v39  ;;  %v3919_v10 = vld [vmem:[#allocation2 + $0xa2] sm:$0xff]  ;;  %5002 = vst [vmem:[#allocation7_spill] sm:$0xff] %v3939_v26 }
 0x146   : > { %v1182_v23 = vadd.f32 %v1174_v46, %v1152_v25  ;;  %v1183_v41 = vadd.f32 %v1175_v20, %v1153_v11  ;;  %v1184_v42 = vadd.f32 %v1176_v9, %v1154_v28  ;;  %v1200_v47 = vmul.f32 %v5000_v35, %v3886_v31  ;;  %v3935_v20 = vld [vmem:[#allocation2 + $0x53] sm:$0xff]  ;;  %v3937_v9 = vld [vmem:[#allocation2 + $0x63] sm:$0xff] }
 0x147   : > { %v1201_v24 = vmul.f32 %v5000_v35, %v3888_v53  ;;  %v1202_v12 = vmul.f32 %v5000_v35, %v3890_v33  ;;  %v1203_v5 = vmul.f32 %v5000_v35, %v3638_v57  ;;  %v1204_v44 = vmul.f32 %v5000_v35, %v3749_v54  ;;  %v3923_v57 = vld [vmem:[#allocation2 + $0x43] sm:$0xff] }
 0x148   : > { %v1205_v22 = vmul.f32 %v5000_v35, %v3895_v3  ;;  %v1207_v45 = vadd.f32 %v1199_v0, %v1178_v2  ;;  %v1208_v36 = vadd.f32 %v1200_v47, %v1179_v43  ;;  %v1228_v40 = vmul.f32 %v5001_v32, %v3899_v48  ;;  %v3943_v0 = vld [vmem:[#allocation2 + $0xa3] sm:$0xff] }
 0x149   : > { %v1209_v61 = vadd.f32 %v1201_v24, %v1180_v56  ;;  %v1210_v55 = vadd.f32 %v1202_v12, %v1181_v63  ;;  %v1211_v27 = vadd.f32 %v1203_v5, %v1182_v23  ;;  %v1212_v39 = vadd.f32 %v1204_v44, %v1183_v41  ;;  %5003 = vst [vmem:[#allocation30_spill] sm:$0xff] %v3943_v0  ;;  %v5004_v56 = vld [vmem:[#allocation20_spill] sm:$0xff]  ;;  %v3947_v47 = vld [vmem:[#allocation2 + $0x44] sm:$0xff] }
 0x14a   : > { %v1213_v25 = vadd.f32 %v1205_v22, %v1184_v42  ;;  %v1229_v11 = vmul.f32 %v5001_v32, %v3907_v34  ;;  %v1230_v28 = vmul.f32 %v5001_v32, %v3915_v50  ;;  %v1231_v29 = vmul.f32 %v5001_v32, %v3917_v7  ;;  %5005 = vst [vmem:[#allocation8_spill] sm:$0xff] %v3947_v47  ;;  %v3955_v22 = vld [vmem:[#allocation2 + $0x54] sm:$0xff] }
 0x14b   : > { %v1232_v14 = vmul.f32 %v5001_v32, %v3648_v21  ;;  %v1233_v46 = vmul.f32 %v5001_v32, %v3764_v19  ;;  %v1234_v2 = vmul.f32 %v5001_v32, %v3919_v10  ;;  %v1236_v43 = vadd.f32 %v1228_v40, %v1207_v45  ;;  %5006 = vst [vmem:[#allocation26_spill] sm:$0xff] %v3955_v22  ;;  %v3963_v32 = vld [vmem:[#allocation2 + $0x64] sm:$0xff]  ;;  %v3965_v40 = vld [vmem:[#allocation2 + $0x74] sm:$0xff] }
 0x14c   : > { %v1237_v35 = vadd.f32 %v1229_v11, %v1208_v36  ;;  %v1257_v63 = vmul.f32 %v5004_v56, %v3923_v57  ;;  %v1238_v21 = vadd.f32 %v1230_v28, %v1209_v61  ;;  %v1239_v23 = vadd.f32 %v1231_v29, %v1210_v55  ;;  %5007 = vst [vmem:[#allocation27_spill] sm:$0xff] %v3963_v32  ;;  %v3967_v11 = vld [vmem:[#allocation2 + $0xa4] sm:$0xff]  ;;  %v5010_v28 = vld [vmem:[#allocation21_spill] sm:$0xff] }
 0x14d   : > { %v1240_v41 = vadd.f32 %v1232_v14, %v1211_v27  ;;  %v1241_v42 = vadd.f32 %v1233_v46, %v1212_v39  ;;  %v1242_v24 = vadd.f32 %v1234_v2, %v1213_v25  ;;  %v1258_v12 = vmul.f32 %v5004_v56, %v3935_v20  ;;  %5008 = vst [vmem:[#allocation9_spill] sm:$0xff] %v3965_v40 }
 0x14e   : > { %v1259_v5 = vmul.f32 %v5004_v56, %v3937_v9  ;;  %v1260_v44 = vmul.f32 %v5004_v56, %v3939_v26  ;;  %v1261_v45 = vmul.f32 %v5004_v56, %v3663_v38  ;;  %v1262_v36 = vmul.f32 %v5004_v56, %v3778_v6  ;;  %5009 = vst [vmem:[#allocation10_spill] sm:$0xff] %v3967_v11  ;;  %v3971_v38 = vld [vmem:[#allocation2 + $0x45] sm:$0xff] }
 0x14f   : > { %v1263_v61 = vmul.f32 %v5004_v56, %v3943_v0  ;;  %v1265_v55 = vadd.f32 %v1257_v63, %v1236_v43  ;;  %v1266_v27 = vadd.f32 %v1258_v12, %v1237_v35  ;;  %v1286_v29 = vmul.f32 %v5010_v28, %v3947_v47 }
 0x150   : > { %v1267_v39 = vadd.f32 %v1259_v5, %v1238_v21  ;;  %v1268_v25 = vadd.f32 %v1260_v44, %v1239_v23  ;;  %v1269_v14 = vadd.f32 %v1261_v45, %v1240_v41  ;;  %v1270_v46 = vadd.f32 %v1262_v36, %v1241_v42  ;;  %v3983_v23 = vld [vmem:[#allocation2 + $0x55] sm:$0xff]  ;;  %v3985_v41 = vld [vmem:[#allocation2 + $0x65] sm:$0xff] }
 0x151   : > { %v1271_v2 = vadd.f32 %v1263_v61, %v1242_v24  ;;  %v1287_v43 = vmul.f32 %v5010_v28, %v3955_v22  ;;  %v1288_v56 = vmul.f32 %v5010_v28, %v3963_v32  ;;  %v1289_v35 = vmul.f32 %v5010_v28, %v3965_v40  ;;  %5011 = vst [vmem:[#allocation11_spill] sm:$0xff] %v3985_v41  ;;  %v3987_v42 = vld [vmem:[#allocation2 + $0x75] sm:$0xff]  ;;  %v3991_v44 = vld [vmem:[#allocation2 + $0xa5] sm:$0xff] }
 0x152   : > { %v1290_v63 = vmul.f32 %v5010_v28, %v3675_v49  ;;  %v1291_v21 = vmul.f32 %v5010_v28, %v3792_v52  ;;  %5012 = vst [vmem:[#allocation12_spill] sm:$0xff] %v3987_v42  ;;  %v1292_v24 = vmul.f32 %v5010_v28, %v3967_v11  ;;  %v1294_v12 = vadd.f32 %v1286_v29, %v1265_v55  ;;  %v5014_v45 = vld [vmem:[#allocation22_spill] sm:$0xff] }
 0x153   : > { %v1295_v5 = vadd.f32 %v1287_v43, %v1266_v27  ;;  %5013 = vst [vmem:[#allocation13_spill] sm:$0xff] %v3991_v44  ;;  %v1315_v36 = vmul.f32 %v5014_v45, %v3971_v38  ;;  %v1296_v49 = vadd.f32 %v1288_v56, %v1267_v39  ;;  %v1297_v61 = vadd.f32 %v1289_v35, %v1268_v25  ;;  %v3995_v32 = vld [vmem:[#allocation2 + $0x46] sm:$0xff]  ;;  %v4003_v27 = vld [vmem:[#allocation2 + $0x56] sm:$0xff] }
 0x154   : > { %v1298_v40 = vadd.f32 %v1290_v63, %v1269_v14  ;;  %v1299_v52 = vadd.f32 %v1291_v21, %v1270_v46  ;;  %5015 = vst [vmem:[#allocation14_spill] sm:$0xff] %v3995_v32  ;;  %v1300_v22 = vadd.f32 %v1292_v24, %v1271_v2  ;;  %v1316_v47 = vmul.f32 %v5014_v45, %v3983_v23  ;;  %v4011_v46 = vld [vmem:[#allocation2 + $0x66] sm:$0xff]  ;;  %v4013_v2 = vld [vmem:[#allocation2 + $0x76] sm:$0xff] }
 0x155   : > { %v1317_v28 = vmul.f32 %v5014_v45, %v3985_v41  ;;  %v1318_v55 = vmul.f32 %v5014_v45, %v3987_v42  ;;  %5016 = vst [vmem:[#allocation15_spill] sm:$0xff] %v4003_v27  ;;  %v1319_v39 = vmul.f32 %v5014_v45, %v3685_v1  ;;  %v1320_v25 = vmul.f32 %v5014_v45, %v3806_v16  ;;  %v4015_v63 = vld [vmem:[#allocation2 + $0xa6] sm:$0xff] }
 0x156   : > { %v1321_v29 = vmul.f32 %v5014_v45, %v3991_v44  ;;  %v1323_v14 = vadd.f32 %v1315_v36, %v1294_v12  ;;  %5017 = vst [vmem:[#allocation36_spill] sm:$0xff] %v4011_v46  ;;  %5018 = vst [vmem:[#allocation16_spill] sm:$0xff] %v4013_v2  ;;  %v1324_v43 = vadd.f32 %v1316_v47, %v1295_v5  ;;  %v5020_v21 = vld [vmem:[#allocation23_spill] sm:$0xff] }
 0x157   : > { %v1325_v56 = vadd.f32 %v1317_v28, %v1296_v49  ;;  %v1326_v35 = vadd.f32 %v1318_v55, %v1297_v61  ;;  %5019 = vst [vmem:[#allocation37_spill] sm:$0xff] %v4015_v63  ;;  %v1344_v24 = vmul.f32 %v5020_v21, %v3995_v32  ;;  %v4019_v1 = vld [vmem:[#allocation2 + $0x47] sm:$0xff]  ;;  %v1327_v42 = vadd.f32 %v1319_v39, %v1298_v40  ;;  %v4031_v49 = vld [vmem:[#allocation2 + $0x57] sm:$0xff] }
 0x158   : > { %v1328_v16 = vadd.f32 %v1320_v25, %v1299_v52  ;;  %v1329_v41 = vadd.f32 %v1321_v29, %v1300_v22  ;;  %v1345_v12 = vmul.f32 %v5020_v21, %v4003_v27  ;;  %v1346_v45 = vmul.f32 %v5020_v21, %v4011_v46  ;;  %v4033_v40 = vld [vmem:[#allocation2 + $0x67] sm:$0xff]  ;;  %v4035_v52 = vld [vmem:[#allocation2 + $0x77] sm:$0xff] }
 0x159   : > { %v1347_v47 = vmul.f32 %v5020_v21, %v4013_v2  ;;  %v1348_v5 = vmul.f32 %v5020_v21, %v3699_v30  ;;  %v1349_v36 = vmul.f32 %v5020_v21, %v3820_v60  ;;  %5021 = vst [vmem:[#allocation38_spill] sm:$0xff] %v4035_v52  ;;  %v1350_v22 = vmul.f32 %v5020_v21, %v4015_v63  ;;  %v4039_v55 = vld [vmem:[#allocation2 + $0xa7] sm:$0xff]  ;;  %v5023_v39 = vld [vmem:[#allocation24_spill] sm:$0xff] }
 0x15a   : > { %v1352_v61 = vadd.f32 %v1344_v24, %v1323_v14  ;;  %v1353_v28 = vadd.f32 %v1345_v12, %v1324_v43  ;;  %5022 = vst [vmem:[#allocation17_spill] sm:$0xff] %v4039_v55  ;;  %v1373_v25 = vmul.f32 %v5023_v39, %v4019_v1  ;;  %v1354_v30 = vadd.f32 %v1346_v45, %v1325_v56  ;;  %v4043_v46 = vld [vmem:[#allocation2 + $0x48] sm:$0xff]  ;;  %v4051_v43 = vld [vmem:[#allocation2 + $0x58] sm:$0xff]  ;;  %v2996_v56 = vld [vmem:[%s4779_s3 + $0x22] ss:$0 sm:$0xff] }
 0x15b   : > { %v1355_v29 = vadd.f32 %v1347_v47, %v1326_v35  ;;  %v1356_v2 = vadd.f32 %v1348_v5, %v1327_v42  ;;  %v1357_v60 = vadd.f32 %v1349_v36, %v1328_v16  ;;  %v1358_v27 = vadd.f32 %v1350_v22, %v1329_v41  ;;  %5024 = vst [vmem:[#allocation28_spill] sm:$0xff] %v4051_v43  ;;  %v4059_v24 = vld [vmem:[#allocation2 + $0x68] sm:$0xff]  ;;  %v4061_v12 = vld [vmem:[#allocation2 + $0x78] sm:$0xff] }
 0x15c   : > { %v1374_v32 = vmul.f32 %v5023_v39, %v4031_v49  ;;  %v1375_v21 = vmul.f32 %v5023_v39, %v4033_v40  ;;  %v1376_v14 = vmul.f32 %v5023_v39, %v4035_v52  ;;  %v1377_v16 = vmul.f32 %v2996_v56, %v3709_v13  ;;  %5025 = vst [vmem:[#allocation18_spill] sm:$0xff] %v4059_v24  ;;  %v4063_v36 = vld [vmem:[#allocation2 + $0xa8] sm:$0xff]  ;;  %v5027_v22 = vld [vmem:[#allocation25_spill] sm:$0xff]  ;;  %v2883_v13 = vld [vmem:[%s4779_s3 + $0x24] ss:$0 sm:$0xff] }
 0x15d   : > { %v1378_v42 = vmul.f32 %v2996_v56, %v3834_v4  ;;  %v1379_v41 = vmul.f32 %v2996_v56, %v4039_v55  ;;  %v1381_v35 = vadd.f32 %v1373_v25, %v1352_v61  ;;  %5026 = vst [vmem:[#allocation19_spill] sm:$0xff] %v4061_v12  ;;  %v1402_v39 = vmul.f32 %v5027_v22, %v4043_v46 }
 0x15e   : > { %v1382_v45 = vadd.f32 %v1374_v32, %v1353_v28  ;;  %v1383_v47 = vadd.f32 %v1375_v21, %v1354_v30  ;;  %v1384_v5 = vadd.f32 %v1376_v14, %v1355_v29  ;;  %v1385_v4 = vadd.f32 %v1377_v16, %v1356_v2  ;;  %v4082_v29 = vld [vmem:[#allocation2 + $0x80] sm:$0xff]  ;;  %v4084_v21 = vld [vmem:[#allocation2 + $0xb0] sm:$0xff] }
 0x15f   : > { %v1386_v52 = vadd.f32 %v1378_v42, %v1357_v60  ;;  %v1387_v56 = vadd.f32 %v1379_v41, %v1358_v27  ;;  %v1403_v61 = vmul.f32 %v5027_v22, %v4051_v43  ;;  %v1404_v32 = vmul.f32 %v5027_v22, %v4059_v24  ;;  %5028 = vst [vmem:[#allocation20_spill] sm:$0xff] %v4084_v21 }
 0x160   : > { %v1405_v28 = vmul.f32 %v5027_v22, %v4061_v12  ;;  %v1406_v25 = vmul.f32 %v5027_v22, %v3723_v17  ;;  %v1407_v30 = vmul.f32 %v5027_v22, %v3848_v15  ;;  %v1408_v2 = vmul.f32 %v5027_v22, %v4063_v36 }
 0x161   : > { %v1410_v60 = vadd.f32 %v1402_v39, %v1381_v35  ;;  %v1411_v27 = vadd.f32 %v1403_v61, %v1382_v45  ;;  %v1430_v14 = vmul.f32 %v2883_v13, %v3854_v58  ;;  %v1412_v16 = vadd.f32 %v1404_v32, %v1383_v47  ;;  %v5029_v58 = vld [vmem:[#allocation29_spill] sm:$0xff]  ;;  %v4098_v61 = vld [vmem:[#allocation2 + $0x81] sm:$0xff] }
 0x162   : > { %v1413_v42 = vadd.f32 %v1405_v28, %v1384_v5  ;;  %v1414_v41 = vadd.f32 %v1406_v25, %v1385_v4  ;;  %v1415_v12 = vadd.f32 %v1407_v30, %v1386_v52  ;;  %v1416_v24 = vadd.f32 %v1408_v2, %v1387_v56  ;;  %v2884_v4 = vld [vmem:[%s4779_s3 + $0x25] ss:$0 sm:$0xff]  ;;  %v4100_v32 = vld [vmem:[#allocation2 + $0xb1] sm:$0xff] }
 0x163   : > { %v1431_v17 = vmul.f32 %v2883_v13, %v3856_v18  ;;  %v1432_v15 = vmul.f32 %v2883_v13, %v3866_v59  ;;  %v1433_v43 = vmul.f32 %v2883_v13, %v3868_v37  ;;  %v1434_v35 = vmul.f32 %v2883_v13, %v4082_v29 }
 0x164   : > { %v1435_v45 = vmul.f32 %v2883_v13, %v3733_v51  ;;  %v1436_v22 = vmul.f32 %v2883_v13, %v3870_v62  ;;  %v1437_v39 = vmul.f32 %v2883_v13, %v4084_v21  ;;  %v1438_v52 = vadd.f32 %v1430_v14, %v5029_v58 }
 0x165   : > { %v1439_v47 = vadd.f32 %v1431_v17, %v1410_v60  ;;  %v1440_v5 = vadd.f32 %v1432_v15, %v1411_v27  ;;  %v1441_v56 = vadd.f32 %v1433_v43, %v1412_v16  ;;  %v1442_v28 = vadd.f32 %v1434_v35, %v1413_v42  ;;  %v4113_v42 = vld [vmem:[#allocation2 + $0x82] sm:$0xff] }
 0x166   : > { %v1443_v25 = vadd.f32 %v1435_v45, %v1414_v41  ;;  %v1444_v51 = vadd.f32 %v1436_v22, %v1415_v12  ;;  %v1445_v30 = vadd.f32 %v1437_v39, %v1416_v24  ;;  %v1459_v2 = vmul.f32 %v2884_v4, %v3876_v8  ;;  %v2885_v24 = vld [vmem:[%s4779_s3 + $0x26] ss:$0 sm:$0xff]  ;;  %v4115_v41 = vld [vmem:[#allocation2 + $0xb2] sm:$0xff] }
 0x167   : > { %v1460_v13 = vmul.f32 %v2884_v4, %v3886_v31  ;;  %v1461_v21 = vmul.f32 %v2884_v4, %v3888_v53  ;;  %v1462_v62 = vmul.f32 %v2884_v4, %v3890_v33  ;;  %v1463_v60 = vmul.f32 %v2884_v4, %v4098_v61 }
 0x168   : > { %v1464_v15 = vmul.f32 %v2884_v4, %v3749_v54  ;;  %v1465_v43 = vmul.f32 %v2884_v4, %v3895_v3  ;;  %v1466_v27 = vmul.f32 %v2884_v4, %v4100_v32  ;;  %v1467_v12 = vadd.f32 %v1459_v2, %v1438_v52 }
 0x169   : > { %v1468_v8 = vadd.f32 %v1460_v13, %v1439_v47  ;;  %v1469_v14 = vadd.f32 %v1461_v21, %v1440_v5  ;;  %v1470_v16 = vadd.f32 %v1462_v62, %v1441_v56  ;;  %v1471_v17 = vadd.f32 %v1463_v60, %v1442_v28  ;;  %v2886_v5 = vld [vmem:[%s4779_s3 + $0x27] ss:$0 sm:$0xff] }
 0x16a   : > { %v1472_v35 = vadd.f32 %v1464_v15, %v1443_v25  ;;  %v1473_v45 = vadd.f32 %v1465_v43, %v1444_v51  ;;  %v1474_v54 = vadd.f32 %v1466_v27, %v1445_v30  ;;  %v1488_v22 = vmul.f32 %v2885_v24, %v3899_v48  ;;  %v4128_v51 = vld [vmem:[#allocation2 + $0x83] sm:$0xff]  ;;  %v4130_v30 = vld [vmem:[#allocation2 + $0xb3] sm:$0xff] }
 0x16b   : > { %v1489_v39 = vmul.f32 %v2885_v24, %v3907_v34  ;;  %v1490_v4 = vmul.f32 %v2885_v24, %v3915_v50  ;;  %v1491_v58 = vmul.f32 %v2885_v24, %v3917_v7  ;;  %v1492_v52 = vmul.f32 %v2885_v24, %v4113_v42  ;;  %5030 = vst [vmem:[#allocation21_spill] sm:$0xff] %v4128_v51 }
 0x16c   : > { %v1493_v62 = vmul.f32 %v2885_v24, %v3764_v19  ;;  %v1494_v21 = vmul.f32 %v2885_v24, %v3919_v10  ;;  %v1495_v47 = vmul.f32 %v2885_v24, %v4115_v41  ;;  %v1496_v56 = vadd.f32 %v1488_v22, %v1467_v12  ;;  %5031 = vst [vmem:[#allocation22_spill] sm:$0xff] %v4130_v30  ;;  %v4143_v22 = vld [vmem:[#allocation2 + $0x84] sm:$0xff] }
 0x16d   : > { %v1497_v48 = vadd.f32 %v1489_v39, %v1468_v8  ;;  %v1498_v28 = vadd.f32 %v1490_v4, %v1469_v14  ;;  %v1499_v25 = vadd.f32 %v1491_v58, %v1470_v16  ;;  %v1500_v2 = vadd.f32 %v1492_v52, %v1471_v17  ;;  %v2887_v17 = vld [vmem:[%s4779_s3 + $0x28] ss:$0 sm:$0xff]  ;;  %5032 = vst [vmem:[#allocation23_spill] sm:$0xff] %v4143_v22  ;;  %v4145_v39 = vld [vmem:[#allocation2 + $0xb4] sm:$0xff] }
 0x16e   : > { %v1501_v13 = vadd.f32 %v1493_v62, %v1472_v35  ;;  %v1502_v60 = vadd.f32 %v1494_v21, %v1473_v45  ;;  %v1503_v19 = vadd.f32 %v1495_v47, %v1474_v54  ;;  %v1517_v15 = vmul.f32 %v2886_v5, %v3923_v57  ;;  %5033 = vst [vmem:[#allocation24_spill] sm:$0xff] %v4145_v39  ;;  %v5034_v62 = vld [vmem:[#allocation8_spill] sm:$0xff]  ;;  %v5035_v47 = vld [vmem:[#allocation26_spill] sm:$0xff] }
 0x16f   : > { %v1518_v43 = vmul.f32 %v2886_v5, %v3935_v20  ;;  %v1519_v27 = vmul.f32 %v2886_v5, %v3937_v9  ;;  %v1520_v24 = vmul.f32 %v2886_v5, %v3939_v26  ;;  %v1521_v12 = vmul.f32 %v2886_v5, %v4128_v51  ;;  %v5037_v51 = vld [vmem:[#allocation9_spill] sm:$0xff] }
 0x170   : > { %v1522_v8 = vmul.f32 %v2886_v5, %v3778_v6  ;;  %v1523_v14 = vmul.f32 %v2886_v5, %v3943_v0  ;;  %v1524_v16 = vmul.f32 %v2886_v5, %v4130_v30  ;;  %v1525_v35 = vadd.f32 %v1517_v15, %v1496_v56  ;;  %v5036_v30 = vld [vmem:[#allocation27_spill] sm:$0xff] }
 0x171   : > { %v1526_v57 = vadd.f32 %v1518_v43, %v1497_v48  ;;  %v1527_v45 = vadd.f32 %v1519_v27, %v1498_v28  ;;  %v1528_v54 = vadd.f32 %v1520_v24, %v1499_v25  ;;  %v1529_v4 = vadd.f32 %v1521_v12, %v1500_v2  ;;  %v5038_v48 = vld [vmem:[#allocation31_spill] sm:$0xff]  ;;  %v4160_v24 = vld [vmem:[#allocation2 + $0xb5] sm:$0xff] }
 0x172   : > { %v1530_v58 = vadd.f32 %v1522_v8, %v1501_v13  ;;  %v1531_v52 = vadd.f32 %v1523_v14, %v1502_v60  ;;  %v1532_v6 = vadd.f32 %v1524_v16, %v1503_v19  ;;  %v1546_v21 = vmul.f32 %v2887_v17, %v5034_v62  ;;  %v2888_v2 = vld [vmem:[%s4779_s3 + $0x29] ss:$0 sm:$0xff]  ;;  %5040 = vst [vmem:[#allocation29_spill] sm:$0xff] %v4160_v24 }
 0x173   : > { %v1547_v5 = vmul.f32 %v2887_v17, %v5035_v47  ;;  %v1548_v0 = vmul.f32 %v2887_v17, %v5036_v30  ;;  %v1549_v26 = vmul.f32 %v2887_v17, %v5037_v51  ;;  %v1550_v56 = vmul.f32 %v2887_v17, %v4143_v22  ;;  %v4158_v27 = vld [vmem:[#allocation2 + $0x85] sm:$0xff] }
 0x174   : > { %v1551_v28 = vmul.f32 %v2887_v17, %v5038_v48  ;;  %v1552_v25 = vmul.f32 %v2887_v17, %v3967_v11  ;;  %v1553_v15 = vmul.f32 %v2887_v17, %v4145_v39  ;;  %v1554_v13 = vadd.f32 %v1546_v21, %v1525_v35  ;;  %5039 = vst [vmem:[#allocation25_spill] sm:$0xff] %v4158_v27  ;;  %v5041_v48 = vld [vmem:[#allocation11_spill] sm:$0xff]  ;;  %v5042_v11 = vld [vmem:[#allocation12_spill] sm:$0xff] }
 0x175   : > { %v1555_v60 = vadd.f32 %v1547_v5, %v1526_v57  ;;  %v1556_v19 = vadd.f32 %v1548_v0, %v1527_v45  ;;  %v1557_v43 = vadd.f32 %v1549_v26, %v1528_v54  ;;  %v1558_v12 = vadd.f32 %v1550_v56, %v1529_v4  ;;  %v5043_v0 = vld [vmem:[#allocation32_spill] sm:$0xff]  ;;  %v2889_v54 = vld [vmem:[%s4779_s3 + $0x2a] ss:$0 sm:$0xff] }
 0x176   : > { %v1559_v8 = vadd.f32 %v1551_v28, %v1530_v58  ;;  %v1560_v14 = vadd.f32 %v1552_v25, %v1531_v52  ;;  %v1561_v16 = vadd.f32 %v1553_v15, %v1532_v6  ;;  %v1575_v62 = vmul.f32 %v2888_v2, %v3971_v38  ;;  %v4173_v6 = vld [vmem:[#allocation2 + $0x86] sm:$0xff]  ;;  %v4175_v21 = vld [vmem:[#allocation2 + $0xb6] sm:$0xff] }
 0x177   : > { %v1576_v17 = vmul.f32 %v2888_v2, %v3983_v23  ;;  %v1577_v39 = vmul.f32 %v2888_v2, %v5041_v48  ;;  %v1578_v22 = vmul.f32 %v2888_v2, %v5042_v11  ;;  %v1579_v35 = vmul.f32 %v2888_v2, %v4158_v27  ;;  %5044 = vst [vmem:[#allocation8_spill] sm:$0xff] %v4175_v21  ;;  %v5045_v15 = vld [vmem:[#allocation14_spill] sm:$0xff]  ;;  %v5048_v11 = vld [vmem:[#allocation16_spill] sm:$0xff] }
 0x178   : > { %v1580_v26 = vmul.f32 %v2888_v2, %v5043_v0  ;;  %v1581_v57 = vmul.f32 %v2888_v2, %v3991_v44  ;;  %v1582_v45 = vmul.f32 %v2888_v2, %v4160_v24  ;;  %v1583_v4 = vadd.f32 %v1575_v62, %v1554_v13  ;;  %v5046_v44 = vld [vmem:[#allocation15_spill] sm:$0xff]  ;;  %v5047_v24 = vld [vmem:[#allocation36_spill] sm:$0xff] }
 0x179   : > { %v1584_v38 = vadd.f32 %v1576_v17, %v1555_v60  ;;  %v1585_v58 = vadd.f32 %v1577_v39, %v1556_v19  ;;  %v1586_v52 = vadd.f32 %v1578_v22, %v1557_v43  ;;  %v1587_v5 = vadd.f32 %v1579_v35, %v1558_v12  ;;  %v5049_v39 = vld [vmem:[#allocation33_spill] sm:$0xff]  ;;  %v2890_v43 = vld [vmem:[%s4779_s3 + $0x2b] ss:$0 sm:$0xff] }
 0x17a   : > { %v1588_v56 = vadd.f32 %v1580_v26, %v1559_v8  ;;  %v1589_v28 = vadd.f32 %v1581_v57, %v1560_v14  ;;  %v1590_v25 = vadd.f32 %v1582_v45, %v1561_v16  ;;  %v1604_v0 = vmul.f32 %v2889_v54, %v5045_v15  ;;  %v4188_v62 = vld [vmem:[#allocation2 + $0x87] sm:$0xff]  ;;  %v4190_v17 = vld [vmem:[#allocation2 + $0xb7] sm:$0xff] }
 0x17b   : > { %v1605_v2 = vmul.f32 %v2889_v54, %v5046_v44  ;;  %v1606_v27 = vmul.f32 %v2889_v54, %v5047_v24  ;;  %v1607_v48 = vmul.f32 %v2889_v54, %v5048_v11  ;;  %v1608_v13 = vmul.f32 %v2889_v54, %v4173_v6  ;;  %5050 = vst [vmem:[#allocation26_spill] sm:$0xff] %v4188_v62 }
 0x17c   : > { %v1609_v22 = vmul.f32 %v2889_v54, %v5049_v39  ;;  %v1610_v60 = vmul.f32 %v2889_v54, %v4015_v63  ;;  %v1611_v19 = vmul.f32 %v2889_v54, %v4175_v21  ;;  %v1612_v12 = vadd.f32 %v1604_v0, %v1583_v4  ;;  %5051 = vst [vmem:[#allocation27_spill] sm:$0xff] %v4190_v17  ;;  %v5052_v21 = vld [vmem:[#allocation38_spill] sm:$0xff]  ;;  %v4205_v0 = vld [vmem:[#allocation2 + $0xb8] sm:$0xff] }
 0x17d   : > { %v1613_v8 = vadd.f32 %v1605_v2, %v1584_v38  ;;  %v1614_v14 = vadd.f32 %v1606_v27, %v1585_v58  ;;  %v1615_v16 = vadd.f32 %v1607_v48, %v1586_v52  ;;  %v1616_v35 = vadd.f32 %v1608_v13, %v1587_v5  ;;  %v5053_v27 = vld [vmem:[#allocation6_spill] sm:$0xff]  ;;  %v2891_v52 = vld [vmem:[%s4779_s3 + $0x2c] ss:$0 sm:$0xff]  ;;  %5054 = vst [vmem:[#allocation9_spill] sm:$0xff] %v4205_v0 }
 0x17e   : > { %v1617_v26 = vadd.f32 %v1609_v22, %v1588_v56  ;;  %v1618_v57 = vadd.f32 %v1610_v60, %v1589_v28  ;;  %v1619_v45 = vadd.f32 %v1611_v19, %v1590_v25  ;;  %v1633_v15 = vmul.f32 %v2890_v43, %v4019_v1  ;;  %v4203_v25 = vld [vmem:[#allocation2 + $0x88] sm:$0xff] }
 0x17f   : > { %v1634_v54 = vmul.f32 %v2890_v43, %v4031_v49  ;;  %v1635_v39 = vmul.f32 %v2890_v43, %v4033_v40  ;;  %v1636_v63 = vmul.f32 %v2890_v43, %v5052_v21  ;;  %v1637_v4 = vmul.f32 %v2890_v43, %v4188_v62  ;;  %v5057_v62 = vld [vmem:[#allocation19_spill] sm:$0xff] }
 0x180   : > { %v1638_v48 = vmul.f32 %v2890_v43, %v5053_v27  ;;  %v1639_v38 = vmul.f32 %v2890_v43, %v4039_v55  ;;  %v1640_v58 = vmul.f32 %v2890_v43, %v4190_v17  ;;  %v1641_v5 = vadd.f32 %v1633_v15, %v1612_v12  ;;  %v5055_v27 = vld [vmem:[#allocation28_spill] sm:$0xff]  ;;  %v5056_v17 = vld [vmem:[#allocation18_spill] sm:$0xff] }
 0x181   : > { %v1642_v1 = vadd.f32 %v1634_v54, %v1613_v8  ;;  %v1643_v56 = vadd.f32 %v1635_v39, %v1614_v14  ;;  %v1644_v28 = vadd.f32 %v1636_v63, %v1615_v16  ;;  %v1645_v2 = vadd.f32 %v1637_v4, %v1616_v35  ;;  %v5058_v8 = vld [vmem:[#allocation34_spill] sm:$0xff]  ;;  %v2892_v35 = vld [vmem:[%s4779_s3 + $0x2d] ss:$0 sm:$0xff]  ;;  %v4218_v15 = vld [vmem:[#allocation2 + $0x90] sm:$0xff] }
 0x182   : > { %v1646_v13 = vadd.f32 %v1638_v48, %v1617_v26  ;;  %v1647_v22 = vadd.f32 %v1639_v38, %v1618_v57  ;;  %v1648_v60 = vadd.f32 %v1640_v58, %v1619_v45  ;;  %v1662_v19 = vmul.f32 %v2891_v52, %v4043_v46  ;;  %v4220_v54 = vld [vmem:[#allocation2 + $0xc0] sm:$0xff] }
 0x183   : > { %v1663_v43 = vmul.f32 %v2891_v52, %v5055_v27  ;;  %v1664_v55 = vmul.f32 %v2891_v52, %v5056_v17  ;;  %v1665_v21 = vmul.f32 %v2891_v52, %v5057_v62  ;;  %v1666_v12 = vmul.f32 %v2891_v52, %v4203_v25 }
 0x184   : > { %v1667_v63 = vmul.f32 %v2891_v52, %v5058_v8  ;;  %v1668_v14 = vmul.f32 %v2891_v52, %v4063_v36  ;;  %v1669_v16 = vmul.f32 %v2891_v52, %v4205_v0  ;;  %v1670_v26 = vadd.f32 %v1662_v19, %v1641_v5 }
 0x185   : > { %v1671_v46 = vadd.f32 %v1663_v43, %v1642_v1  ;;  %v1672_v57 = vadd.f32 %v1664_v55, %v1643_v56  ;;  %v1673_v45 = vadd.f32 %v1665_v21, %v1644_v28  ;;  %v1674_v39 = vadd.f32 %v1666_v12, %v1645_v2  ;;  %v5059_v55 = vld [vmem:[#allocation35_spill] sm:$0xff]  ;;  %v5060_v1 = vld [vmem:[#allocation20_spill] sm:$0xff] }
 0x186   : > { %v1675_v4 = vadd.f32 %v1667_v63, %v1646_v13  ;;  %v1676_v48 = vadd.f32 %v1668_v14, %v1647_v22  ;;  %v1677_v38 = vadd.f32 %v1669_v16, %v1648_v60  ;;  %v1692_v58 = vmul.f32 %v2892_v35, %v3856_v18  ;;  %v2893_v2 = vld [vmem:[%s4779_s3 + $0x2e] ss:$0 sm:$0xff]  ;;  %v4233_v60 = vld [vmem:[#allocation2 + $0x91] sm:$0xff] }
 0x187   : > { %v1693_v52 = vmul.f32 %v2892_v35, %v3866_v59  ;;  %v1694_v8 = vmul.f32 %v2892_v35, %v3868_v37  ;;  %v1695_v0 = vmul.f32 %v2892_v35, %v4082_v29  ;;  %v1696_v5 = vmul.f32 %v2892_v35, %v4218_v15  ;;  %v4235_v37 = vld [vmem:[#allocation2 + $0xc1] sm:$0xff] }
 0x188   : > { %v1697_v21 = vmul.f32 %v2892_v35, %v5059_v55  ;;  %v1698_v56 = vmul.f32 %v2892_v35, %v5060_v1  ;;  %v1699_v28 = vmul.f32 %v2892_v35, %v4220_v54  ;;  %v1700_v13 = vadd.f32 %v1692_v58, %v1670_v26 }
 0x189   : > { %v1701_v18 = vadd.f32 %v1693_v52, %v1671_v46  ;;  %v1702_v22 = vadd.f32 %v1694_v8, %v1672_v57  ;;  %v1703_v59 = vadd.f32 %v1695_v0, %v1673_v45  ;;  %v1704_v19 = vadd.f32 %v1696_v5, %v1674_v39  ;;  %v2894_v45 = vld [vmem:[%s4779_s3 + $0x2f] ss:$0 sm:$0xff] }
 0x18a   : > { %v1705_v43 = vadd.f32 %v1697_v21, %v1675_v4  ;;  %v1706_v12 = vadd.f32 %v1698_v56, %v1676_v48  ;;  %v1707_v63 = vadd.f32 %v1699_v28, %v1677_v38  ;;  %v1721_v14 = vmul.f32 %v2893_v2, %v3886_v31  ;;  %v4248_v48 = vld [vmem:[#allocation2 + $0x92] sm:$0xff] }
 0x18b   : > { %v1722_v16 = vmul.f32 %v2893_v2, %v3888_v53  ;;  %v1723_v35 = vmul.f32 %v2893_v2, %v3890_v33  ;;  %v1724_v55 = vmul.f32 %v2893_v2, %v4098_v61  ;;  %v1725_v26 = vmul.f32 %v2893_v2, %v4233_v60  ;;  %v4250_v33 = vld [vmem:[#allocation2 + $0xc2] sm:$0xff] }
 0x18c   : > { %v1726_v0 = vmul.f32 %v2893_v2, %v3895_v3  ;;  %v1727_v46 = vmul.f32 %v2893_v2, %v4100_v32  ;;  %v1728_v57 = vmul.f32 %v2893_v2, %v4235_v37  ;;  %v1729_v39 = vadd.f32 %v1721_v14, %v1700_v13 }
 0x18d   : > { %v1730_v31 = vadd.f32 %v1722_v16, %v1701_v18  ;;  %v1731_v4 = vadd.f32 %v1723_v35, %v1702_v22  ;;  %v1732_v53 = vadd.f32 %v1724_v55, %v1703_v59  ;;  %v1733_v38 = vadd.f32 %v1725_v26, %v1704_v19  ;;  %v2895_v22 = vld [vmem:[%s4779_s3 + $0x30] ss:$0 sm:$0xff]  ;;  %v5061_v55 = vld [vmem:[#allocation7_spill] sm:$0xff] }
 0x18e   : > { %v1734_v58 = vadd.f32 %v1726_v0, %v1705_v43  ;;  %v1735_v52 = vadd.f32 %v1727_v46, %v1706_v12  ;;  %v1736_v3 = vadd.f32 %v1728_v57, %v1707_v63  ;;  %v1750_v8 = vmul.f32 %v2894_v45, %v3907_v34  ;;  %v4263_v43 = vld [vmem:[#allocation2 + $0x93] sm:$0xff] }
 0x18f   : > { %v1751_v5 = vmul.f32 %v2894_v45, %v3915_v50  ;;  %v1752_v21 = vmul.f32 %v2894_v45, %v3917_v7  ;;  %v1753_v56 = vmul.f32 %v2894_v45, %v4113_v42  ;;  %v1754_v28 = vmul.f32 %v2894_v45, %v4248_v48  ;;  %v4265_v7 = vld [vmem:[#allocation2 + $0xc3] sm:$0xff]  ;;  %v5062_v0 = vld [vmem:[#allocation21_spill] sm:$0xff] }
 0x190   : > { %v1755_v2 = vmul.f32 %v2894_v45, %v3919_v10  ;;  %v1756_v13 = vmul.f32 %v2894_v45, %v4115_v41  ;;  %v1757_v18 = vmul.f32 %v2894_v45, %v4250_v33  ;;  %v1758_v59 = vadd.f32 %v1750_v8, %v1729_v39  ;;  %v5063_v45 = vld [vmem:[#allocation30_spill] sm:$0xff] }
 0x191   : > { %v1759_v34 = vadd.f32 %v1751_v5, %v1730_v31  ;;  %v1760_v19 = vadd.f32 %v1752_v21, %v1731_v4  ;;  %v1761_v50 = vadd.f32 %v1753_v56, %v1732_v53  ;;  %v1762_v12 = vadd.f32 %v1754_v28, %v1733_v38  ;;  %v5064_v31 = vld [vmem:[#allocation22_spill] sm:$0xff]  ;;  %v2896_v38 = vld [vmem:[%s4779_s3 + $0x31] ss:$0 sm:$0xff] }
 0x192   : > { %v1763_v63 = vadd.f32 %v1755_v2, %v1734_v58  ;;  %v1764_v14 = vadd.f32 %v1756_v13, %v1735_v52  ;;  %v1765_v10 = vadd.f32 %v1757_v18, %v1736_v3  ;;  %v1779_v16 = vmul.f32 %v2895_v22, %v3935_v20  ;;  %v4278_v3 = vld [vmem:[#allocation2 + $0x94] sm:$0xff]  ;;  %v4280_v8 = vld [vmem:[#allocation2 + $0xc4] sm:$0xff] }
 0x193   : > { %v1780_v35 = vmul.f32 %v2895_v22, %v3937_v9  ;;  %v1781_v26 = vmul.f32 %v2895_v22, %v5061_v55  ;;  %v1782_v46 = vmul.f32 %v2895_v22, %v5062_v0  ;;  %v1783_v57 = vmul.f32 %v2895_v22, %v4263_v43  ;;  %5065 = vst [vmem:[#allocation31_spill] sm:$0xff] %v4280_v8 }
 0x194   : > { %v1784_v39 = vmul.f32 %v2895_v22, %v5063_v45  ;;  %v1785_v4 = vmul.f32 %v2895_v22, %v5064_v31  ;;  %v1786_v53 = vmul.f32 %v2895_v22, %v4265_v7  ;;  %v1787_v58 = vadd.f32 %v1779_v16, %v1758_v59  ;;  %v5066_v22 = vld [vmem:[#allocation23_spill] sm:$0xff] }
 0x195   : > { %v1788_v20 = vadd.f32 %v1780_v35, %v1759_v34  ;;  %v1789_v52 = vadd.f32 %v1781_v26, %v1760_v19  ;;  %v1790_v9 = vadd.f32 %v1782_v46, %v1761_v50  ;;  %v1791_v5 = vadd.f32 %v1783_v57, %v1762_v12  ;;  %v5067_v34 = vld [vmem:[#allocation10_spill] sm:$0xff]  ;;  %v5068_v50 = vld [vmem:[#allocation24_spill] sm:$0xff] }
 0x196   : > { %v1792_v21 = vadd.f32 %v1784_v39, %v1763_v63  ;;  %v1793_v56 = vadd.f32 %v1785_v4, %v1764_v14  ;;  %v1794_v28 = vadd.f32 %v1786_v53, %v1765_v10  ;;  %v1808_v2 = vmul.f32 %v2896_v38, %v5035_v47  ;;  %v2897_v12 = vld [vmem:[%s4779_s3 + $0x32] ss:$0 sm:$0xff]  ;;  %v4293_v10 = vld [vmem:[#allocation2 + $0x95] sm:$0xff]  ;;  %v5069_v4 = vld [vmem:[#allocation11_spill] sm:$0xff] }
 0x197   : > { %v1809_v13 = vmul.f32 %v2896_v38, %v5036_v30  ;;  %v1810_v18 = vmul.f32 %v2896_v38, %v5037_v51  ;;  %v1811_v55 = vmul.f32 %v2896_v38, %v5066_v22  ;;  %v1812_v59 = vmul.f32 %v2896_v38, %v4278_v3  ;;  %v4295_v51 = vld [vmem:[#allocation2 + $0xc5] sm:$0xff] }
 0x198   : > { %v1813_v19 = vmul.f32 %v2896_v38, %v5067_v34  ;;  %v1814_v16 = vmul.f32 %v2896_v38, %v5068_v50  ;;  %v1815_v35 = vmul.f32 %v2896_v38, %v4280_v8  ;;  %v1816_v63 = vadd.f32 %v1808_v2, %v1787_v58  ;;  %v5070_v38 = vld [vmem:[#allocation12_spill] sm:$0xff]  ;;  %v5071_v8 = vld [vmem:[#allocation25_spill] sm:$0xff] }
 0x199   : > { %v1817_v47 = vadd.f32 %v1809_v13, %v1788_v20  ;;  %v1818_v14 = vadd.f32 %v1810_v18, %v1789_v52  ;;  %v1819_v30 = vadd.f32 %v1811_v55, %v1790_v9  ;;  %v1820_v26 = vadd.f32 %v1812_v59, %v1791_v5  ;;  %v5072_v20 = vld [vmem:[#allocation13_spill] sm:$0xff]  ;;  %v2898_v5 = vld [vmem:[%s4779_s3 + $0x33] ss:$0 sm:$0xff]  ;;  %v4310_v55 = vld [vmem:[#allocation2 + $0xc6] sm:$0xff] }
 0x19a   : > { %v1821_v46 = vadd.f32 %v1813_v19, %v1792_v21  ;;  %v1822_v57 = vadd.f32 %v1814_v16, %v1793_v56  ;;  %v1823_v45 = vadd.f32 %v1815_v35, %v1794_v28  ;;  %v1837_v39 = vmul.f32 %v2897_v12, %v3983_v23  ;;  %v5073_v9 = vld [vmem:[#allocation29_spill] sm:$0xff]  ;;  %5074 = vst [vmem:[#allocation32_spill] sm:$0xff] %v4310_v55 }
 0x19b   : > { %v1838_v53 = vmul.f32 %v2897_v12, %v5069_v4  ;;  %v1839_v34 = vmul.f32 %v2897_v12, %v5070_v38  ;;  %v1840_v50 = vmul.f32 %v2897_v12, %v5071_v8  ;;  %v1841_v58 = vmul.f32 %v2897_v12, %v4293_v10  ;;  %v4308_v18 = vld [vmem:[#allocation2 + $0x96] sm:$0xff] }
 0x19c   : > { %v1842_v52 = vmul.f32 %v2897_v12, %v5072_v20  ;;  %v1843_v2 = vmul.f32 %v2897_v12, %v5073_v9  ;;  %v1844_v13 = vmul.f32 %v2897_v12, %v4295_v51  ;;  %v1845_v21 = vadd.f32 %v1837_v39, %v1816_v63 }
 0x19d   : > { %v1846_v23 = vadd.f32 %v1838_v53, %v1817_v47  ;;  %v1847_v56 = vadd.f32 %v1839_v34, %v1818_v14  ;;  %v1848_v28 = vadd.f32 %v1840_v50, %v1819_v30  ;;  %v1849_v59 = vadd.f32 %v1841_v58, %v1820_v26  ;;  %v5075_v47 = vld [vmem:[#allocation37_spill] sm:$0xff]  ;;  %v5076_v14 = vld [vmem:[#allocation8_spill] sm:$0xff] }
 0x19e   : > { %v1850_v19 = vadd.f32 %v1842_v52, %v1821_v46  ;;  %v1851_v16 = vadd.f32 %v1843_v2, %v1822_v57  ;;  %v1852_v35 = vadd.f32 %v1844_v13, %v1823_v45  ;;  %v1866_v4 = vmul.f32 %v2898_v5, %v5046_v44  ;;  %v2899_v26 = vld [vmem:[%s4779_s3 + $0x34] ss:$0 sm:$0xff]  ;;  %v4323_v45 = vld [vmem:[#allocation2 + $0x97] sm:$0xff] }
 0x19f   : > { %v1867_v12 = vmul.f32 %v2898_v5, %v5047_v24  ;;  %v1868_v38 = vmul.f32 %v2898_v5, %v5048_v11  ;;  %v1869_v20 = vmul.f32 %v2898_v5, %v4173_v6  ;;  %v1870_v63 = vmul.f32 %v2898_v5, %v4308_v18  ;;  %v4325_v11 = vld [vmem:[#allocation2 + $0xc7] sm:$0xff] }
 0x1a0   : > { %v1871_v50 = vmul.f32 %v2898_v5, %v5075_v47  ;;  %v1872_v30 = vmul.f32 %v2898_v5, %v5076_v14  ;;  %v1873_v39 = vmul.f32 %v2898_v5, %v4310_v55  ;;  %v1874_v46 = vadd.f32 %v1866_v4, %v1845_v21  ;;  %v5077_v5 = vld [vmem:[#allocation38_spill] sm:$0xff] }
 0x1a1   : > { %v1875_v44 = vadd.f32 %v1867_v12, %v1846_v23  ;;  %v1876_v57 = vadd.f32 %v1868_v38, %v1847_v56  ;;  %v1877_v24 = vadd.f32 %v1869_v20, %v1848_v28  ;;  %v1878_v53 = vadd.f32 %v1870_v63, %v1849_v59  ;;  %v5078_v55 = vld [vmem:[#allocation26_spill] sm:$0xff]  ;;  %v5079_v23 = vld [vmem:[#allocation17_spill] sm:$0xff]  ;;  %v5080_v28 = vld [vmem:[#allocation27_spill] sm:$0xff] }
 0x1a2   : > { %v1879_v34 = vadd.f32 %v1871_v50, %v1850_v19  ;;  %v1880_v58 = vadd.f32 %v1872_v30, %v1851_v16  ;;  %v1881_v52 = vadd.f32 %v1873_v39, %v1852_v35  ;;  %v1895_v2 = vmul.f32 %v2899_v26, %v4031_v49  ;;  %v2900_v59 = vld [vmem:[%s4779_s3 + $0x35] ss:$0 sm:$0xff]  ;;  %v4338_v35 = vld [vmem:[#allocation2 + $0x98] sm:$0xff]  ;;  %v4340_v38 = vld [vmem:[#allocation2 + $0xc8] sm:$0xff] }
 0x1a3   : > { %v1896_v13 = vmul.f32 %v2899_v26, %v4033_v40  ;;  %v1897_v47 = vmul.f32 %v2899_v26, %v5077_v5  ;;  %v1898_v14 = vmul.f32 %v2899_v26, %v5078_v55  ;;  %v1899_v21 = vmul.f32 %v2899_v26, %v4323_v45  ;;  %5081 = vst [vmem:[#allocation14_spill] sm:$0xff] %v4340_v38 }
 0x1a4   : > { %v1900_v56 = vmul.f32 %v2899_v26, %v5079_v23  ;;  %v1901_v4 = vmul.f32 %v2899_v26, %v5080_v28  ;;  %v1902_v12 = vmul.f32 %v2899_v26, %v4325_v11  ;;  %v1903_v19 = vadd.f32 %v1895_v2, %v1874_v46  ;;  %v4355_v2 = vld [vmem:[#allocation2 + $0xa0] sm:$0xff] }
 0x1a5   : > { %v1904_v49 = vadd.f32 %v1896_v13, %v1875_v44  ;;  %v1905_v16 = vadd.f32 %v1897_v47, %v1876_v57  ;;  %v1906_v40 = vadd.f32 %v1898_v14, %v1877_v24  ;;  %v1907_v20 = vadd.f32 %v1899_v21, %v1878_v53  ;;  %v5082_v44 = vld [vmem:[#allocation9_spill] sm:$0xff]  ;;  %v1941_v53 = vld [vmem:[#allocation2 + $0x60] sm:$0xff]  ;;  %v4357_v13 = vld [vmem:[#allocation2 + $0xd0] sm:$0xff] }
 0x1a6   : > { %v1908_v63 = vadd.f32 %v1900_v56, %v1879_v34  ;;  %v1909_v50 = vadd.f32 %v1901_v4, %v1880_v58  ;;  %v1910_v30 = vadd.f32 %v1902_v12, %v1881_v52  ;;  %v1924_v39 = vmul.f32 %v2900_v59, %v5055_v27  ;;  %v4350_v34 = vld [vmem:[#allocation2 + $0x70] sm:$0xff]  ;;  %5083 = vst [vmem:[#allocation15_spill] sm:$0xff] %v4357_v13 }
 0x1a7   : > { %v1925_v26 = vmul.f32 %v2900_v59, %v5056_v17  ;;  %v1926_v5 = vmul.f32 %v2900_v59, %v5057_v62  ;;  %v1927_v23 = vmul.f32 %v2900_v59, %v4203_v25  ;;  %v1928_v46 = vmul.f32 %v2900_v59, %v4338_v35  ;;  %v2901_v27 = vld [vmem:[%s4779_s3 + $0x36] ss:$0 sm:$0xff] }
 0x1a8   : > { %v1929_v14 = vmul.f32 %v2900_v59, %v4063_v36  ;;  %v1930_v57 = vmul.f32 %v2900_v59, %v5082_v44  ;;  %v1931_v24 = vmul.f32 %v2900_v59, %v4340_v38  ;;  %v1932_v17 = vadd.f32 %v1924_v39, %v1903_v19  ;;  %v1970_v39 = vld [vmem:[#allocation2 + $0x61] sm:$0xff] }
 0x1a9   : > { %v1933_v58 = vadd.f32 %v1925_v26, %v1904_v49  ;;  %v1934_v62 = vadd.f32 %v1926_v5, %v1905_v16  ;;  %v1935_v52 = vadd.f32 %v1927_v23, %v1906_v40  ;;  %v1936_v36 = vadd.f32 %v1928_v46, %v1907_v20  ;;  %v4366_v20 = vld [vmem:[#allocation2 + $0x71] sm:$0xff]  ;;  %v4371_v5 = vld [vmem:[#allocation2 + $0xa1] sm:$0xff] }
 0x1aa   : > { %v1937_v47 = vadd.f32 %v1929_v14, %v1908_v63  ;;  %v1938_v21 = vadd.f32 %v1930_v57, %v1909_v50  ;;  %v1939_v56 = vadd.f32 %v1931_v24, %v1910_v30  ;;  %v1954_v4 = vmul.f32 %v2901_v27, %v1941_v53  ;;  %v2902_v63 = vld [vmem:[%s4779_s3 + $0x37] ss:$0 sm:$0xff] }
 0x1ab   : > { %v1955_v12 = vmul.f32 %v2901_v27, %v4350_v34  ;;  %v1956_v59 = vmul.f32 %v2901_v27, %v4082_v29  ;;  %v1957_v38 = vmul.f32 %v2901_v27, %v4218_v15  ;;  %v1958_v19 = vmul.f32 %v2901_v27, %v4355_v2  ;;  %v4373_v23 = vld [vmem:[#allocation2 + $0xd1] sm:$0xff] }
 0x1ac   : > { %v1959_v49 = vmul.f32 %v2901_v27, %v5060_v1  ;;  %v1960_v16 = vmul.f32 %v2901_v27, %v4220_v54  ;;  %v1961_v40 = vmul.f32 %v2901_v27, %v4357_v13  ;;  %v1962_v50 = vadd.f32 %v1954_v4, %v1932_v17  ;;  %5084 = vst [vmem:[#allocation36_spill] sm:$0xff] %v4373_v23 }
 0x1ad   : > { %v1963_v30 = vadd.f32 %v1955_v12, %v1933_v58  ;;  %v1964_v29 = vadd.f32 %v1956_v59, %v1934_v62  ;;  %v1965_v26 = vadd.f32 %v1957_v38, %v1935_v52  ;;  %v1966_v1 = vadd.f32 %v1958_v19, %v1936_v36  ;;  %v1999_v52 = vld [vmem:[#allocation2 + $0x62] sm:$0xff]  ;;  %v4382_v36 = vld [vmem:[#allocation2 + $0x72] sm:$0xff] }
 0x1ae   : > { %v1967_v46 = vadd.f32 %v1959_v49, %v1937_v47  ;;  %v1968_v14 = vadd.f32 %v1960_v16, %v1938_v21  ;;  %v1969_v57 = vadd.f32 %v1961_v40, %v1939_v56  ;;  %v1983_v24 = vmul.f32 %v2902_v63, %v1970_v39  ;;  %v2903_v47 = vld [vmem:[%s4779_s3 + $0x38] ss:$0 sm:$0xff]  ;;  %v4387_v12 = vld [vmem:[#allocation2 + $0xa2] sm:$0xff] }
 0x1af   : > { %v1984_v53 = vmul.f32 %v2902_v63, %v4366_v20  ;;  %v1985_v27 = vmul.f32 %v2902_v63, %v4098_v61  ;;  %v1986_v13 = vmul.f32 %v2902_v63, %v4233_v60  ;;  %v1987_v17 = vmul.f32 %v2902_v63, %v4371_v5  ;;  %v4389_v59 = vld [vmem:[#allocation2 + $0xd2] sm:$0xff] }
 0x1b0   : > { %v1988_v58 = vmul.f32 %v2902_v63, %v4100_v32  ;;  %v1989_v38 = vmul.f32 %v2902_v63, %v4235_v37  ;;  %v1990_v62 = vmul.f32 %v2902_v63, %v4373_v23  ;;  %v1991_v21 = vadd.f32 %v1983_v24, %v1962_v50  ;;  %5085 = vst [vmem:[#allocation16_spill] sm:$0xff] %v4389_v59 }
 0x1b1   : > { %v1992_v56 = vadd.f32 %v1984_v53, %v1963_v30  ;;  %v1993_v61 = vadd.f32 %v1985_v27, %v1964_v29  ;;  %v1994_v4 = vadd.f32 %v1986_v13, %v1965_v26  ;;  %v1995_v32 = vadd.f32 %v1987_v17, %v1966_v1  ;;  %v2028_v26 = vld [vmem:[#allocation2 + $0x63] sm:$0xff]  ;;  %v4398_v1 = vld [vmem:[#allocation2 + $0x73] sm:$0xff] }
 0x1b2   : > { %v1996_v19 = vadd.f32 %v1988_v58, %v1967_v46  ;;  %v1997_v49 = vadd.f32 %v1989_v38, %v1968_v14  ;;  %v1998_v16 = vadd.f32 %v1990_v62, %v1969_v57  ;;  %v2012_v40 = vmul.f32 %v2903_v47, %v1999_v52  ;;  %v2904_v46 = vld [vmem:[%s4779_s3 + $0x39] ss:$0 sm:$0xff]  ;;  %v4403_v53 = vld [vmem:[#allocation2 + $0xa3] sm:$0xff] }
 0x1b3   : > { %v2013_v39 = vmul.f32 %v2903_v47, %v4382_v36  ;;  %v2014_v63 = vmul.f32 %v2903_v47, %v4113_v42  ;;  %v2015_v23 = vmul.f32 %v2903_v47, %v4248_v48  ;;  %v2016_v50 = vmul.f32 %v2903_v47, %v4387_v12  ;;  %v4405_v27 = vld [vmem:[#allocation2 + $0xd3] sm:$0xff] }
 0x1b4   : > { %v2017_v30 = vmul.f32 %v2903_v47, %v4115_v41  ;;  %v2018_v13 = vmul.f32 %v2903_v47, %v4250_v33  ;;  %v2019_v29 = vmul.f32 %v2903_v47, %v4389_v59  ;;  %v2020_v14 = vadd.f32 %v2012_v40, %v1991_v21  ;;  %5086 = vst [vmem:[#allocation33_spill] sm:$0xff] %v4405_v27 }
 0x1b5   : > { %v2021_v57 = vadd.f32 %v2013_v39, %v1992_v56  ;;  %v2022_v42 = vadd.f32 %v2014_v63, %v1993_v61  ;;  %v2023_v24 = vadd.f32 %v2015_v23, %v1994_v4  ;;  %v2024_v41 = vadd.f32 %v2016_v50, %v1995_v32  ;;  %v2057_v4 = vld [vmem:[#allocation2 + $0x64] sm:$0xff]  ;;  %v4414_v32 = vld [vmem:[#allocation2 + $0x74] sm:$0xff] }
 0x1b6   : > { %v2025_v17 = vadd.f32 %v2017_v30, %v1996_v19  ;;  %v2026_v58 = vadd.f32 %v2018_v13, %v1997_v49  ;;  %v2027_v38 = vadd.f32 %v2019_v29, %v1998_v16  ;;  %v2041_v62 = vmul.f32 %v2904_v46, %v2028_v26  ;;  %v2905_v19 = vld [vmem:[%s4779_s3 + $0x3a] ss:$0 sm:$0xff]  ;;  %v4419_v39 = vld [vmem:[#allocation2 + $0xa4] sm:$0xff] }
 0x1b7   : > { %v2042_v52 = vmul.f32 %v2904_v46, %v4398_v1  ;;  %v2043_v47 = vmul.f32 %v2904_v46, %v5062_v0  ;;  %v2044_v59 = vmul.f32 %v2904_v46, %v4263_v43  ;;  %v2045_v21 = vmul.f32 %v2904_v46, %v4403_v53  ;;  %5087 = vst [vmem:[#allocation6_spill] sm:$0xff] %v4419_v39  ;;  %v4421_v63 = vld [vmem:[#allocation2 + $0xd4] sm:$0xff] }
 0x1b8   : > { %v2046_v56 = vmul.f32 %v2904_v46, %v5064_v31  ;;  %v2047_v23 = vmul.f32 %v2904_v46, %v4265_v7  ;;  %v2048_v61 = vmul.f32 %v2904_v46, %v4405_v27  ;;  %v2049_v49 = vadd.f32 %v2041_v62, %v2020_v14  ;;  %5088 = vst [vmem:[#allocation28_spill] sm:$0xff] %v4421_v63 }
 0x1b9   : > { %v2050_v16 = vadd.f32 %v2042_v52, %v2021_v57  ;;  %v2051_v0 = vadd.f32 %v2043_v47, %v2022_v42  ;;  %v2052_v40 = vadd.f32 %v2044_v59, %v2023_v24  ;;  %v2053_v31 = vadd.f32 %v2045_v21, %v2024_v41  ;;  %v5089_v57 = vld [vmem:[#allocation24_spill] sm:$0xff]  ;;  %v5090_v59 = vld [vmem:[#allocation31_spill] sm:$0xff] }
 0x1ba   : > { %v2054_v50 = vadd.f32 %v2046_v56, %v2025_v17  ;;  %v2055_v30 = vadd.f32 %v2047_v23, %v2026_v58  ;;  %v2056_v13 = vadd.f32 %v2048_v61, %v2027_v38  ;;  %v2070_v29 = vmul.f32 %v2905_v19, %v2057_v4  ;;  %v2086_v52 = vld [vmem:[#allocation2 + $0x65] sm:$0xff]  ;;  %v4430_v41 = vld [vmem:[#allocation2 + $0x75] sm:$0xff] }
 0x1bb   : > { %v2071_v26 = vmul.f32 %v2905_v19, %v4414_v32  ;;  %v2072_v46 = vmul.f32 %v2905_v19, %v5066_v22  ;;  %v2073_v27 = vmul.f32 %v2905_v19, %v4278_v3  ;;  %v2074_v14 = vmul.f32 %v2905_v19, %v4419_v39  ;;  %v2906_v17 = vld [vmem:[%s4779_s3 + $0x3b] ss:$0 sm:$0xff]  ;;  %v4435_v21 = vld [vmem:[#allocation2 + $0xa5] sm:$0xff] }
 0x1bc   : > { %v2075_v42 = vmul.f32 %v2905_v19, %v5089_v57  ;;  %v2076_v24 = vmul.f32 %v2905_v19, %v5090_v59  ;;  %v2077_v62 = vmul.f32 %v2905_v19, %v4421_v63  ;;  %v2078_v58 = vadd.f32 %v2070_v29, %v2049_v49  ;;  %v4437_v56 = vld [vmem:[#allocation2 + $0xd5] sm:$0xff] }
 0x1bd   : > { %v2079_v38 = vadd.f32 %v2071_v26, %v2050_v16  ;;  %v2080_v22 = vadd.f32 %v2072_v46, %v2051_v0  ;;  %v2081_v47 = vadd.f32 %v2073_v27, %v2052_v40  ;;  %5091 = vst [vmem:[#allocation18_spill] sm:$0xff] %v4437_v56  ;;  %v2082_v23 = vadd.f32 %v2074_v14, %v2053_v31  ;;  %v2115_v40 = vld [vmem:[#allocation2 + $0x66] sm:$0xff]  ;;  %v4446_v31 = vld [vmem:[#allocation2 + $0x76] sm:$0xff] }
 0x1be   : > { %v2083_v61 = vadd.f32 %v2075_v42, %v2054_v50  ;;  %v2084_v4 = vadd.f32 %v2076_v24, %v2055_v30  ;;  %v2085_v57 = vadd.f32 %v2077_v62, %v2056_v13  ;;  %v2099_v19 = vmul.f32 %v2906_v17, %v2086_v52  ;;  %v2907_v50 = vld [vmem:[%s4779_s3 + $0x3c] ss:$0 sm:$0xff]  ;;  %v4451_v26 = vld [vmem:[#allocation2 + $0xa6] sm:$0xff] }
 0x1bf   : > { %v2100_v63 = vmul.f32 %v2906_v17, %v4430_v41  ;;  %v2101_v59 = vmul.f32 %v2906_v17, %v5071_v8  ;;  %v2102_v39 = vmul.f32 %v2906_v17, %v4293_v10  ;;  %v2103_v49 = vmul.f32 %v2906_v17, %v4435_v21  ;;  %5092 = vst [vmem:[#allocation19_spill] sm:$0xff] %v4451_v26  ;;  %v4453_v46 = vld [vmem:[#allocation2 + $0xd6] sm:$0xff] }
 0x1c0   : > { %v2104_v16 = vmul.f32 %v2906_v17, %v5073_v9  ;;  %v2105_v27 = vmul.f32 %v2906_v17, %v4295_v51  ;;  %v2106_v0 = vmul.f32 %v2906_v17, %v4437_v56  ;;  %v2107_v30 = vadd.f32 %v2099_v19, %v2078_v58  ;;  %5093 = vst [vmem:[#allocation34_spill] sm:$0xff] %v4453_v46 }
 0x1c1   : > { %v2108_v13 = vadd.f32 %v2100_v63, %v2079_v38  ;;  %v2109_v8 = vadd.f32 %v2101_v59, %v2080_v22  ;;  %v2110_v29 = vadd.f32 %v2102_v39, %v2081_v47  ;;  %v2111_v9 = vadd.f32 %v2103_v49, %v2082_v23  ;;  %v5094_v63 = vld [vmem:[#allocation8_spill] sm:$0xff]  ;;  %v2144_v47 = vld [vmem:[#allocation2 + $0x67] sm:$0xff] }
 0x1c2   : > { %v2112_v14 = vadd.f32 %v2104_v16, %v2083_v61  ;;  %v2113_v42 = vadd.f32 %v2105_v27, %v2084_v4  ;;  %v2114_v24 = vadd.f32 %v2106_v0, %v2085_v57  ;;  %v2128_v62 = vmul.f32 %v2907_v50, %v2115_v40  ;;  %v5095_v39 = vld [vmem:[#allocation32_spill] sm:$0xff]  ;;  %v2908_v61 = vld [vmem:[%s4779_s3 + $0x3d] ss:$0 sm:$0xff]  ;;  %v4467_v49 = vld [vmem:[#allocation2 + $0xa7] sm:$0xff] }
 0x1c3   : > { %v2129_v52 = vmul.f32 %v2907_v50, %v4446_v31  ;;  %v2130_v17 = vmul.f32 %v2907_v50, %v4173_v6  ;;  %v2131_v56 = vmul.f32 %v2907_v50, %v4308_v18  ;;  %v2132_v58 = vmul.f32 %v2907_v50, %v4451_v26  ;;  %v4462_v23 = vld [vmem:[#allocation2 + $0x77] sm:$0xff] }
 0x1c4   : > { %v2133_v59 = vmul.f32 %v2907_v50, %v5094_v63  ;;  %v2134_v38 = vmul.f32 %v2907_v50, %v5095_v39  ;;  %v2135_v22 = vmul.f32 %v2907_v50, %v4453_v46  ;;  %v2136_v4 = vadd.f32 %v2128_v62, %v2107_v30  ;;  %v4469_v16 = vld [vmem:[#allocation2 + $0xd7] sm:$0xff] }
 0x1c5   : > { %v2137_v57 = vadd.f32 %v2129_v52, %v2108_v13  ;;  %v2138_v6 = vadd.f32 %v2130_v17, %v2109_v8  ;;  %v2139_v19 = vadd.f32 %v2131_v56, %v2110_v29  ;;  %5096 = vst [vmem:[#allocation35_spill] sm:$0xff] %v4469_v16  ;;  %v2140_v27 = vadd.f32 %v2132_v58, %v2111_v9  ;;  %v2173_v29 = vld [vmem:[#allocation2 + $0x68] sm:$0xff]  ;;  %v4478_v9 = vld [vmem:[#allocation2 + $0x78] sm:$0xff] }
 0x1c6   : > { %v2141_v0 = vadd.f32 %v2133_v59, %v2112_v14  ;;  %v2142_v40 = vadd.f32 %v2134_v38, %v2113_v42  ;;  %v2143_v63 = vadd.f32 %v2135_v22, %v2114_v24  ;;  %v2157_v50 = vmul.f32 %v2908_v61, %v2144_v47  ;;  %v2909_v14 = vld [vmem:[%s4779_s3 + $0x3e] ss:$0 sm:$0xff]  ;;  %v4483_v52 = vld [vmem:[#allocation2 + $0xa8] sm:$0xff] }
 0x1c7   : > { %v2158_v46 = vmul.f32 %v2908_v61, %v4462_v23  ;;  %v2159_v39 = vmul.f32 %v2908_v61, %v5078_v55  ;;  %v2160_v26 = vmul.f32 %v2908_v61, %v4323_v45  ;;  %v2161_v30 = vmul.f32 %v2908_v61, %v4467_v49  ;;  %v4485_v17 = vld [vmem:[#allocation2 + $0xd8] sm:$0xff] }
 0x1c8   : > { %v2162_v13 = vmul.f32 %v2908_v61, %v5080_v28  ;;  %v2163_v56 = vmul.f32 %v2908_v61, %v4325_v11  ;;  %v2164_v8 = vmul.f32 %v2908_v61, %v4469_v16  ;;  %v2165_v42 = vadd.f32 %v2157_v50, %v2136_v4  ;;  %5097 = vst [vmem:[#allocation20_spill] sm:$0xff] %v4485_v17  ;;  %v4501_v50 = vld [vmem:[#allocation2 + $0xe0] sm:$0xff] }
 0x1c9   : > { %v2166_v24 = vadd.f32 %v2158_v46, %v2137_v57  ;;  %v2167_v55 = vadd.f32 %v2159_v39, %v2138_v6  ;;  %v2168_v62 = vadd.f32 %v2160_v26, %v2139_v19  ;;  %v2169_v28 = vadd.f32 %v2161_v30, %v2140_v27  ;;  %v5098_v26 = vld [vmem:[#allocation14_spill] sm:$0xff]  ;;  %v2910_v19 = vld [vmem:[%s4779_s3 + $0x3f] ss:$0 sm:$0xff]  ;;  %5099 = vst [vmem:[#allocation7_spill] sm:$0xff] %v4501_v50 }
 0x1ca   : > { %v2170_v58 = vadd.f32 %v2162_v13, %v2141_v0  ;;  %v2171_v59 = vadd.f32 %v2163_v56, %v2142_v40  ;;  %v2172_v38 = vadd.f32 %v2164_v8, %v2143_v63  ;;  %v2186_v22 = vmul.f32 %v2909_v14, %v2173_v29  ;;  %v4494_v6 = vld [vmem:[#allocation2 + $0x80] sm:$0xff]  ;;  %v4499_v63 = vld [vmem:[#allocation2 + $0xb0] sm:$0xff] }
 0x1cb   : > { %v2187_v47 = vmul.f32 %v2909_v14, %v4478_v9  ;;  %v2188_v61 = vmul.f32 %v2909_v14, %v4203_v25  ;;  %v2189_v16 = vmul.f32 %v2909_v14, %v4338_v35  ;;  %v2190_v4 = vmul.f32 %v2909_v14, %v4483_v52 }
 0x1cc   : > { %v2191_v46 = vmul.f32 %v2909_v14, %v5082_v44  ;;  %v2192_v39 = vmul.f32 %v2909_v14, %v5098_v26  ;;  %v2193_v57 = vmul.f32 %v2909_v14, %v4485_v17  ;;  %v2194_v27 = vadd.f32 %v2186_v22, %v2165_v42  ;;  %v4516_v22 = vld [vmem:[#allocation2 + $0xb1] sm:$0xff] }
 0x1cd   : > { %v2195_v0 = vadd.f32 %v2187_v47, %v2166_v24  ;;  %v2196_v40 = vadd.f32 %v2188_v61, %v2167_v55  ;;  %v2197_v25 = vadd.f32 %v2189_v16, %v2168_v62  ;;  %v2198_v30 = vadd.f32 %v2190_v4, %v2169_v28  ;;  %v5100_v24 = vld [vmem:[#allocation15_spill] sm:$0xff] }
 0x1ce   : > { %v2199_v44 = vadd.f32 %v2191_v46, %v2170_v58  ;;  %v2200_v13 = vadd.f32 %v2192_v39, %v2171_v59  ;;  %v2201_v56 = vadd.f32 %v2193_v57, %v2172_v38  ;;  %v2216_v8 = vmul.f32 %v2910_v19, %v4350_v34  ;;  %v4511_v28 = vld [vmem:[#allocation2 + $0x81] sm:$0xff]  ;;  %v2911_v34 = vld [vmem:[%s4779_s3 + $0x40] ss:$0 sm:$0xff] }
 0x1cf   : > { %v2217_v29 = vmul.f32 %v2910_v19, %v4494_v6  ;;  %v2218_v14 = vmul.f32 %v2910_v19, %v4218_v15  ;;  %v2219_v17 = vmul.f32 %v2910_v19, %v4355_v2  ;;  %v2220_v42 = vmul.f32 %v2910_v19, %v4499_v63  ;;  %v4518_v47 = vld [vmem:[#allocation2 + $0xe1] sm:$0xff] }
 0x1d0   : > { %v2221_v16 = vmul.f32 %v2910_v19, %v4220_v54  ;;  %v2222_v55 = vmul.f32 %v2910_v19, %v5100_v24  ;;  %v2223_v62 = vmul.f32 %v2910_v19, %v4501_v50  ;;  %v2224_v58 = vadd.f32 %v2216_v8, %v2194_v27  ;;  %5101 = vst [vmem:[#allocation21_spill] sm:$0xff] %v4518_v47  ;;  %v4533_v8 = vld [vmem:[#allocation2 + $0xb2] sm:$0xff] }
 0x1d1   : > { %v2225_v59 = vadd.f32 %v2217_v29, %v2195_v0  ;;  %v2226_v38 = vadd.f32 %v2218_v14, %v2196_v40  ;;  %v2227_v15 = vadd.f32 %v2219_v17, %v2197_v25  ;;  %v2228_v61 = vadd.f32 %v2220_v42, %v2198_v30  ;;  %v5102_v0 = vld [vmem:[#allocation36_spill] sm:$0xff]  ;;  %v4528_v30 = vld [vmem:[#allocation2 + $0x82] sm:$0xff] }
 0x1d2   : > { %v2229_v54 = vadd.f32 %v2221_v16, %v2199_v44  ;;  %v2230_v4 = vadd.f32 %v2222_v55, %v2200_v13  ;;  %v2231_v46 = vadd.f32 %v2223_v62, %v2201_v56  ;;  %v2245_v39 = vmul.f32 %v2911_v34, %v4366_v20  ;;  %v2912_v20 = vld [vmem:[%s4779_s3 + $0x41] ss:$0 sm:$0xff]  ;;  %v4535_v29 = vld [vmem:[#allocation2 + $0xe2] sm:$0xff] }
 0x1d3   : > { %v2246_v57 = vmul.f32 %v2911_v34, %v4511_v28  ;;  %v2247_v19 = vmul.f32 %v2911_v34, %v4233_v60  ;;  %v2248_v50 = vmul.f32 %v2911_v34, %v4371_v5  ;;  %v2249_v27 = vmul.f32 %v2911_v34, %v4516_v22  ;;  %5103 = vst [vmem:[#allocation30_spill] sm:$0xff] %v4535_v29 }
 0x1d4   : > { %v2250_v17 = vmul.f32 %v2911_v34, %v4235_v37  ;;  %v2251_v40 = vmul.f32 %v2911_v34, %v5102_v0  ;;  %v2252_v25 = vmul.f32 %v2911_v34, %v4518_v47  ;;  %v2253_v44 = vadd.f32 %v2245_v39, %v2224_v58  ;;  %v4550_v39 = vld [vmem:[#allocation2 + $0xb3] sm:$0xff] }
 0x1d5   : > { %v2254_v13 = vadd.f32 %v2246_v57, %v2225_v59  ;;  %v2255_v56 = vadd.f32 %v2247_v19, %v2226_v38  ;;  %v2256_v60 = vadd.f32 %v2248_v50, %v2227_v15  ;;  %v2257_v14 = vadd.f32 %v2249_v27, %v2228_v61  ;;  %v5104_v59 = vld [vmem:[#allocation16_spill] sm:$0xff]  ;;  %v4545_v61 = vld [vmem:[#allocation2 + $0x83] sm:$0xff] }
 0x1d6   : > { %v2258_v37 = vadd.f32 %v2250_v17, %v2229_v54  ;;  %v2259_v42 = vadd.f32 %v2251_v40, %v2230_v4  ;;  %v2260_v16 = vadd.f32 %v2252_v25, %v2231_v46  ;;  %v2274_v55 = vmul.f32 %v2912_v20, %v4382_v36  ;;  %v2913_v36 = vld [vmem:[%s4779_s3 + $0x42] ss:$0 sm:$0xff]  ;;  %v4552_v57 = vld [vmem:[#allocation2 + $0xe3] sm:$0xff] }
 0x1d7   : > { %v2275_v62 = vmul.f32 %v2912_v20, %v4528_v30  ;;  %v2276_v34 = vmul.f32 %v2912_v20, %v4248_v48  ;;  %v2277_v47 = vmul.f32 %v2912_v20, %v4387_v12  ;;  %v2278_v58 = vmul.f32 %v2912_v20, %v4533_v8  ;;  %5105 = vst [vmem:[#allocation22_spill] sm:$0xff] %v4552_v57 }
 0x1d8   : > { %v2279_v50 = vmul.f32 %v2912_v20, %v4250_v33  ;;  %v2280_v38 = vmul.f32 %v2912_v20, %v5104_v59  ;;  %v2281_v15 = vmul.f32 %v2912_v20, %v4535_v29  ;;  %v2282_v54 = vadd.f32 %v2274_v55, %v2253_v44  ;;  %v4567_v55 = vld [vmem:[#allocation2 + $0xb4] sm:$0xff] }
 0x1d9   : > { %v2283_v4 = vadd.f32 %v2275_v62, %v2254_v13  ;;  %v2284_v46 = vadd.f32 %v2276_v34, %v2255_v56  ;;  %v2285_v48 = vadd.f32 %v2277_v47, %v2256_v60  ;;  %v2286_v19 = vadd.f32 %v2278_v58, %v2257_v14  ;;  %v5106_v13 = vld [vmem:[#allocation33_spill] sm:$0xff]  ;;  %v4562_v14 = vld [vmem:[#allocation2 + $0x84] sm:$0xff] }
 0x1da   : > { %v2287_v33 = vadd.f32 %v2279_v50, %v2258_v37  ;;  %v2288_v27 = vadd.f32 %v2280_v38, %v2259_v42  ;;  %v2289_v17 = vadd.f32 %v2281_v15, %v2260_v16  ;;  %v2303_v40 = vmul.f32 %v2913_v36, %v4398_v1  ;;  %v2914_v1 = vld [vmem:[%s4779_s3 + $0x43] ss:$0 sm:$0xff]  ;;  %v4569_v62 = vld [vmem:[#allocation2 + $0xe4] sm:$0xff] }
 0x1db   : > { %v2304_v25 = vmul.f32 %v2913_v36, %v4545_v61  ;;  %v2305_v20 = vmul.f32 %v2913_v36, %v4263_v43  ;;  %v2306_v29 = vmul.f32 %v2913_v36, %v4403_v53  ;;  %v2307_v44 = vmul.f32 %v2913_v36, %v4550_v39  ;;  %5107 = vst [vmem:[#allocation23_spill] sm:$0xff] %v4569_v62 }
 0x1dc   : > { %v2308_v47 = vmul.f32 %v2913_v36, %v4265_v7  ;;  %v2309_v56 = vmul.f32 %v2913_v36, %v5106_v13  ;;  %v2310_v60 = vmul.f32 %v2913_v36, %v4552_v57  ;;  %v2311_v37 = vadd.f32 %v2303_v40, %v2282_v54  ;;  %v5108_v57 = vld [vmem:[#allocation6_spill] sm:$0xff] }
 0x1dd   : > { %v2312_v42 = vadd.f32 %v2304_v25, %v2283_v4  ;;  %v2313_v16 = vadd.f32 %v2305_v20, %v2284_v46  ;;  %v2314_v43 = vadd.f32 %v2306_v29, %v2285_v48  ;;  %v2315_v34 = vadd.f32 %v2307_v44, %v2286_v19  ;;  %v5109_v4 = vld [vmem:[#allocation31_spill] sm:$0xff]  ;;  %v5110_v46 = vld [vmem:[#allocation28_spill] sm:$0xff] }
 0x1de   : > { %v2316_v7 = vadd.f32 %v2308_v47, %v2287_v33  ;;  %v2317_v58 = vadd.f32 %v2309_v56, %v2288_v27  ;;  %v2318_v50 = vadd.f32 %v2310_v60, %v2289_v17  ;;  %v2332_v38 = vmul.f32 %v2914_v1, %v4414_v32  ;;  %v4579_v19 = vld [vmem:[#allocation2 + $0x85] sm:$0xff]  ;;  %v2915_v32 = vld [vmem:[%s4779_s3 + $0x44] ss:$0 sm:$0xff]  ;;  %v4584_v25 = vld [vmem:[#allocation2 + $0xb5] sm:$0xff] }
 0x1df   : > { %v2333_v15 = vmul.f32 %v2914_v1, %v4562_v14  ;;  %v2334_v36 = vmul.f32 %v2914_v1, %v4278_v3  ;;  %v2335_v13 = vmul.f32 %v2914_v1, %v5108_v57  ;;  %v2336_v54 = vmul.f32 %v2914_v1, %v4567_v55  ;;  %v4586_v20 = vld [vmem:[#allocation2 + $0xe5] sm:$0xff] }
 0x1e0   : > { %v2337_v29 = vmul.f32 %v2914_v1, %v5109_v4  ;;  %v2338_v48 = vmul.f32 %v2914_v1, %v5110_v46  ;;  %v2339_v40 = vmul.f32 %v2914_v1, %v4569_v62  ;;  %v2340_v33 = vadd.f32 %v2332_v38, %v2311_v37  ;;  %5111 = vst [vmem:[#allocation10_spill] sm:$0xff] %v4586_v20  ;;  %v4601_v38 = vld [vmem:[#allocation2 + $0xb6] sm:$0xff] }
 0x1e1   : > { %v2341_v27 = vadd.f32 %v2333_v15, %v2312_v42  ;;  %v2342_v17 = vadd.f32 %v2334_v36, %v2313_v16  ;;  %v2343_v3 = vadd.f32 %v2335_v13, %v2314_v43  ;;  %v2344_v44 = vadd.f32 %v2336_v54, %v2315_v34  ;;  %v5112_v42 = vld [vmem:[#allocation18_spill] sm:$0xff] }
 0x1e2   : > { %v2345_v47 = vadd.f32 %v2337_v29, %v2316_v7  ;;  %v2346_v56 = vadd.f32 %v2338_v48, %v2317_v58  ;;  %v2347_v60 = vadd.f32 %v2339_v40, %v2318_v50  ;;  %v2361_v1 = vmul.f32 %v2915_v32, %v4430_v41  ;;  %v4596_v34 = vld [vmem:[#allocation2 + $0x86] sm:$0xff]  ;;  %v2916_v41 = vld [vmem:[%s4779_s3 + $0x45] ss:$0 sm:$0xff] }
 0x1e3   : > { %v2362_v4 = vmul.f32 %v2915_v32, %v4579_v19  ;;  %v2363_v62 = vmul.f32 %v2915_v32, %v4293_v10  ;;  %v2364_v46 = vmul.f32 %v2915_v32, %v4435_v21  ;;  %v2365_v37 = vmul.f32 %v2915_v32, %v4584_v25  ;;  %v4603_v15 = vld [vmem:[#allocation2 + $0xe6] sm:$0xff] }
 0x1e4   : > { %v2366_v13 = vmul.f32 %v2915_v32, %v4295_v51  ;;  %v2367_v16 = vmul.f32 %v2915_v32, %v5112_v42  ;;  %v2368_v43 = vmul.f32 %v2915_v32, %v4586_v20  ;;  %v2369_v7 = vadd.f32 %v2361_v1, %v2340_v33  ;;  %5113 = vst [vmem:[#allocation11_spill] sm:$0xff] %v4603_v15  ;;  %v5114_v20 = vld [vmem:[#allocation19_spill] sm:$0xff]  ;;  %v4618_v1 = vld [vmem:[#allocation2 + $0xb7] sm:$0xff] }
 0x1e5   : > { %v2370_v58 = vadd.f32 %v2362_v4, %v2341_v27  ;;  %v2371_v50 = vadd.f32 %v2363_v62, %v2342_v17  ;;  %v2372_v10 = vadd.f32 %v2364_v46, %v2343_v3  ;;  %v2373_v36 = vadd.f32 %v2365_v37, %v2344_v44  ;;  %v5115_v62 = vld [vmem:[#allocation32_spill] sm:$0xff]  ;;  %v5116_v27 = vld [vmem:[#allocation34_spill] sm:$0xff] }
 0x1e6   : > { %v2374_v51 = vadd.f32 %v2366_v13, %v2345_v47  ;;  %v2375_v54 = vadd.f32 %v2367_v16, %v2346_v56  ;;  %v2376_v29 = vadd.f32 %v2368_v43, %v2347_v60  ;;  %v2390_v48 = vmul.f32 %v2916_v41, %v4446_v31  ;;  %v4613_v44 = vld [vmem:[#allocation2 + $0x87] sm:$0xff]  ;;  %v2917_v31 = vld [vmem:[%s4779_s3 + $0x46] ss:$0 sm:$0xff] }
 0x1e7   : > { %v2391_v40 = vmul.f32 %v2916_v41, %v4596_v34  ;;  %v2392_v32 = vmul.f32 %v2916_v41, %v4308_v18  ;;  %v2393_v42 = vmul.f32 %v2916_v41, %v5114_v20  ;;  %v2394_v33 = vmul.f32 %v2916_v41, %v4601_v38  ;;  %v4620_v4 = vld [vmem:[#allocation2 + $0xe7] sm:$0xff] }
 0x1e8   : > { %v2395_v46 = vmul.f32 %v2916_v41, %v5115_v62  ;;  %v2396_v17 = vmul.f32 %v2916_v41, %v5116_v27  ;;  %v2397_v3 = vmul.f32 %v2916_v41, %v4603_v15  ;;  %v2398_v47 = vadd.f32 %v2390_v48, %v2369_v7  ;;  %5117 = vst [vmem:[#allocation12_spill] sm:$0xff] %v4620_v4  ;;  %v4635_v48 = vld [vmem:[#allocation2 + $0xb8] sm:$0xff] }
 0x1e9   : > { %v2399_v56 = vadd.f32 %v2391_v40, %v2370_v58  ;;  %v2400_v60 = vadd.f32 %v2392_v32, %v2371_v50  ;;  %v2401_v18 = vadd.f32 %v2393_v42, %v2372_v10  ;;  %v2402_v37 = vadd.f32 %v2394_v33, %v2373_v36  ;;  %v5118_v58 = vld [vmem:[#allocation35_spill] sm:$0xff]  ;;  %5119 = vst [vmem:[#allocation25_spill] sm:$0xff] %v4635_v48 }
 0x1ea   : > { %v2403_v13 = vadd.f32 %v2395_v46, %v2374_v51  ;;  %v2404_v16 = vadd.f32 %v2396_v17, %v2375_v54  ;;  %v2405_v43 = vadd.f32 %v2397_v3, %v2376_v29  ;;  %v2419_v41 = vmul.f32 %v2917_v31, %v4462_v23  ;;  %v4630_v36 = vld [vmem:[#allocation2 + $0x88] sm:$0xff]  ;;  %v2918_v23 = vld [vmem:[%s4779_s3 + $0x47] ss:$0 sm:$0xff] }
 0x1eb   : > { %v2420_v62 = vmul.f32 %v2917_v31, %v4613_v44  ;;  %v2421_v15 = vmul.f32 %v2917_v31, %v4323_v45  ;;  %v2422_v27 = vmul.f32 %v2917_v31, %v4467_v49  ;;  %v2423_v7 = vmul.f32 %v2917_v31, %v4618_v1  ;;  %v4637_v40 = vld [vmem:[#allocation2 + $0xe8] sm:$0xff] }
 0x1ec   : > { %v2424_v42 = vmul.f32 %v2917_v31, %v4325_v11  ;;  %v2425_v50 = vmul.f32 %v2917_v31, %v5118_v58  ;;  %v2426_v10 = vmul.f32 %v2917_v31, %v4620_v4  ;;  %v2427_v51 = vadd.f32 %v2419_v41, %v2398_v47  ;;  %5120 = vst [vmem:[#allocation13_spill] sm:$0xff] %v4637_v40  ;;  %v2472_v41 = vld [vmem:[#allocation2 + $0xf0] sm:$0xff] }
 0x1ed   : > { %v2428_v54 = vadd.f32 %v2420_v62, %v2399_v56  ;;  %v2429_v29 = vadd.f32 %v2421_v15, %v2400_v60  ;;  %v2430_v45 = vadd.f32 %v2422_v27, %v2401_v18  ;;  %v2431_v32 = vadd.f32 %v2423_v7, %v2402_v37  ;;  %v5121_v27 = vld [vmem:[#allocation20_spill] sm:$0xff]  ;;  %v2919_v37 = vld [vmem:[%s4779_s3 + $0x48] ss:$0 sm:$0xff] }
 0x1ee   : > { %v2432_v11 = vadd.f32 %v2424_v42, %v2403_v13  ;;  %v2433_v33 = vadd.f32 %v2425_v50, %v2404_v16  ;;  %v2434_v46 = vadd.f32 %v2426_v10, %v2405_v43  ;;  %v2448_v17 = vmul.f32 %v2918_v23, %v4478_v9  ;;  %v2466_v18 = vld [vmem:[#allocation2 + $0x90] sm:$0xff] }
 0x1ef   : > { %v2449_v3 = vmul.f32 %v2918_v23, %v4630_v36  ;;  %v2450_v31 = vmul.f32 %v2918_v23, %v4338_v35  ;;  %v2451_v4 = vmul.f32 %v2918_v23, %v4483_v52  ;;  %v2452_v47 = vmul.f32 %v2918_v23, %v4635_v48  ;;  %v2469_v35 = vld [vmem:[#allocation2 + $0xc0] sm:$0xff] }
 0x1f0   : > { %v2453_v15 = vmul.f32 %v2918_v23, %v5098_v26  ;;  %v2454_v56 = vmul.f32 %v2918_v23, %v5121_v27  ;;  %v2455_v60 = vmul.f32 %v2918_v23, %v4637_v40  ;;  %v2456_v9 = vadd.f32 %v2448_v17, %v2427_v51  ;;  %v5122_v51 = vld [vmem:[#allocation7_spill] sm:$0xff]  ;;  %v2501_v17 = vld [vmem:[#allocation2 + $0xf1] sm:$0xff] }
 0x1f1   : > { %v2457_v13 = vadd.f32 %v2449_v3, %v2428_v54  ;;  %v2458_v16 = vadd.f32 %v2450_v31, %v2429_v29  ;;  %v2459_v43 = vadd.f32 %v2451_v4, %v2430_v45  ;;  %v2460_v62 = vadd.f32 %v2452_v47, %v2431_v32  ;;  %v2495_v4 = vld [vmem:[#allocation2 + $0x91] sm:$0xff]  ;;  %v2920_v45 = vld [vmem:[%s4779_s3 + $0x49] ss:$0 sm:$0xff] }
 0x1f2   : > { %v2461_v7 = vadd.f32 %v2453_v15, %v2432_v11  ;;  %v2462_v42 = vadd.f32 %v2454_v56, %v2433_v33  ;;  %v2463_v50 = vadd.f32 %v2455_v60, %v2434_v46  ;;  %v2478_v26 = vmul.f32 %v2919_v37, %v4494_v6  ;;  %v2498_v46 = vld [vmem:[#allocation2 + $0xc1] sm:$0xff] }
 0x1f3   : > { %v2479_v10 = vmul.f32 %v2919_v37, %v2466_v18  ;;  %v2480_v23 = vmul.f32 %v2919_v37, %v4355_v2  ;;  %v2481_v40 = vmul.f32 %v2919_v37, %v4499_v63  ;;  %v2482_v27 = vmul.f32 %v2919_v37, %v2469_v35  ;;  %v2527_v35 = vld [vmem:[#allocation2 + $0xc2] sm:$0xff] }
 0x1f4   : > { %v2483_v48 = vmul.f32 %v2919_v37, %v5100_v24  ;;  %v2484_v54 = vmul.f32 %v2919_v37, %v5122_v51  ;;  %v2485_v29 = vmul.f32 %v2919_v37, %v2472_v41  ;;  %v2486_v32 = vadd.f32 %v2478_v26, %v2456_v9  ;;  %v5123_v37 = vld [vmem:[#allocation21_spill] sm:$0xff]  ;;  %v5124_v51 = vld [vmem:[#allocation30_spill] sm:$0xff] }
 0x1f5   : > { %v2487_v11 = vadd.f32 %v2479_v10, %v2457_v13  ;;  %v2488_v33 = vadd.f32 %v2480_v23, %v2458_v16  ;;  %v2489_v6 = vadd.f32 %v2481_v40, %v2459_v43  ;;  %v2490_v2 = vadd.f32 %v2482_v27, %v2460_v62  ;;  %v2524_v40 = vld [vmem:[#allocation2 + $0x92] sm:$0xff] }
 0x1f6   : > { %v2491_v3 = vadd.f32 %v2483_v48, %v2461_v7  ;;  %v2492_v63 = vadd.f32 %v2484_v54, %v2462_v42  ;;  %v2493_v31 = vadd.f32 %v2485_v29, %v2463_v50  ;;  %v2507_v24 = vmul.f32 %v2920_v45, %v4511_v28  ;;  %v2921_v48 = vld [vmem:[%s4779_s3 + $0x4a] ss:$0 sm:$0xff]  ;;  %v2530_v41 = vld [vmem:[#allocation2 + $0xf2] sm:$0xff] }
 0x1f7   : > { %v2508_v47 = vmul.f32 %v2920_v45, %v2495_v4  ;;  %v2509_v15 = vmul.f32 %v2920_v45, %v4371_v5  ;;  %v2510_v56 = vmul.f32 %v2920_v45, %v4516_v22  ;;  %v2511_v60 = vmul.f32 %v2920_v45, %v2498_v46  ;;  %v2553_v4 = vld [vmem:[#allocation2 + $0x93] sm:$0xff] }
 0x1f8   : > { %v2512_v18 = vmul.f32 %v2920_v45, %v5102_v0  ;;  %v2513_v9 = vmul.f32 %v2920_v45, %v5123_v37  ;;  %v2514_v13 = vmul.f32 %v2920_v45, %v2501_v17  ;;  %v2515_v27 = vadd.f32 %v2507_v24, %v2486_v32  ;;  %v2922_v45 = vld [vmem:[%s4779_s3 + $0x4b] ss:$0 sm:$0xff]  ;;  %v2559_v46 = vld [vmem:[#allocation2 + $0xf3] sm:$0xff] }
 0x1f9   : > { %v2516_v16 = vadd.f32 %v2508_v47, %v2487_v11  ;;  %v2517_v43 = vadd.f32 %v2509_v15, %v2488_v33  ;;  %v2518_v28 = vadd.f32 %v2510_v56, %v2489_v6  ;;  %v2519_v5 = vadd.f32 %v2511_v60, %v2490_v2  ;;  %v2556_v6 = vld [vmem:[#allocation2 + $0xc3] sm:$0xff]  ;;  %v5125_v47 = vld [vmem:[#allocation33_spill] sm:$0xff] }
 0x1fa   : > { %v2520_v62 = vadd.f32 %v2512_v18, %v2491_v3  ;;  %v2521_v22 = vadd.f32 %v2513_v9, %v2492_v63  ;;  %v2522_v7 = vadd.f32 %v2514_v13, %v2493_v31  ;;  %v2536_v0 = vmul.f32 %v2921_v48, %v4528_v30  ;;  %v5126_v56 = vld [vmem:[#allocation22_spill] sm:$0xff]  ;;  %v2582_v37 = vld [vmem:[#allocation2 + $0x94] sm:$0xff]  ;;  %v2923_v9 = vld [vmem:[%s4779_s3 + $0x4c] ss:$0 sm:$0xff] }
 0x1fb   : > { %v2537_v42 = vmul.f32 %v2921_v48, %v2524_v40  ;;  %v2538_v50 = vmul.f32 %v2921_v48, %v4387_v12  ;;  %v2539_v26 = vmul.f32 %v2921_v48, %v4533_v8  ;;  %v2540_v10 = vmul.f32 %v2921_v48, %v2527_v35 }
 0x1fc   : > { %v2541_v23 = vmul.f32 %v2921_v48, %v5104_v59  ;;  %v2542_v54 = vmul.f32 %v2921_v48, %v5124_v51  ;;  %v2543_v29 = vmul.f32 %v2921_v48, %v2530_v41  ;;  %v2544_v32 = vadd.f32 %v2536_v0, %v2515_v27  ;;  %v2585_v27 = vld [vmem:[#allocation2 + $0xc4] sm:$0xff] }
 0x1fd   : > { %v2545_v11 = vadd.f32 %v2537_v42, %v2516_v16  ;;  %v2546_v33 = vadd.f32 %v2538_v50, %v2517_v43  ;;  %v2547_v30 = vadd.f32 %v2539_v26, %v2518_v28  ;;  %v2548_v12 = vadd.f32 %v2540_v10, %v2519_v5  ;;  %v2588_v16 = vld [vmem:[#allocation2 + $0xf4] sm:$0xff]  ;;  %v5128_v42 = vld [vmem:[#allocation23_spill] sm:$0xff] }
 0x1fe   : > { %v2549_v17 = vadd.f32 %v2541_v23, %v2520_v62  ;;  %v2550_v8 = vadd.f32 %v2542_v54, %v2521_v22  ;;  %v2551_v2 = vadd.f32 %v2543_v29, %v2522_v7  ;;  %v2565_v59 = vmul.f32 %v2922_v45, %v4545_v61  ;;  %v5127_v7 = vld [vmem:[#allocation28_spill] sm:$0xff]  ;;  %v2924_v23 = vld [vmem:[%s4779_s3 + $0x4d] ss:$0 sm:$0xff] }
 0x1ff   : > { %v2566_v3 = vmul.f32 %v2922_v45, %v2553_v4  ;;  %v2567_v63 = vmul.f32 %v2922_v45, %v4403_v53  ;;  %v2568_v31 = vmul.f32 %v2922_v45, %v4550_v39  ;;  %v2569_v24 = vmul.f32 %v2922_v45, %v2556_v6  ;;  %v2611_v10 = vld [vmem:[#allocation2 + $0x95] sm:$0xff]  ;;  %v2614_v4 = vld [vmem:[#allocation2 + $0xc5] sm:$0xff] }
 0x200   : > { %v2570_v15 = vmul.f32 %v2922_v45, %v5125_v47  ;;  %v2571_v60 = vmul.f32 %v2922_v45, %v5126_v56  ;;  %v2572_v18 = vmul.f32 %v2922_v45, %v2559_v46  ;;  %v2573_v13 = vadd.f32 %v2565_v59, %v2544_v32  ;;  %v2617_v45 = vld [vmem:[#allocation2 + $0xf5] sm:$0xff]  ;;  %v2643_v56 = vld [vmem:[#allocation2 + $0xc6] sm:$0xff] }
 0x201   : > { %v2574_v40 = vadd.f32 %v2566_v3, %v2545_v11  ;;  %v2575_v48 = vadd.f32 %v2567_v63, %v2546_v33  ;;  %v2576_v61 = vadd.f32 %v2568_v31, %v2547_v30  ;;  %v2577_v53 = vadd.f32 %v2569_v24, %v2548_v12  ;;  %v2640_v63 = vld [vmem:[#allocation2 + $0x96] sm:$0xff]  ;;  %v2925_v31 = vld [vmem:[%s4779_s3 + $0x4e] ss:$0 sm:$0xff] }
 0x202   : > { %v2578_v43 = vadd.f32 %v2570_v15, %v2549_v17  ;;  %v2579_v39 = vadd.f32 %v2571_v60, %v2550_v8  ;;  %v2580_v28 = vadd.f32 %v2572_v18, %v2551_v2  ;;  %v2594_v35 = vmul.f32 %v2923_v9, %v4562_v14  ;;  %v5129_v17 = vld [vmem:[#allocation18_spill] sm:$0xff]  ;;  %v2646_v60 = vld [vmem:[#allocation2 + $0xf6] sm:$0xff] }
 0x203   : > { %v2595_v41 = vmul.f32 %v2923_v9, %v2582_v37  ;;  %v2596_v5 = vmul.f32 %v2923_v9, %v5108_v57  ;;  %v2597_v62 = vmul.f32 %v2923_v9, %v4567_v55  ;;  %v2598_v22 = vmul.f32 %v2923_v9, %v2585_v27  ;;  %v5130_v2 = vld [vmem:[#allocation10_spill] sm:$0xff] }
 0x204   : > { %v2599_v0 = vmul.f32 %v2923_v9, %v5127_v7  ;;  %v2600_v50 = vmul.f32 %v2923_v9, %v5128_v42  ;;  %v2601_v26 = vmul.f32 %v2923_v9, %v2588_v16  ;;  %v2602_v51 = vadd.f32 %v2594_v35, %v2573_v13  ;;  %v5131_v27 = vld [vmem:[#allocation34_spill] sm:$0xff]  ;;  %v2926_v35 = vld [vmem:[%s4779_s3 + $0x4f] ss:$0 sm:$0xff] }
 0x205   : > { %v2603_v54 = vadd.f32 %v2595_v41, %v2574_v40  ;;  %v2604_v29 = vadd.f32 %v2596_v5, %v2575_v48  ;;  %v2605_v14 = vadd.f32 %v2597_v62, %v2576_v61  ;;  %v2606_v57 = vadd.f32 %v2598_v22, %v2577_v53  ;;  %v5132_v53 = vld [vmem:[#allocation11_spill] sm:$0xff] }
 0x206   : > { %v2607_v32 = vadd.f32 %v2599_v0, %v2578_v43  ;;  %v2608_v55 = vadd.f32 %v2600_v50, %v2579_v39  ;;  %v2609_v11 = vadd.f32 %v2601_v26, %v2580_v28  ;;  %v2623_v33 = vmul.f32 %v2924_v23, %v4579_v19  ;;  %v2669_v28 = vld [vmem:[#allocation2 + $0x97] sm:$0xff]  ;;  %v2672_v22 = vld [vmem:[#allocation2 + $0xc7] sm:$0xff] }
 0x207   : > { %v2624_v30 = vmul.f32 %v2924_v23, %v2611_v10  ;;  %v2625_v6 = vmul.f32 %v2924_v23, %v4435_v21  ;;  %v2626_v46 = vmul.f32 %v2924_v23, %v4584_v25  ;;  %v2627_v12 = vmul.f32 %v2924_v23, %v2614_v4 }
 0x208   : > { %v2628_v8 = vmul.f32 %v2924_v23, %v5129_v17  ;;  %v2629_v59 = vmul.f32 %v2924_v23, %v5130_v2  ;;  %v2630_v3 = vmul.f32 %v2924_v23, %v2617_v45  ;;  %v2631_v24 = vadd.f32 %v2623_v33, %v2602_v51  ;;  %v2698_v45 = vld [vmem:[#allocation2 + $0x98] sm:$0xff]  ;;  %v2701_v33 = vld [vmem:[#allocation2 + $0xc8] sm:$0xff] }
 0x209   : > { %v2632_v47 = vadd.f32 %v2624_v30, %v2603_v54  ;;  %v2633_v15 = vadd.f32 %v2625_v6, %v2604_v29  ;;  %v2634_v19 = vadd.f32 %v2626_v46, %v2605_v14  ;;  %v2635_v21 = vadd.f32 %v2627_v12, %v2606_v57  ;;  %v5133_v29 = vld [vmem:[#allocation12_spill] sm:$0xff]  ;;  %v2704_v30 = vld [vmem:[#allocation2 + $0xf8] sm:$0xff] }
 0x20a   : > { %v2636_v18 = vadd.f32 %v2628_v8, %v2607_v32  ;;  %v2637_v25 = vadd.f32 %v2629_v59, %v2608_v55  ;;  %v2638_v37 = vadd.f32 %v2630_v3, %v2609_v11  ;;  %v2652_v9 = vmul.f32 %v2925_v31, %v4596_v34  ;;  %v2927_v57 = vld [vmem:[%s4779_s3 + $0x50] ss:$0 sm:$0xff]  ;;  %v5134_v8 = vld [vmem:[#allocation25_spill] sm:$0xff] }
 0x20b   : > { %v2653_v13 = vmul.f32 %v2925_v31, %v2640_v63  ;;  %v2654_v40 = vmul.f32 %v2925_v31, %v5114_v20  ;;  %v2655_v48 = vmul.f32 %v2925_v31, %v4601_v38  ;;  %v2656_v61 = vmul.f32 %v2925_v31, %v2643_v56  ;;  %v2675_v20 = vld [vmem:[#allocation2 + $0xf7] sm:$0xff] }
 0x20c   : > { %v2657_v16 = vmul.f32 %v2925_v31, %v5131_v27  ;;  %v2658_v43 = vmul.f32 %v2925_v31, %v5132_v53  ;;  %v2659_v39 = vmul.f32 %v2925_v31, %v2646_v60  ;;  %v2660_v41 = vadd.f32 %v2652_v9, %v2631_v24  ;;  %v5135_v3 = vld [vmem:[#allocation20_spill] sm:$0xff]  ;;  %v5136_v31 = vld [vmem:[#allocation13_spill] sm:$0xff] }
 0x20d   : > { %v2661_v5 = vadd.f32 %v2653_v13, %v2632_v47  ;;  %v2662_v34 = vadd.f32 %v2654_v40, %v2633_v15  ;;  %v2663_v62 = vadd.f32 %v2655_v48, %v2634_v19  ;;  %v2664_v7 = vadd.f32 %v2656_v61, %v2635_v21  ;;  %v2928_v15 = vld [vmem:[%s4780_s4] ss:$0 sm:$0xff] }
 0x20e   : > { %v2665_v38 = vadd.f32 %v2657_v16, %v2636_v18  ;;  %v2666_v0 = vadd.f32 %v2658_v43, %v2637_v25  ;;  %v2667_v42 = vadd.f32 %v2659_v39, %v2638_v37  ;;  %v2681_v50 = vmul.f32 %v2926_v35, %v4613_v44 }
 0x20f   : > { %v2682_v26 = vmul.f32 %v2926_v35, %v2669_v28  ;;  %v2683_v10 = vmul.f32 %v2926_v35, %v4467_v49  ;;  %v2684_v23 = vmul.f32 %v2926_v35, %v4618_v1  ;;  %v2685_v51 = vmul.f32 %v2926_v35, %v2672_v22 }
 0x210   : > { %v2686_v54 = vmul.f32 %v2926_v35, %v5118_v58  ;;  %v2687_v14 = vmul.f32 %v2926_v35, %v5133_v29  ;;  %v2688_v4 = vmul.f32 %v2926_v35, %v2675_v20  ;;  %v2689_v32 = vadd.f32 %v2681_v50, %v2660_v41 }
 0x211   : > { %v2690_v55 = vadd.f32 %v2682_v26, %v2661_v5  ;;  %v2691_v44 = vadd.f32 %v2683_v10, %v2662_v34  ;;  %v2692_v11 = vadd.f32 %v2684_v23, %v2663_v62  ;;  %v2693_v49 = vadd.f32 %v2685_v51, %v2664_v7 }
 0x212   : > { %v2694_v1 = vadd.f32 %v2686_v54, %v2665_v38  ;;  %v2695_v6 = vadd.f32 %v2687_v14, %v2666_v0  ;;  %v2696_v58 = vadd.f32 %v2688_v4, %v2667_v42  ;;  %v2710_v46 = vmul.f32 %v2927_v57, %v4630_v36 }
 0x213   : > { %v2711_v12 = vmul.f32 %v2927_v57, %v2698_v45  ;;  %v2712_v17 = vmul.f32 %v2927_v57, %v4483_v52  ;;  %v2713_v2 = vmul.f32 %v2927_v57, %v5134_v8  ;;  %v2714_v59 = vmul.f32 %v2927_v57, %v2701_v33 }
 0x214   : > { %v2715_v63 = vmul.f32 %v2927_v57, %v5135_v3  ;;  %v2716_v24 = vmul.f32 %v2927_v57, %v5136_v31  ;;  %v2717_v47 = vmul.f32 %v2927_v57, %v2704_v30  ;;  %v2718_v19 = vadd.f32 %v2710_v46, %v2689_v32 }
 0x215   : > { %v2719_v56 = vadd.f32 %v2711_v12, %v2690_v55  ;;  %v2720_v60 = vadd.f32 %v2712_v17, %v2691_v44  ;;  %v2721_v36 = vadd.f32 %v2713_v2, %v2692_v11  ;;  %v2722_v21 = vadd.f32 %v2714_v59, %v2693_v49 }
 0x216   : > { %v2723_v18 = vadd.f32 %v2715_v63, %v2694_v1  ;;  %v2724_v25 = vadd.f32 %v2716_v24, %v2695_v6  ;;  %v2725_v52 = vadd.f32 %v2717_v47, %v2696_v58  ;;  %v2733_v37 = vadd.f32 %v2928_v15, %v2718_v19 }
 0x217   : > { %v2734_v9 = vadd.f32 %v2928_v15, %v2719_v56  ;;  %v2735_v13 = vadd.f32 %v2928_v15, %v2720_v60  ;;  %v2736_v40 = vadd.f32 %v2928_v15, %v2721_v36  ;;  %v2737_v48 = vadd.f32 %v2928_v15, %v2722_v21 }
 0x218   : > { %v2738_v61 = vadd.f32 %v2928_v15, %v2723_v18  ;;  %v2739_v27 = vadd.f32 %v2928_v15, %v2724_v25  ;;  %v2740_v16 = vadd.f32 %v2928_v15, %v2725_v52  ;;  %v2741_v53 = vpack.c.bf16 %v2733_v37, %v2733_v37 }
 0x219   : > { %v2742_v43 = vpack.c.bf16 %v2734_v9, %v2734_v9  ;;  %v2743_v39 = vpack.c.bf16 %v2735_v13, %v2735_v13  ;;  %v2744_v28 = vpack.c.bf16 %v2736_v40, %v2736_v40  ;;  %v2745_v35 = vpack.c.bf16 %v2737_v48, %v2737_v48 }
 0x21a   : > { %v2746_v41 = vpack.c.bf16 %v2738_v61, %v2738_v61  ;;  %v2747_v5 = vpack.c.bf16 %v2739_v27, %v2739_v27  ;;  %v2748_v34 = vpack.c.bf16 %v2740_v16, %v2740_v16  ;;  %2750 = vst.msk [vmem:[%s217_s7] sm:$0xf] %vm2749_vm1, %v2741_v53 }
 0x21b   : > { %2751 = vst.msk [vmem:[%s217_s7 + $0x4] sm:$0xf] %vm2749_vm1, %v2742_v43  ;;  %2752 = vst.msk [vmem:[%s217_s7 + $0x8] sm:$0xf] %vm2749_vm1, %v2743_v39 }
 0x21c   : > { %2753 = vst.msk [vmem:[%s217_s7 + $0xc] sm:$0xf] %vm2749_vm1, %v2744_v28  ;;  %2754 = vst.msk [vmem:[%s217_s7 + $0x10] sm:$0xf] %vm2749_vm1, %v2745_v35 }
 0x21d   : > { %2755 = vst.msk [vmem:[%s217_s7 + $0x14] sm:$0xf] %vm2749_vm1, %v2746_v41  ;;  %2756 = vst.msk [vmem:[%s217_s7 + $0x18] sm:$0xf] %vm2749_vm1, %v2747_v5 }
 0x21e   : > { %2757 = vst.msk [vmem:[%s217_s7 + $0x1c] sm:$0xf] %vm2749_vm1, %v2748_v34 }
 0x21f   : > { %3010 = shalt.err (!%p3007_p3)
}
 0x220   : > { %s3011_s16 = scalar_lea.hbm %s4729_s11, 512  ;;  %s3015_s25 = scalar_lea.hbm %s4781_s5, 1024 }
 0x221   : > { %p3012_p4 = scmp.ne.s32.totalorder %s4729_s11, %s3011_s16  ;;  %p3016_p9 = scmp.lt.u32.totalorder %s4729_s11, %s4781_s5 }
 0x222   : > { %p3017_p10 = scmp.lt.u32.totalorder %s3015_s25, %s3011_s16  ;;  %p3019_p12 = scmp.lt.u32.totalorder %s3011_s16, %s4729_s11 }
 0x223   : > { %p3013_p7 = pnand %p3012_p4, %p3133_p5 }
 0x224   : > { %p3018_p11 = por %p3017_p10, %p3016_p9 }
 0x225   : > { %p3014_p8 = pneg %p3013_p7 }
 0x226   : > { %p3020_p13 = por %p3019_p12, %p3018_p11 }
 0x228   : > { %p3021_p0 = pnand %p3020_p13, %p3014_p8 }
 0x22a   : > { %3024 = shalt.err (!%p3021_p0)
}
 0x22b   : > { %s3063_s6 = smov 64   ;;  %s3064_s7 = smov 4  }
 0x22c   : > { %2953 = dma.vmem_to_hbm [thread:$0]  (%p3133_p5), %s4731_s8, 512, %s4729_s11, %s4735_s22, %s3063_s6, %s3063_s6, %s3064_s7  }
 0x22d PF: > { %p2959_p1 = scmp.ge.s32.totalorder %s3059_s21, 2  ;;  %s2787_s9 = sand.u32 1, %s3047_s18  }
 0x22e   : > { %s2788_s10 = scalar_lea.sflag [#allocation4], %s2787_s9 }
 0x22f   : > { %p2956_p2 = pnand %p2959_p1, %p3137_p6 }
 0x231   : > { %3042 = dma.done.wait (!%p2956_p2), %s2788_s10, 512  }
 0x232   : > { %3044 = vsyncadd (!%p2956_p2), %s2788_s10, 4294966784  ;;  %p15_p3 = scmp.ge.s32.totalorder %s3120_s24, 4   ;;  %s5137_s18 = smov %s3051_s19 }
 0x233   : > { %s5138_s19 = smov %s3055_s20  ;;  %s5139_s20 = smov %s3131_s27 }
 0x234   : > { %s5140_s21 = smov %s3120_s24  ;;  %17 = sbr.rel (!%p15_p3) target bundleno = 3 (0x3), region = 83 }
 0x23b   :  { %2793 = vsyncpa [#allocation4], 1 }
 0x23c   :  { %2795 = vsyncpa [#allocation4 + $0x1], 1 }

</bundles_post_ra>
